<compile_context>
chip_gen: v7x
topology: tpu7x:2x2x1
jax: 0.10.0
libtpu: 0.0.40
codegen_flags: <defaults>
</compile_context>

<pallas_src>
import functools

import numpy as np
import jax
import jax.numpy as jnp
from jax import lax
from jax.experimental import pallas as pl
from jax.experimental.pallas import tpu as pltpu


def _round_up(x, m):
    return (x + m - 1) // m * m


def _device_kind():
    try:
        return jax.devices()[0].device_kind.lower()
    except Exception:
        return ""


def _auto_compute_dtype():
    # bf16 on v6e / v7x (bf16 MXU + bf16 VPU/EUP); f32 on v5e and older
    # (no bf16 VPU/EUP -> per-step casts are pure overhead).
    kind = _device_kind()
    if ("v6" in kind) or ("v7" in kind):
        return jnp.bfloat16
    return jnp.float32


def lstm_fc_kernel(x_ref,                       # (Tt*Bp, I)  time-major rows of this chunk
                   wih0_ref, whh0_ref, b0_ref,  # (I,4Hp), (Hp,4Hp), (1,4Hp)
                   w1_ref, b1_ref,              # (2Hp,4Hp), (1,4Hp)  [Wih1; Whh1]
                   fc1w_ref, fc1b_ref,          # (Hp,Hp), (1,Hp)
                   fc2w_ref, fc2b_ref,          # (Hp,Op), (1,Op)
                   out_ref,                     # (Bp, Op)
                   gx_ref, h0_ref, c0_ref, h1_ref, c1_ref,   # scratch
                   *, full_steps, rem_steps, unroll_n, split_layer1):
    Bp, Hp = h0_ref.shape
    c_idx = pl.program_id(0)
    n_chunks = pl.num_programs(0)

    @pl.when(c_idx == 0)
    def _init():
        zero = jnp.zeros((Bp, Hp), jnp.float32)
        h0_ref[...] = zero
        c0_ref[...] = zero
        h1_ref[...] = zero
        c1_ref[...] = zero

    # Hoisted layer-0 input projection for the whole chunk: one tall MXU matmul
    # (bias b0 folded in here, off the serial critical path).
    gx_ref[...] = (jnp.dot(x_ref[...], wih0_ref[...],
                           preferred_element_type=jnp.float32)
                   + b0_ref[...])

    wdt = whh0_ref.dtype
    # Hoisted bias broadcast (loop-invariant; not re-materialized per step).
    b1 = jnp.broadcast_to(b1_ref[...], (Bp, 4 * Hp))

    def act(g):
        # PyTorch gate order i, f, g, o; Hp is a multiple of 128 so every slice
        # is lane-block aligned (no masked selects / lane rotates).
        i = jax.nn.sigmoid(g[:, 0 * Hp:1 * Hp])
        f = jax.nn.sigmoid(g[:, 1 * Hp:2 * Hp])
        gg = jnp.tanh(g[:, 2 * Hp:3 * Hp])
        o = jax.nn.sigmoid(g[:, 3 * Hp:4 * Hp])
        return i, f, gg, o

    # TODO(synk): replace the per-step jnp.dot recurrent matmuls with
    # pltpu.matmul_push_rhs (once per chunk) + matmul_acc_lhs/matmul_pop to keep
    # whh0 / w1 resident in the MXU; verify lowering + staging capacity per chip
    # from the bundle dump before committing.
    def step(t, carry):
        h0, c0, h1, c1 = carry
        row = pl.multiple_of(t * Bp, Bp)
        # Layer 0: only the recurrent matmul remains on the serial path.
        g0 = gx_ref[pl.ds(row, Bp), :] + jnp.dot(
            h0.astype(wdt), whh0_ref[...], preferred_element_type=jnp.float32)
        i0, f0, gg0, o0 = act(g0)
        c0n = f0 * c0 + i0 * gg0
        h0n = o0 * jnp.tanh(c0n)
        # TODO(synk): inter-layer LSTM dropout (training only) is identity here.
        if split_layer1:
            # v5e-friendly: two 128-K matmuls, no (Bp,2Hp) concat copy.
            g1 = (jnp.dot(h0n.astype(wdt), w1_ref[0:Hp, :],
                          preferred_element_type=jnp.float32)
                  + jnp.dot(h1.astype(wdt), w1_ref[Hp:2 * Hp, :],
                            preferred_element_type=jnp.float32)
                  + b1)
        else:
            # v6e/v7x: single fused matmul on [h0_new, h1_prev].
            hcat = jnp.concatenate([h0n, h1], axis=1).astype(wdt)
            g1 = jnp.dot(hcat, w1_ref[...], preferred_element_type=jnp.float32) + b1
        i1, f1, gg1, o1 = act(g1)
        c1n = f1 * c1 + i1 * gg1
        h1n = o1 * jnp.tanh(c1n)
        return h0n, c0n, h1n, c1n

    def run(n_steps):
        carry0 = (h0_ref[...], c0_ref[...], h1_ref[...], c1_ref[...])
        u = True if n_steps <= 32 else unroll_n   # bounded unroll for big chunks
        h0, c0, h1, c1 = lax.fori_loop(0, n_steps, step, carry0, unroll=u)
        h0_ref[...] = h0
        c0_ref[...] = c0
        h1_ref[...] = h1
        c1_ref[...] = c1

    if rem_steps == full_steps:
        run(full_steps)
    else:
        # Statically-sized remainder chunk: no divisor search, no dynamic trip count.
        @pl.when(c_idx < n_chunks - 1)
        def _full_chunk():
            run(full_steps)

        @pl.when(c_idx == n_chunks - 1)
        def _tail_chunk():
            run(rem_steps)

    # FC head on the final layer-2 hidden state (== out[:, -1, :]), last chunk only.
    @pl.when(c_idx == n_chunks - 1)
    def _head():
        h1v = h1_ref[...]
        z = jnp.dot(h1v.astype(wdt), fc1w_ref[...],
                    preferred_element_type=jnp.float32) + fc1b_ref[...]
        z = jnp.maximum(z, 0.0)
        # TODO(synk): fc Dropout(0.8) is identity at inference time.
        z = jnp.dot(z.astype(wdt), fc2w_ref[...],
                    preferred_element_type=jnp.float32) + fc2b_ref[...]
        out_ref[...] = jax.nn.sigmoid(z)


def lstm_forward_pallas(x, params, *, time_chunk=128, compute_dtype=None,
                        split_layer1=None):
    """x: (B, T, I) float32; params: dict of weights in PyTorch layout."""
    B, T, I = x.shape
    H = params["w_hh0"].shape[1]
    O = params["fc2_w"].shape[0]

    if compute_dtype is None:
        compute_dtype = _auto_compute_dtype()
    if split_layer1 is None:
        split_layer1 = "v5" in _device_kind()

    Hp = _round_up(H, 128)      # lane-aligned gate blocks
    Op = _round_up(O, 128)      # lane-dense output
    Bp = _round_up(B, 8)        # sublane-aligned batch

    # Fixed-size time chunks + static remainder (no "largest divisor" search).
    Tt = max(1, min(time_chunk, T))
    nc = -(-T // Tt)
    rem = T - (nc - 1) * Tt          # in [1, Tt]
    T_pad = nc * Tt

    f32 = jnp.float32
    cd = compute_dtype

    def pad_gate_cols(w):
        # Pad the 4H gate axis per-gate (i,f,g,o blocks each H -> Hp).
        w = w.reshape(w.shape[:-1] + (4, H))
        w = jnp.pad(w, [(0, 0)] * (w.ndim - 1) + [(0, Hp - H)])
        return w.reshape(w.shape[:-2] + (4 * Hp,))

    def pad_rows(w, rows):
        return jnp.pad(w, [(0, Hp - rows)] + [(0, 0)] * (w.ndim - 1))

    # Layer 0 (x-projection hoisted; biases combined and folded into it).
    wih0 = pad_gate_cols(params["w_ih0"].T.astype(f32))                      # (I, 4Hp)
    whh0 = pad_rows(pad_gate_cols(params["w_hh0"].T.astype(f32)), H)         # (Hp, 4Hp)
    b0 = pad_gate_cols((params["b_ih0"] + params["b_hh0"]).astype(f32))[None, :]
    # Layer 1: stacked [Wih1; Whh1] (fused or split inside the kernel).
    wih1 = pad_rows(pad_gate_cols(params["w_ih1"].T.astype(f32)), H)
    whh1 = pad_rows(pad_gate_cols(params["w_hh1"].T.astype(f32)), H)
    w1 = jnp.concatenate([wih1, whh1], axis=0)                               # (2Hp, 4Hp)
    b1 = pad_gate_cols((params["b_ih1"] + params["b_hh1"]).astype(f32))[None, :]
    # FC head.
    fc1w = jnp.pad(params["fc1_w"].T.astype(f32), ((0, Hp - H), (0, Hp - H)))
    fc1b = jnp.pad(params["fc1_b"].astype(f32), (0, Hp - H))[None, :]
    fc2w = jnp.pad(params["fc2_w"].T.astype(f32), ((0, Hp - H), (0, Op - O)))
    fc2b = jnp.pad(params["fc2_b"].astype(f32), (0, Op - O))[None, :]

    # Matmul operands in compute_dtype (bf16 on v6e/v7x halves weight bytes +
    # uses the bf16 MXU path); biases / accumulation / cell state stay f32.
    wih0, whh0, w1, fc1w, fc2w = (a.astype(cd) for a in (wih0, whh0, w1, fc1w, fc2w))

    # Time-major rows (t*Bp + b); batch padded to Bp, time padded to nc*Tt.
    # Padded timesteps only produce unread gx rows (the step loops stop at rem).
    x_p = jnp.pad(x, ((0, Bp - B), (0, T_pad - T), (0, 0)))     # (Bp, T_pad, I)
    x_p = jnp.transpose(x_p, (1, 0, 2)).reshape(T_pad * Bp, I).astype(cd)

    kern = functools.partial(lstm_fc_kernel, full_steps=Tt, rem_steps=rem,
                             unroll_n=8, split_layer1=split_layer1)

    def wspec(arr):
        return pl.BlockSpec(arr.shape, lambda c: (0, 0))

    weights = (wih0, whh0, b0, w1, b1, fc1w, fc1b, fc2w, fc2b)

    # VMEM budget from the actual footprint (+ headroom), sized for v7x's 64 MiB.
    nbytes = lambda a: a.size * a.dtype.itemsize
    vmem_bytes = 2 * Tt * Bp * I * jnp.dtype(cd).itemsize          # streamed x (2 bufs)
    vmem_bytes += 2 * sum(nbytes(a) for a in weights)              # weights (2 bufs)
    vmem_bytes += 2 * Bp * Op * 4                                  # output
    vmem_bytes += (Tt * Bp * 4 * Hp + 4 * Bp * Hp) * 4             # gx + h/c scratch
    vmem_limit = int(min(max(vmem_bytes + (8 << 20), 16 << 20), 56 << 20))

    out = pl.pallas_call(
        kern,
        out_shape=jax.ShapeDtypeStruct((Bp, Op), jnp.float32),
        grid_spec=pltpu.PrefetchScalarGridSpec(
            num_scalar_prefetch=0,
            grid=(nc,),
            in_specs=[
                pl.BlockSpec((Tt * Bp, I), lambda c: (c, 0)),   # streamed x chunk
                wspec(wih0), wspec(whh0), wspec(b0),
                wspec(w1), wspec(b1),
                wspec(fc1w), wspec(fc1b),
                wspec(fc2w), wspec(fc2b),
            ],
            out_specs=pl.BlockSpec((Bp, Op), lambda c: (0, 0)),
            scratch_shapes=[
                pltpu.VMEM((Tt * Bp, 4 * Hp), jnp.float32),     # hoisted x-projection
                pltpu.VMEM((Bp, Hp), jnp.float32),              # h0
                pltpu.VMEM((Bp, Hp), jnp.float32),              # c0
                pltpu.VMEM((Bp, Hp), jnp.float32),              # h1
                pltpu.VMEM((Bp, Hp), jnp.float32),              # c1
            ],
        ),
        compiler_params=pltpu.CompilerParams(
            dimension_semantics=("arbitrary",),
            vmem_limit_bytes=vmem_limit,
        ),
    )(x_p, *weights)

    return out[:B, :O]


def lstm_forward_ref(x, params):
    """Pure-JAX reference matching torch.nn.LSTM(batch_first=True) + FC head."""
    B, T, I = x.shape
    H = params["w_hh0"].shape[1]

    def cell(xt, h, c, wih, whh, bih, bhh):
        g = xt @ wih.T + h @ whh.T + bih + bhh
        i = jax.nn.sigmoid(g[:, 0 * H:1 * H])
        f = jax.nn.sigmoid(g[:, 1 * H:2 * H])
        gg = jnp.tanh(g[:, 2 * H:3 * H])
        o = jax.nn.sigmoid(g[:, 3 * H:4 * H])
        c = f * c + i * gg
        h = o * jnp.tanh(c)
        return h, c

    h0 = jnp.zeros((B, H)); c0 = jnp.zeros((B, H))
    h1 = jnp.zeros((B, H)); c1 = jnp.zeros((B, H))
    for t in range(T):
        h0, c0 = cell(x[:, t, :], h0, c0,
                      params["w_ih0"], params["w_hh0"], params["b_ih0"], params["b_hh0"])
        h1, c1 = cell(h0, h1, c1,
                      params["w_ih1"], params["w_hh1"], params["b_ih1"], params["b_hh1"])
    z = jnp.maximum(h1 @ params["fc1_w"].T + params["fc1_b"], 0.0)
    z = z @ params["fc2_w"].T + params["fc2_b"]
    return jax.nn.sigmoid(z)


def init_params(key, input_size, hidden_size, output_size):
    H = hidden_size
    k = 1.0 / np.sqrt(H)
    names_shapes = [
        ("w_ih0", (4 * H, input_size)), ("w_hh0", (4 * H, H)),
        ("b_ih0", (4 * H,)), ("b_hh0", (4 * H,)),
        ("w_ih1", (4 * H, H)), ("w_hh1", (4 * H, H)),
        ("b_ih1", (4 * H,)), ("b_hh1", (4 * H,)),
        ("fc1_w", (H, H)), ("fc1_b", (H,)),
        ("fc2_w", (output_size, H)), ("fc2_b", (output_size,)),
    ]
    params = {}
    keys = jax.random.split(key, len(names_shapes))
    for (name, shape), kk in zip(names_shapes, keys):
        params[name] = jax.random.uniform(kk, shape, jnp.float32, -k, k)
    return params


if __name__ == "__main__":
    B, T, I, H, O = 2, 8, 16, 32, 4
    key = jax.random.PRNGKey(0)
    kx, kx2, kp = jax.random.split(key, 3)
    x = jax.random.normal(kx, (B, T, I), jnp.float32)
    params = init_params(kp, I, H, O)

    ref = lstm_forward_ref(x, params)

    # f32, single chunk (default time_chunk covers T).
    out = jax.block_until_ready(
        lstm_forward_pallas(x, params, compute_dtype=jnp.float32, split_layer1=False))
    np.testing.assert_allclose(np.asarray(out), np.asarray(ref), atol=1e-4, rtol=1e-4)

    # f32, multi-chunk streamed grid (exercises h/c carry across chunks).
    out = jax.block_until_ready(
        lstm_forward_pallas(x, params, time_chunk=4, compute_dtype=jnp.float32,
                            split_layer1=False))
    np.testing.assert_allclose(np.asarray(out), np.asarray(ref), atol=1e-4, rtol=1e-4)

    # f32, remainder-chunk path (T not divisible by the chunk) + split layer-1 matmuls.
    T2 = 7
    x2 = jax.random.normal(kx2, (B, T2, I), jnp.float32)
    ref2 = lstm_forward_ref(x2, params)
    out2 = jax.block_until_ready(
        lstm_forward_pallas(x2, params, time_chunk=4, compute_dtype=jnp.float32,
                            split_layer1=True))
    np.testing.assert_allclose(np.asarray(out2), np.asarray(ref2), atol=1e-4, rtol=1e-4)

    # bf16 weights/activations (f32 accumulate + f32 hidden/cell state) — looser tolerance.
    out_bf16 = jax.block_until_ready(
        lstm_forward_pallas(x, params, time_chunk=4, compute_dtype=jnp.bfloat16,
                            split_layer1=False))
    np.testing.assert_allclose(np.asarray(out_bf16), np.asarray(ref), atol=5e-2, rtol=5e-2)

    print("KERNEL_OK")
</pallas_src>

<mosaic_0001>
module attributes {stable_mosaic.version = 11 : i64} {
  func.func @lstm_fc_kernel(%arg0: i32, %arg1: memref<64x16xf32, #tpu.memory_space<vmem>>, %arg2: memref<16x512xf32, #tpu.memory_space<vmem>>, %arg3: memref<128x512xf32, #tpu.memory_space<vmem>>, %arg4: memref<1x512xf32, #tpu.memory_space<vmem>>, %arg5: memref<256x512xf32, #tpu.memory_space<vmem>>, %arg6: memref<1x512xf32, #tpu.memory_space<vmem>>, %arg7: memref<128x128xf32, #tpu.memory_space<vmem>>, %arg8: memref<1x128xf32, #tpu.memory_space<vmem>>, %arg9: memref<128x128xf32, #tpu.memory_space<vmem>>, %arg10: memref<1x128xf32, #tpu.memory_space<vmem>>, %arg11: memref<8x128xf32, #tpu.memory_space<vmem>>, %arg12: memref<64x512xf32, #tpu.memory_space<vmem>>, %arg13: memref<8x128xf32, #tpu.memory_space<vmem>>, %arg14: memref<8x128xf32, #tpu.memory_space<vmem>>, %arg15: memref<8x128xf32, #tpu.memory_space<vmem>>, %arg16: memref<8x128xf32, #tpu.memory_space<vmem>>) attributes {dimension_semantics = [#tpu.dimension_semantics<arbitrary>], iteration_bounds = array<i64: 1>, scalar_prefetch = 0 : i64, scratch_operands = 5 : i64, tpu.core_type = #tpu.core_type<tc>, window_params = [{transform_indices = @transform_0, window_bounds = array<i64: 64, 16>}, {pipeline_mode = #tpu.pipeline_mode<synchronous>, transform_indices = @transform_1, window_bounds = array<i64: 16, 512>}, {pipeline_mode = #tpu.pipeline_mode<synchronous>, transform_indices = @transform_2, window_bounds = array<i64: 128, 512>}, {pipeline_mode = #tpu.pipeline_mode<synchronous>, transform_indices = @transform_3, window_bounds = array<i64: 1, 512>}, {pipeline_mode = #tpu.pipeline_mode<synchronous>, transform_indices = @transform_4, window_bounds = array<i64: 256, 512>}, {pipeline_mode = #tpu.pipeline_mode<synchronous>, transform_indices = @transform_5, window_bounds = array<i64: 1, 512>}, {pipeline_mode = #tpu.pipeline_mode<synchronous>, transform_indices = @transform_6, window_bounds = array<i64: 128, 128>}, {pipeline_mode = #tpu.pipeline_mode<synchronous>, transform_indices = @transform_7, window_bounds = array<i64: 1, 128>}, {pipeline_mode = #tpu.pipeline_mode<synchronous>, transform_indices = @transform_8, window_bounds = array<i64: 128, 128>}, {pipeline_mode = #tpu.pipeline_mode<synchronous>, transform_indices = @transform_9, window_bounds = array<i64: 1, 128>}, {pipeline_mode = #tpu.pipeline_mode<synchronous>, transform_indices = @transform_10, window_bounds = array<i64: 8, 128>}]} {
    %c0_i32 = arith.constant 0 : i32
    %0 = arith.cmpi eq, %arg0, %c0_i32 : i32
    %1 = arith.extui %0 : i1 to i32
    %c0_i32_0 = arith.constant 0 : i32
    %2 = arith.cmpi ne, %1, %c0_i32_0 : i32
    scf.if %2 {
      %cst_141 = arith.constant 0.000000e+00 : f32
      %512 = vector.broadcast %cst_141 : f32 to vector<8x128xf32>
      %c0_142 = arith.constant 0 : index
      %c0_143 = arith.constant 0 : index
      %513 = vector.load %arg13[%c0_142, %c0_143] : memref<8x128xf32, #tpu.memory_space<vmem>>, vector<8x128xf32>
      tpu.vector_store %arg13[%c0_142, %c0_143], %512 {strides = array<i32>} : memref<8x128xf32, #tpu.memory_space<vmem>>, vector<8x128xf32>,
      %c0_144 = arith.constant 0 : index
      %c0_145 = arith.constant 0 : index
      %514 = vector.load %arg14[%c0_144, %c0_145] : memref<8x128xf32, #tpu.memory_space<vmem>>, vector<8x128xf32>
      tpu.vector_store %arg14[%c0_144, %c0_145], %512 {strides = array<i32>} : memref<8x128xf32, #tpu.memory_space<vmem>>, vector<8x128xf32>,
      %c0_146 = arith.constant 0 : index
      %c0_147 = arith.constant 0 : index
      %515 = vector.load %arg15[%c0_146, %c0_147] : memref<8x128xf32, #tpu.memory_space<vmem>>, vector<8x128xf32>
      tpu.vector_store %arg15[%c0_146, %c0_147], %512 {strides = array<i32>} : memref<8x128xf32, #tpu.memory_space<vmem>>, vector<8x128xf32>,
      %c0_148 = arith.constant 0 : index
      %c0_149 = arith.constant 0 : index
      %516 = vector.load %arg16[%c0_148, %c0_149] : memref<8x128xf32, #tpu.memory_space<vmem>>, vector<8x128xf32>
      tpu.vector_store %arg16[%c0_148, %c0_149], %512 {strides = array<i32>} : memref<8x128xf32, #tpu.memory_space<vmem>>, vector<8x128xf32>,
    } else {
    }
    %c0 = arith.constant 0 : index
    %c0_1 = arith.constant 0 : index
    %3 = vector.load %arg1[%c0, %c0_1] : memref<64x16xf32, #tpu.memory_space<vmem>>, vector<64x16xf32>
    %c0_2 = arith.constant 0 : index
    %c0_3 = arith.constant 0 : index
    %4 = vector.load %arg2[%c0_2, %c0_3] : memref<16x512xf32, #tpu.memory_space<vmem>>, vector<16x512xf32>
    %cst = arith.constant dense<0.000000e+00> : vector<64x512xf32>
    %5 = tpu.matmul %3, %4, %cst {dimension_numbers = #tpu.dot_dimension_numbers<[1], [0], [0], [1], [0, 0, 1, 1], [], []>} : vector<64x16xf32>, vector<16x512xf32>, vector<64x512xf32> -> vector<64x512xf32>
    %c0_4 = arith.constant 0 : index
    %c0_5 = arith.constant 0 : index
    %6 = vector.load %arg4[%c0_4, %c0_5] : memref<1x512xf32, #tpu.memory_space<vmem>>, vector<1x512xf32>
    %7 = vector.broadcast %6 : vector<1x512xf32> to vector<64x512xf32>
    %8 = arith.addf %5, %7 : vector<64x512xf32>
    %c0_6 = arith.constant 0 : index
    %c0_7 = arith.constant 0 : index
    %9 = vector.load %arg12[%c0_6, %c0_7] : memref<64x512xf32, #tpu.memory_space<vmem>>, vector<64x512xf32>
    tpu.vector_store %arg12[%c0_6, %c0_7], %8 {strides = array<i32>} : memref<64x512xf32, #tpu.memory_space<vmem>>, vector<64x512xf32>,
    %c0_8 = arith.constant 0 : index
    %c0_9 = arith.constant 0 : index
    %10 = vector.load %arg6[%c0_8, %c0_9] : memref<1x512xf32, #tpu.memory_space<vmem>>, vector<1x512xf32>
    %11 = vector.shape_cast %10 : vector<1x512xf32> to vector<1x512xf32>
    %12 = vector.broadcast %11 : vector<1x512xf32> to vector<8x512xf32>
    %c0_10 = arith.constant 0 : index
    %c0_11 = arith.constant 0 : index
    %13 = vector.load %arg13[%c0_10, %c0_11] : memref<8x128xf32, #tpu.memory_space<vmem>>, vector<8x128xf32>
    %c0_12 = arith.constant 0 : index
    %c0_13 = arith.constant 0 : index
    %14 = vector.load %arg14[%c0_12, %c0_13] : memref<8x128xf32, #tpu.memory_space<vmem>>, vector<8x128xf32>
    %c0_14 = arith.constant 0 : index
    %c0_15 = arith.constant 0 : index
    %15 = vector.load %arg15[%c0_14, %c0_15] : memref<8x128xf32, #tpu.memory_space<vmem>>, vector<8x128xf32>
    %c0_16 = arith.constant 0 : index
    %c0_17 = arith.constant 0 : index
    %16 = vector.load %arg16[%c0_16, %c0_17] : memref<8x128xf32, #tpu.memory_space<vmem>>, vector<8x128xf32>
    %c0_i32_18 = arith.constant 0 : i32
    %c8_i32 = arith.constant 8 : i32
    %17 = arith.muli %c0_i32_18, %c8_i32 : i32
    %18 = tpu.assume_multiple %17, 8 : i32
    %19 = arith.index_cast %18 : i32 to index
    %c0_19 = arith.constant 0 : index
    %20 = vector.load %arg12[%19, %c0_19] : memref<64x512xf32, #tpu.memory_space<vmem>>, vector<8x512xf32>
    %c0_20 = arith.constant 0 : index
    %c0_21 = arith.constant 0 : index
    %21 = vector.load %arg3[%c0_20, %c0_21] : memref<128x512xf32, #tpu.memory_space<vmem>>, vector<128x512xf32>
    %cst_22 = arith.constant dense<0.000000e+00> : vector<8x512xf32>
    %22 = tpu.matmul %13, %21, %cst_22 {dimension_numbers = #tpu.dot_dimension_numbers<[1], [0], [0], [1], [0, 0, 1, 1], [], []>} : vector<8x128xf32>, vector<128x512xf32>, vector<8x512xf32> -> vector<8x512xf32>
    %23 = arith.addf %20, %22 : vector<8x512xf32>
    %24 = vector.extract_strided_slice %23 {offsets = [0, 0], sizes = [8, 128], strides = [1, 1]} : vector<8x512xf32> to vector<8x128xf32>
    %25 = arith.negf %24 : vector<8x128xf32>
    %26 = math.exp %25 : vector<8x128xf32>
    %cst_23 = arith.constant 1.000000e+00 : f32
    %27 = vector.broadcast %cst_23 : f32 to vector<8x128xf32>
    %28 = arith.addf %27, %26 : vector<8x128xf32>
    %29 = arith.divf %27, %28 : vector<8x128xf32>
    %30 = vector.extract_strided_slice %23 {offsets = [0, 128], sizes = [8, 128], strides = [1, 1]} : vector<8x512xf32> to vector<8x128xf32>
    %31 = arith.negf %30 : vector<8x128xf32>
    %32 = math.exp %31 : vector<8x128xf32>
    %cst_24 = arith.constant 1.000000e+00 : f32
    %33 = vector.broadcast %cst_24 : f32 to vector<8x128xf32>
    %34 = arith.addf %33, %32 : vector<8x128xf32>
    %35 = arith.divf %33, %34 : vector<8x128xf32>
    %36 = vector.extract_strided_slice %23 {offsets = [0, 256], sizes = [8, 128], strides = [1, 1]} : vector<8x512xf32> to vector<8x128xf32>
    %37 = math.tanh %36 : vector<8x128xf32>
    %38 = vector.extract_strided_slice %23 {offsets = [0, 384], sizes = [8, 128], strides = [1, 1]} : vector<8x512xf32> to vector<8x128xf32>
    %39 = arith.negf %38 : vector<8x128xf32>
    %40 = math.exp %39 : vector<8x128xf32>
    %cst_25 = arith.constant 1.000000e+00 : f32
    %41 = vector.broadcast %cst_25 : f32 to vector<8x128xf32>
    %42 = arith.addf %41, %40 : vector<8x128xf32>
    %43 = arith.divf %41, %42 : vector<8x128xf32>
    %44 = arith.mulf %35, %14 : vector<8x128xf32>
    %45 = arith.mulf %29, %37 : vector<8x128xf32>
    %46 = arith.addf %44, %45 : vector<8x128xf32>
    %47 = math.tanh %46 : vector<8x128xf32>
    %48 = arith.mulf %43, %47 : vector<8x128xf32>
    %49 = tpu.concatenate %48, %15 in 1 : vector<8x128xf32>, vector<8x128xf32> -> vector<8x256xf32>
    %c0_26 = arith.constant 0 : index
    %c0_27 = arith.constant 0 : index
    %50 = vector.load %arg5[%c0_26, %c0_27] : memref<256x512xf32, #tpu.memory_space<vmem>>, vector<256x512xf32>
    %cst_28 = arith.constant dense<0.000000e+00> : vector<8x512xf32>
    %51 = tpu.matmul %49, %50, %cst_28 {dimension_numbers = #tpu.dot_dimension_numbers<[1], [0], [0], [1], [0, 0, 1, 1], [], []>} : vector<8x256xf32>, vector<256x512xf32>, vector<8x512xf32> -> vector<8x512xf32>
    %52 = arith.addf %51, %12 : vector<8x512xf32>
    %53 = vector.extract_strided_slice %52 {offsets = [0, 0], sizes = [8, 128], strides = [1, 1]} : vector<8x512xf32> to vector<8x128xf32>
    %54 = arith.negf %53 : vector<8x128xf32>
    %55 = math.exp %54 : vector<8x128xf32>
    %cst_29 = arith.constant 1.000000e+00 : f32
    %56 = vector.broadcast %cst_29 : f32 to vector<8x128xf32>
    %57 = arith.addf %56, %55 : vector<8x128xf32>
    %58 = arith.divf %56, %57 : vector<8x128xf32>
    %59 = vector.extract_strided_slice %52 {offsets = [0, 128], sizes = [8, 128], strides = [1, 1]} : vector<8x512xf32> to vector<8x128xf32>
    %60 = arith.negf %59 : vector<8x128xf32>
    %61 = math.exp %60 : vector<8x128xf32>
    %cst_30 = arith.constant 1.000000e+00 : f32
    %62 = vector.broadcast %cst_30 : f32 to vector<8x128xf32>
    %63 = arith.addf %62, %61 : vector<8x128xf32>
    %64 = arith.divf %62, %63 : vector<8x128xf32>
    %65 = vector.extract_strided_slice %52 {offsets = [0, 256], sizes = [8, 128], strides = [1, 1]} : vector<8x512xf32> to vector<8x128xf32>
    %66 = math.tanh %65 : vector<8x128xf32>
    %67 = vector.extract_strided_slice %52 {offsets = [0, 384], sizes = [8, 128], strides = [1, 1]} : vector<8x512xf32> to vector<8x128xf32>
    %68 = arith.negf %67 : vector<8x128xf32>
    %69 = math.exp %68 : vector<8x128xf32>
    %cst_31 = arith.constant 1.000000e+00 : f32
    %70 = vector.broadcast %cst_31 : f32 to vector<8x128xf32>
    %71 = arith.addf %70, %69 : vector<8x128xf32>
    %72 = arith.divf %70, %71 : vector<8x128xf32>
    %73 = arith.mulf %64, %16 : vector<8x128xf32>
    %74 = arith.mulf %58, %66 : vector<8x128xf32>
    %75 = arith.addf %73, %74 : vector<8x128xf32>
    %76 = math.tanh %75 : vector<8x128xf32>
    %77 = arith.mulf %72, %76 : vector<8x128xf32>
    %c1_i32 = arith.constant 1 : i32
    %c8_i32_32 = arith.constant 8 : i32
    %78 = arith.muli %c1_i32, %c8_i32_32 : i32
    %79 = tpu.assume_multiple %78, 8 : i32
    %80 = arith.index_cast %79 : i32 to index
    %c0_33 = arith.constant 0 : index
    %81 = vector.load %arg12[%80, %c0_33] : memref<64x512xf32, #tpu.memory_space<vmem>>, vector<8x512xf32>
    %c0_34 = arith.constant 0 : index
    %c0_35 = arith.constant 0 : index
    %82 = vector.load %arg3[%c0_34, %c0_35] : memref<128x512xf32, #tpu.memory_space<vmem>>, vector<128x512xf32>
    %cst_36 = arith.constant dense<0.000000e+00> : vector<8x512xf32>
    %83 = tpu.matmul %48, %82, %cst_36 {dimension_numbers = #tpu.dot_dimension_numbers<[1], [0], [0], [1], [0, 0, 1, 1], [], []>} : vector<8x128xf32>, vector<128x512xf32>, vector<8x512xf32> -> vector<8x512xf32>
    %84 = arith.addf %81, %83 : vector<8x512xf32>
    %85 = vector.extract_strided_slice %84 {offsets = [0, 0], sizes = [8, 128], strides = [1, 1]} : vector<8x512xf32> to vector<8x128xf32>
    %86 = arith.negf %85 : vector<8x128xf32>
    %87 = math.exp %86 : vector<8x128xf32>
    %cst_37 = arith.constant 1.000000e+00 : f32
    %88 = vector.broadcast %cst_37 : f32 to vector<8x128xf32>
    %89 = arith.addf %88, %87 : vector<8x128xf32>
    %90 = arith.divf %88, %89 : vector<8x128xf32>
    %91 = vector.extract_strided_slice %84 {offsets = [0, 128], sizes = [8, 128], strides = [1, 1]} : vector<8x512xf32> to vector<8x128xf32>
    %92 = arith.negf %91 : vector<8x128xf32>
    %93 = math.exp %92 : vector<8x128xf32>
    %cst_38 = arith.constant 1.000000e+00 : f32
    %94 = vector.broadcast %cst_38 : f32 to vector<8x128xf32>
    %95 = arith.addf %94, %93 : vector<8x128xf32>
    %96 = arith.divf %94, %95 : vector<8x128xf32>
    %97 = vector.extract_strided_slice %84 {offsets = [0, 256], sizes = [8, 128], strides = [1, 1]} : vector<8x512xf32> to vector<8x128xf32>
    %98 = math.tanh %97 : vector<8x128xf32>
    %99 = vector.extract_strided_slice %84 {offsets = [0, 384], sizes = [8, 128], strides = [1, 1]} : vector<8x512xf32> to vector<8x128xf32>
    %100 = arith.negf %99 : vector<8x128xf32>
    %101 = math.exp %100 : vector<8x128xf32>
    %cst_39 = arith.constant 1.000000e+00 : f32
    %102 = vector.broadcast %cst_39 : f32 to vector<8x128xf32>
    %103 = arith.addf %102, %101 : vector<8x128xf32>
    %104 = arith.divf %102, %103 : vector<8x128xf32>
    %105 = arith.mulf %96, %46 : vector<8x128xf32>
    %106 = arith.mulf %90, %98 : vector<8x128xf32>
    %107 = arith.addf %105, %106 : vector<8x128xf32>
    %108 = math.tanh %107 : vector<8x128xf32>
    %109 = arith.mulf %104, %108 : vector<8x128xf32>
    %110 = tpu.concatenate %109, %77 in 1 : vector<8x128xf32>, vector<8x128xf32> -> vector<8x256xf32>
    %c0_40 = arith.constant 0 : index
    %c0_41 = arith.constant 0 : index
    %111 = vector.load %arg5[%c0_40, %c0_41] : memref<256x512xf32, #tpu.memory_space<vmem>>, vector<256x512xf32>
    %cst_42 = arith.constant dense<0.000000e+00> : vector<8x512xf32>
    %112 = tpu.matmul %110, %111, %cst_42 {dimension_numbers = #tpu.dot_dimension_numbers<[1], [0], [0], [1], [0, 0, 1, 1], [], []>} : vector<8x256xf32>, vector<256x512xf32>, vector<8x512xf32> -> vector<8x512xf32>
    %113 = arith.addf %112, %12 : vector<8x512xf32>
    %114 = vector.extract_strided_slice %113 {offsets = [0, 0], sizes = [8, 128], strides = [1, 1]} : vector<8x512xf32> to vector<8x128xf32>
    %115 = arith.negf %114 : vector<8x128xf32>
    %116 = math.exp %115 : vector<8x128xf32>
    %cst_43 = arith.constant 1.000000e+00 : f32
    %117 = vector.broadcast %cst_43 : f32 to vector<8x128xf32>
    %118 = arith.addf %117, %116 : vector<8x128xf32>
    %119 = arith.divf %117, %118 : vector<8x128xf32>
    %120 = vector.extract_strided_slice %113 {offsets = [0, 128], sizes = [8, 128], strides = [1, 1]} : vector<8x512xf32> to vector<8x128xf32>
    %121 = arith.negf %120 : vector<8x128xf32>
    %122 = math.exp %121 : vector<8x128xf32>
    %cst_44 = arith.constant 1.000000e+00 : f32
    %123 = vector.broadcast %cst_44 : f32 to vector<8x128xf32>
    %124 = arith.addf %123, %122 : vector<8x128xf32>
    %125 = arith.divf %123, %124 : vector<8x128xf32>
    %126 = vector.extract_strided_slice %113 {offsets = [0, 256], sizes = [8, 128], strides = [1, 1]} : vector<8x512xf32> to vector<8x128xf32>
    %127 = math.tanh %126 : vector<8x128xf32>
    %128 = vector.extract_strided_slice %113 {offsets = [0, 384], sizes = [8, 128], strides = [1, 1]} : vector<8x512xf32> to vector<8x128xf32>
    %129 = arith.negf %128 : vector<8x128xf32>
    %130 = math.exp %129 : vector<8x128xf32>
    %cst_45 = arith.constant 1.000000e+00 : f32
    %131 = vector.broadcast %cst_45 : f32 to vector<8x128xf32>
    %132 = arith.addf %131, %130 : vector<8x128xf32>
    %133 = arith.divf %131, %132 : vector<8x128xf32>
    %134 = arith.mulf %125, %75 : vector<8x128xf32>
    %135 = arith.mulf %119, %127 : vector<8x128xf32>
    %136 = arith.addf %134, %135 : vector<8x128xf32>
    %137 = math.tanh %136 : vector<8x128xf32>
    %138 = arith.mulf %133, %137 : vector<8x128xf32>
    %c2_i32 = arith.constant 2 : i32
    %c8_i32_46 = arith.constant 8 : i32
    %139 = arith.muli %c2_i32, %c8_i32_46 : i32
    %140 = tpu.assume_multiple %139, 8 : i32
    %141 = arith.index_cast %140 : i32 to index
    %c0_47 = arith.constant 0 : index
    %142 = vector.load %arg12[%141, %c0_47] : memref<64x512xf32, #tpu.memory_space<vmem>>, vector<8x512xf32>
    %c0_48 = arith.constant 0 : index
    %c0_49 = arith.constant 0 : index
    %143 = vector.load %arg3[%c0_48, %c0_49] : memref<128x512xf32, #tpu.memory_space<vmem>>, vector<128x512xf32>
    %cst_50 = arith.constant dense<0.000000e+00> : vector<8x512xf32>
    %144 = tpu.matmul %109, %143, %cst_50 {dimension_numbers = #tpu.dot_dimension_numbers<[1], [0], [0], [1], [0, 0, 1, 1], [], []>} : vector<8x128xf32>, vector<128x512xf32>, vector<8x512xf32> -> vector<8x512xf32>
    %145 = arith.addf %142, %144 : vector<8x512xf32>
    %146 = vector.extract_strided_slice %145 {offsets = [0, 0], sizes = [8, 128], strides = [1, 1]} : vector<8x512xf32> to vector<8x128xf32>
    %147 = arith.negf %146 : vector<8x128xf32>
    %148 = math.exp %147 : vector<8x128xf32>
    %cst_51 = arith.constant 1.000000e+00 : f32
    %149 = vector.broadcast %cst_51 : f32 to vector<8x128xf32>
    %150 = arith.addf %149, %148 : vector<8x128xf32>
    %151 = arith.divf %149, %150 : vector<8x128xf32>
    %152 = vector.extract_strided_slice %145 {offsets = [0, 128], sizes = [8, 128], strides = [1, 1]} : vector<8x512xf32> to vector<8x128xf32>
    %153 = arith.negf %152 : vector<8x128xf32>
    %154 = math.exp %153 : vector<8x128xf32>
    %cst_52 = arith.constant 1.000000e+00 : f32
    %155 = vector.broadcast %cst_52 : f32 to vector<8x128xf32>
    %156 = arith.addf %155, %154 : vector<8x128xf32>
    %157 = arith.divf %155, %156 : vector<8x128xf32>
    %158 = vector.extract_strided_slice %145 {offsets = [0, 256], sizes = [8, 128], strides = [1, 1]} : vector<8x512xf32> to vector<8x128xf32>
    %159 = math.tanh %158 : vector<8x128xf32>
    %160 = vector.extract_strided_slice %145 {offsets = [0, 384], sizes = [8, 128], strides = [1, 1]} : vector<8x512xf32> to vector<8x128xf32>
    %161 = arith.negf %160 : vector<8x128xf32>
    %162 = math.exp %161 : vector<8x128xf32>
    %cst_53 = arith.constant 1.000000e+00 : f32
    %163 = vector.broadcast %cst_53 : f32 to vector<8x128xf32>
    %164 = arith.addf %163, %162 : vector<8x128xf32>
    %165 = arith.divf %163, %164 : vector<8x128xf32>
    %166 = arith.mulf %157, %107 : vector<8x128xf32>
    %167 = arith.mulf %151, %159 : vector<8x128xf32>
    %168 = arith.addf %166, %167 : vector<8x128xf32>
    %169 = math.tanh %168 : vector<8x128xf32>
    %170 = arith.mulf %165, %169 : vector<8x128xf32>
    %171 = tpu.concatenate %170, %138 in 1 : vector<8x128xf32>, vector<8x128xf32> -> vector<8x256xf32>
    %c0_54 = arith.constant 0 : index
    %c0_55 = arith.constant 0 : index
    %172 = vector.load %arg5[%c0_54, %c0_55] : memref<256x512xf32, #tpu.memory_space<vmem>>, vector<256x512xf32>
    %cst_56 = arith.constant dense<0.000000e+00> : vector<8x512xf32>
    %173 = tpu.matmul %171, %172, %cst_56 {dimension_numbers = #tpu.dot_dimension_numbers<[1], [0], [0], [1], [0, 0, 1, 1], [], []>} : vector<8x256xf32>, vector<256x512xf32>, vector<8x512xf32> -> vector<8x512xf32>
    %174 = arith.addf %173, %12 : vector<8x512xf32>
    %175 = vector.extract_strided_slice %174 {offsets = [0, 0], sizes = [8, 128], strides = [1, 1]} : vector<8x512xf32> to vector<8x128xf32>
    %176 = arith.negf %175 : vector<8x128xf32>
    %177 = math.exp %176 : vector<8x128xf32>
    %cst_57 = arith.constant 1.000000e+00 : f32
    %178 = vector.broadcast %cst_57 : f32 to vector<8x128xf32>
    %179 = arith.addf %178, %177 : vector<8x128xf32>
    %180 = arith.divf %178, %179 : vector<8x128xf32>
    %181 = vector.extract_strided_slice %174 {offsets = [0, 128], sizes = [8, 128], strides = [1, 1]} : vector<8x512xf32> to vector<8x128xf32>
    %182 = arith.negf %181 : vector<8x128xf32>
    %183 = math.exp %182 : vector<8x128xf32>
    %cst_58 = arith.constant 1.000000e+00 : f32
    %184 = vector.broadcast %cst_58 : f32 to vector<8x128xf32>
    %185 = arith.addf %184, %183 : vector<8x128xf32>
    %186 = arith.divf %184, %185 : vector<8x128xf32>
    %187 = vector.extract_strided_slice %174 {offsets = [0, 256], sizes = [8, 128], strides = [1, 1]} : vector<8x512xf32> to vector<8x128xf32>
    %188 = math.tanh %187 : vector<8x128xf32>
    %189 = vector.extract_strided_slice %174 {offsets = [0, 384], sizes = [8, 128], strides = [1, 1]} : vector<8x512xf32> to vector<8x128xf32>
    %190 = arith.negf %189 : vector<8x128xf32>
    %191 = math.exp %190 : vector<8x128xf32>
    %cst_59 = arith.constant 1.000000e+00 : f32
    %192 = vector.broadcast %cst_59 : f32 to vector<8x128xf32>
    %193 = arith.addf %192, %191 : vector<8x128xf32>
    %194 = arith.divf %192, %193 : vector<8x128xf32>
    %195 = arith.mulf %186, %136 : vector<8x128xf32>
    %196 = arith.mulf %180, %188 : vector<8x128xf32>
    %197 = arith.addf %195, %196 : vector<8x128xf32>
    %198 = math.tanh %197 : vector<8x128xf32>
    %199 = arith.mulf %194, %198 : vector<8x128xf32>
    %c3_i32 = arith.constant 3 : i32
    %c8_i32_60 = arith.constant 8 : i32
    %200 = arith.muli %c3_i32, %c8_i32_60 : i32
    %201 = tpu.assume_multiple %200, 8 : i32
    %202 = arith.index_cast %201 : i32 to index
    %c0_61 = arith.constant 0 : index
    %203 = vector.load %arg12[%202, %c0_61] : memref<64x512xf32, #tpu.memory_space<vmem>>, vector<8x512xf32>
    %c0_62 = arith.constant 0 : index
    %c0_63 = arith.constant 0 : index
    %204 = vector.load %arg3[%c0_62, %c0_63] : memref<128x512xf32, #tpu.memory_space<vmem>>, vector<128x512xf32>
    %cst_64 = arith.constant dense<0.000000e+00> : vector<8x512xf32>
    %205 = tpu.matmul %170, %204, %cst_64 {dimension_numbers = #tpu.dot_dimension_numbers<[1], [0], [0], [1], [0, 0, 1, 1], [], []>} : vector<8x128xf32>, vector<128x512xf32>, vector<8x512xf32> -> vector<8x512xf32>
    %206 = arith.addf %203, %205 : vector<8x512xf32>
    %207 = vector.extract_strided_slice %206 {offsets = [0, 0], sizes = [8, 128], strides = [1, 1]} : vector<8x512xf32> to vector<8x128xf32>
    %208 = arith.negf %207 : vector<8x128xf32>
    %209 = math.exp %208 : vector<8x128xf32>
    %cst_65 = arith.constant 1.000000e+00 : f32
    %210 = vector.broadcast %cst_65 : f32 to vector<8x128xf32>
    %211 = arith.addf %210, %209 : vector<8x128xf32>
    %212 = arith.divf %210, %211 : vector<8x128xf32>
    %213 = vector.extract_strided_slice %206 {offsets = [0, 128], sizes = [8, 128], strides = [1, 1]} : vector<8x512xf32> to vector<8x128xf32>
    %214 = arith.negf %213 : vector<8x128xf32>
    %215 = math.exp %214 : vector<8x128xf32>
    %cst_66 = arith.constant 1.000000e+00 : f32
    %216 = vector.broadcast %cst_66 : f32 to vector<8x128xf32>
    %217 = arith.addf %216, %215 : vector<8x128xf32>
    %218 = arith.divf %216, %217 : vector<8x128xf32>
    %219 = vector.extract_strided_slice %206 {offsets = [0, 256], sizes = [8, 128], strides = [1, 1]} : vector<8x512xf32> to vector<8x128xf32>
    %220 = math.tanh %219 : vector<8x128xf32>
    %221 = vector.extract_strided_slice %206 {offsets = [0, 384], sizes = [8, 128], strides = [1, 1]} : vector<8x512xf32> to vector<8x128xf32>
    %222 = arith.negf %221 : vector<8x128xf32>
    %223 = math.exp %222 : vector<8x128xf32>
    %cst_67 = arith.constant 1.000000e+00 : f32
    %224 = vector.broadcast %cst_67 : f32 to vector<8x128xf32>
    %225 = arith.addf %224, %223 : vector<8x128xf32>
    %226 = arith.divf %224, %225 : vector<8x128xf32>
    %227 = arith.mulf %218, %168 : vector<8x128xf32>
    %228 = arith.mulf %212, %220 : vector<8x128xf32>
    %229 = arith.addf %227, %228 : vector<8x128xf32>
    %230 = math.tanh %229 : vector<8x128xf32>
    %231 = arith.mulf %226, %230 : vector<8x128xf32>
    %232 = tpu.concatenate %231, %199 in 1 : vector<8x128xf32>, vector<8x128xf32> -> vector<8x256xf32>
    %c0_68 = arith.constant 0 : index
    %c0_69 = arith.constant 0 : index
    %233 = vector.load %arg5[%c0_68, %c0_69] : memref<256x512xf32, #tpu.memory_space<vmem>>, vector<256x512xf32>
    %cst_70 = arith.constant dense<0.000000e+00> : vector<8x512xf32>
    %234 = tpu.matmul %232, %233, %cst_70 {dimension_numbers = #tpu.dot_dimension_numbers<[1], [0], [0], [1], [0, 0, 1, 1], [], []>} : vector<8x256xf32>, vector<256x512xf32>, vector<8x512xf32> -> vector<8x512xf32>
    %235 = arith.addf %234, %12 : vector<8x512xf32>
    %236 = vector.extract_strided_slice %235 {offsets = [0, 0], sizes = [8, 128], strides = [1, 1]} : vector<8x512xf32> to vector<8x128xf32>
    %237 = arith.negf %236 : vector<8x128xf32>
    %238 = math.exp %237 : vector<8x128xf32>
    %cst_71 = arith.constant 1.000000e+00 : f32
    %239 = vector.broadcast %cst_71 : f32 to vector<8x128xf32>
    %240 = arith.addf %239, %238 : vector<8x128xf32>
    %241 = arith.divf %239, %240 : vector<8x128xf32>
    %242 = vector.extract_strided_slice %235 {offsets = [0, 128], sizes = [8, 128], strides = [1, 1]} : vector<8x512xf32> to vector<8x128xf32>
    %243 = arith.negf %242 : vector<8x128xf32>
    %244 = math.exp %243 : vector<8x128xf32>
    %cst_72 = arith.constant 1.000000e+00 : f32
    %245 = vector.broadcast %cst_72 : f32 to vector<8x128xf32>
    %246 = arith.addf %245, %244 : vector<8x128xf32>
    %247 = arith.divf %245, %246 : vector<8x128xf32>
    %248 = vector.extract_strided_slice %235 {offsets = [0, 256], sizes = [8, 128], strides = [1, 1]} : vector<8x512xf32> to vector<8x128xf32>
    %249 = math.tanh %248 : vector<8x128xf32>
    %250 = vector.extract_strided_slice %235 {offsets = [0, 384], sizes = [8, 128], strides = [1, 1]} : vector<8x512xf32> to vector<8x128xf32>
    %251 = arith.negf %250 : vector<8x128xf32>
    %252 = math.exp %251 : vector<8x128xf32>
    %cst_73 = arith.constant 1.000000e+00 : f32
    %253 = vector.broadcast %cst_73 : f32 to vector<8x128xf32>
    %254 = arith.addf %253, %252 : vector<8x128xf32>
    %255 = arith.divf %253, %254 : vector<8x128xf32>
    %256 = arith.mulf %247, %197 : vector<8x128xf32>
    %257 = arith.mulf %241, %249 : vector<8x128xf32>
    %258 = arith.addf %256, %257 : vector<8x128xf32>
    %259 = math.tanh %258 : vector<8x128xf32>
    %260 = arith.mulf %255, %259 : vector<8x128xf32>
    %c4_i32 = arith.constant 4 : i32
    %c8_i32_74 = arith.constant 8 : i32
    %261 = arith.muli %c4_i32, %c8_i32_74 : i32
    %262 = tpu.assume_multiple %261, 8 : i32
    %263 = arith.index_cast %262 : i32 to index
    %c0_75 = arith.constant 0 : index
    %264 = vector.load %arg12[%263, %c0_75] : memref<64x512xf32, #tpu.memory_space<vmem>>, vector<8x512xf32>
    %c0_76 = arith.constant 0 : index
    %c0_77 = arith.constant 0 : index
    %265 = vector.load %arg3[%c0_76, %c0_77] : memref<128x512xf32, #tpu.memory_space<vmem>>, vector<128x512xf32>
    %cst_78 = arith.constant dense<0.000000e+00> : vector<8x512xf32>
    %266 = tpu.matmul %231, %265, %cst_78 {dimension_numbers = #tpu.dot_dimension_numbers<[1], [0], [0], [1], [0, 0, 1, 1], [], []>} : vector<8x128xf32>, vector<128x512xf32>, vector<8x512xf32> -> vector<8x512xf32>
    %267 = arith.addf %264, %266 : vector<8x512xf32>
    %268 = vector.extract_strided_slice %267 {offsets = [0, 0], sizes = [8, 128], strides = [1, 1]} : vector<8x512xf32> to vector<8x128xf32>
    %269 = arith.negf %268 : vector<8x128xf32>
    %270 = math.exp %269 : vector<8x128xf32>
    %cst_79 = arith.constant 1.000000e+00 : f32
    %271 = vector.broadcast %cst_79 : f32 to vector<8x128xf32>
    %272 = arith.addf %271, %270 : vector<8x128xf32>
    %273 = arith.divf %271, %272 : vector<8x128xf32>
    %274 = vector.extract_strided_slice %267 {offsets = [0, 128], sizes = [8, 128], strides = [1, 1]} : vector<8x512xf32> to vector<8x128xf32>
    %275 = arith.negf %274 : vector<8x128xf32>
    %276 = math.exp %275 : vector<8x128xf32>
    %cst_80 = arith.constant 1.000000e+00 : f32
    %277 = vector.broadcast %cst_80 : f32 to vector<8x128xf32>
    %278 = arith.addf %277, %276 : vector<8x128xf32>
    %279 = arith.divf %277, %278 : vector<8x128xf32>
    %280 = vector.extract_strided_slice %267 {offsets = [0, 256], sizes = [8, 128], strides = [1, 1]} : vector<8x512xf32> to vector<8x128xf32>
    %281 = math.tanh %280 : vector<8x128xf32>
    %282 = vector.extract_strided_slice %267 {offsets = [0, 384], sizes = [8, 128], strides = [1, 1]} : vector<8x512xf32> to vector<8x128xf32>
    %283 = arith.negf %282 : vector<8x128xf32>
    %284 = math.exp %283 : vector<8x128xf32>
    %cst_81 = arith.constant 1.000000e+00 : f32
    %285 = vector.broadcast %cst_81 : f32 to vector<8x128xf32>
    %286 = arith.addf %285, %284 : vector<8x128xf32>
    %287 = arith.divf %285, %286 : vector<8x128xf32>
    %288 = arith.mulf %279, %229 : vector<8x128xf32>
    %289 = arith.mulf %273, %281 : vector<8x128xf32>
    %290 = arith.addf %288, %289 : vector<8x128xf32>
    %291 = math.tanh %290 : vector<8x128xf32>
    %292 = arith.mulf %287, %291 : vector<8x128xf32>
    %293 = tpu.concatenate %292, %260 in 1 : vector<8x128xf32>, vector<8x128xf32> -> vector<8x256xf32>
    %c0_82 = arith.constant 0 : index
    %c0_83 = arith.constant 0 : index
    %294 = vector.load %arg5[%c0_82, %c0_83] : memref<256x512xf32, #tpu.memory_space<vmem>>, vector<256x512xf32>
    %cst_84 = arith.constant dense<0.000000e+00> : vector<8x512xf32>
    %295 = tpu.matmul %293, %294, %cst_84 {dimension_numbers = #tpu.dot_dimension_numbers<[1], [0], [0], [1], [0, 0, 1, 1], [], []>} : vector<8x256xf32>, vector<256x512xf32>, vector<8x512xf32> -> vector<8x512xf32>
    %296 = arith.addf %295, %12 : vector<8x512xf32>
    %297 = vector.extract_strided_slice %296 {offsets = [0, 0], sizes = [8, 128], strides = [1, 1]} : vector<8x512xf32> to vector<8x128xf32>
    %298 = arith.negf %297 : vector<8x128xf32>
    %299 = math.exp %298 : vector<8x128xf32>
    %cst_85 = arith.constant 1.000000e+00 : f32
    %300 = vector.broadcast %cst_85 : f32 to vector<8x128xf32>
    %301 = arith.addf %300, %299 : vector<8x128xf32>
    %302 = arith.divf %300, %301 : vector<8x128xf32>
    %303 = vector.extract_strided_slice %296 {offsets = [0, 128], sizes = [8, 128], strides = [1, 1]} : vector<8x512xf32> to vector<8x128xf32>
    %304 = arith.negf %303 : vector<8x128xf32>
    %305 = math.exp %304 : vector<8x128xf32>
    %cst_86 = arith.constant 1.000000e+00 : f32
    %306 = vector.broadcast %cst_86 : f32 to vector<8x128xf32>
    %307 = arith.addf %306, %305 : vector<8x128xf32>
    %308 = arith.divf %306, %307 : vector<8x128xf32>
    %309 = vector.extract_strided_slice %296 {offsets = [0, 256], sizes = [8, 128], strides = [1, 1]} : vector<8x512xf32> to vector<8x128xf32>
    %310 = math.tanh %309 : vector<8x128xf32>
    %311 = vector.extract_strided_slice %296 {offsets = [0, 384], sizes = [8, 128], strides = [1, 1]} : vector<8x512xf32> to vector<8x128xf32>
    %312 = arith.negf %311 : vector<8x128xf32>
    %313 = math.exp %312 : vector<8x128xf32>
    %cst_87 = arith.constant 1.000000e+00 : f32
    %314 = vector.broadcast %cst_87 : f32 to vector<8x128xf32>
    %315 = arith.addf %314, %313 : vector<8x128xf32>
    %316 = arith.divf %314, %315 : vector<8x128xf32>
    %317 = arith.mulf %308, %258 : vector<8x128xf32>
    %318 = arith.mulf %302, %310 : vector<8x128xf32>
    %319 = arith.addf %317, %318 : vector<8x128xf32>
    %320 = math.tanh %319 : vector<8x128xf32>
    %321 = arith.mulf %316, %320 : vector<8x128xf32>
    %c5_i32 = arith.constant 5 : i32
    %c8_i32_88 = arith.constant 8 : i32
    %322 = arith.muli %c5_i32, %c8_i32_88 : i32
    %323 = tpu.assume_multiple %322, 8 : i32
    %324 = arith.index_cast %323 : i32 to index
    %c0_89 = arith.constant 0 : index
    %325 = vector.load %arg12[%324, %c0_89] : memref<64x512xf32, #tpu.memory_space<vmem>>, vector<8x512xf32>
    %c0_90 = arith.constant 0 : index
    %c0_91 = arith.constant 0 : index
    %326 = vector.load %arg3[%c0_90, %c0_91] : memref<128x512xf32, #tpu.memory_space<vmem>>, vector<128x512xf32>
    %cst_92 = arith.constant dense<0.000000e+00> : vector<8x512xf32>
    %327 = tpu.matmul %292, %326, %cst_92 {dimension_numbers = #tpu.dot_dimension_numbers<[1], [0], [0], [1], [0, 0, 1, 1], [], []>} : vector<8x128xf32>, vector<128x512xf32>, vector<8x512xf32> -> vector<8x512xf32>
    %328 = arith.addf %325, %327 : vector<8x512xf32>
    %329 = vector.extract_strided_slice %328 {offsets = [0, 0], sizes = [8, 128], strides = [1, 1]} : vector<8x512xf32> to vector<8x128xf32>
    %330 = arith.negf %329 : vector<8x128xf32>
    %331 = math.exp %330 : vector<8x128xf32>
    %cst_93 = arith.constant 1.000000e+00 : f32
    %332 = vector.broadcast %cst_93 : f32 to vector<8x128xf32>
    %333 = arith.addf %332, %331 : vector<8x128xf32>
    %334 = arith.divf %332, %333 : vector<8x128xf32>
    %335 = vector.extract_strided_slice %328 {offsets = [0, 128], sizes = [8, 128], strides = [1, 1]} : vector<8x512xf32> to vector<8x128xf32>
    %336 = arith.negf %335 : vector<8x128xf32>
    %337 = math.exp %336 : vector<8x128xf32>
    %cst_94 = arith.constant 1.000000e+00 : f32
    %338 = vector.broadcast %cst_94 : f32 to vector<8x128xf32>
    %339 = arith.addf %338, %337 : vector<8x128xf32>
    %340 = arith.divf %338, %339 : vector<8x128xf32>
    %341 = vector.extract_strided_slice %328 {offsets = [0, 256], sizes = [8, 128], strides = [1, 1]} : vector<8x512xf32> to vector<8x128xf32>
    %342 = math.tanh %341 : vector<8x128xf32>
    %343 = vector.extract_strided_slice %328 {offsets = [0, 384], sizes = [8, 128], strides = [1, 1]} : vector<8x512xf32> to vector<8x128xf32>
    %344 = arith.negf %343 : vector<8x128xf32>
    %345 = math.exp %344 : vector<8x128xf32>
    %cst_95 = arith.constant 1.000000e+00 : f32
    %346 = vector.broadcast %cst_95 : f32 to vector<8x128xf32>
    %347 = arith.addf %346, %345 : vector<8x128xf32>
    %348 = arith.divf %346, %347 : vector<8x128xf32>
    %349 = arith.mulf %340, %290 : vector<8x128xf32>
    %350 = arith.mulf %334, %342 : vector<8x128xf32>
    %351 = arith.addf %349, %350 : vector<8x128xf32>
    %352 = math.tanh %351 : vector<8x128xf32>
    %353 = arith.mulf %348, %352 : vector<8x128xf32>
    %354 = tpu.concatenate %353, %321 in 1 : vector<8x128xf32>, vector<8x128xf32> -> vector<8x256xf32>
    %c0_96 = arith.constant 0 : index
    %c0_97 = arith.constant 0 : index
    %355 = vector.load %arg5[%c0_96, %c0_97] : memref<256x512xf32, #tpu.memory_space<vmem>>, vector<256x512xf32>
    %cst_98 = arith.constant dense<0.000000e+00> : vector<8x512xf32>
    %356 = tpu.matmul %354, %355, %cst_98 {dimension_numbers = #tpu.dot_dimension_numbers<[1], [0], [0], [1], [0, 0, 1, 1], [], []>} : vector<8x256xf32>, vector<256x512xf32>, vector<8x512xf32> -> vector<8x512xf32>
    %357 = arith.addf %356, %12 : vector<8x512xf32>
    %358 = vector.extract_strided_slice %357 {offsets = [0, 0], sizes = [8, 128], strides = [1, 1]} : vector<8x512xf32> to vector<8x128xf32>
    %359 = arith.negf %358 : vector<8x128xf32>
    %360 = math.exp %359 : vector<8x128xf32>
    %cst_99 = arith.constant 1.000000e+00 : f32
    %361 = vector.broadcast %cst_99 : f32 to vector<8x128xf32>
    %362 = arith.addf %361, %360 : vector<8x128xf32>
    %363 = arith.divf %361, %362 : vector<8x128xf32>
    %364 = vector.extract_strided_slice %357 {offsets = [0, 128], sizes = [8, 128], strides = [1, 1]} : vector<8x512xf32> to vector<8x128xf32>
    %365 = arith.negf %364 : vector<8x128xf32>
    %366 = math.exp %365 : vector<8x128xf32>
    %cst_100 = arith.constant 1.000000e+00 : f32
    %367 = vector.broadcast %cst_100 : f32 to vector<8x128xf32>
    %368 = arith.addf %367, %366 : vector<8x128xf32>
    %369 = arith.divf %367, %368 : vector<8x128xf32>
    %370 = vector.extract_strided_slice %357 {offsets = [0, 256], sizes = [8, 128], strides = [1, 1]} : vector<8x512xf32> to vector<8x128xf32>
    %371 = math.tanh %370 : vector<8x128xf32>
    %372 = vector.extract_strided_slice %357 {offsets = [0, 384], sizes = [8, 128], strides = [1, 1]} : vector<8x512xf32> to vector<8x128xf32>
    %373 = arith.negf %372 : vector<8x128xf32>
    %374 = math.exp %373 : vector<8x128xf32>
    %cst_101 = arith.constant 1.000000e+00 : f32
    %375 = vector.broadcast %cst_101 : f32 to vector<8x128xf32>
    %376 = arith.addf %375, %374 : vector<8x128xf32>
    %377 = arith.divf %375, %376 : vector<8x128xf32>
    %378 = arith.mulf %369, %319 : vector<8x128xf32>
    %379 = arith.mulf %363, %371 : vector<8x128xf32>
    %380 = arith.addf %378, %379 : vector<8x128xf32>
    %381 = math.tanh %380 : vector<8x128xf32>
    %382 = arith.mulf %377, %381 : vector<8x128xf32>
    %c6_i32 = arith.constant 6 : i32
    %c8_i32_102 = arith.constant 8 : i32
    %383 = arith.muli %c6_i32, %c8_i32_102 : i32
    %384 = tpu.assume_multiple %383, 8 : i32
    %385 = arith.index_cast %384 : i32 to index
    %c0_103 = arith.constant 0 : index
    %386 = vector.load %arg12[%385, %c0_103] : memref<64x512xf32, #tpu.memory_space<vmem>>, vector<8x512xf32>
    %c0_104 = arith.constant 0 : index
    %c0_105 = arith.constant 0 : index
    %387 = vector.load %arg3[%c0_104, %c0_105] : memref<128x512xf32, #tpu.memory_space<vmem>>, vector<128x512xf32>
    %cst_106 = arith.constant dense<0.000000e+00> : vector<8x512xf32>
    %388 = tpu.matmul %353, %387, %cst_106 {dimension_numbers = #tpu.dot_dimension_numbers<[1], [0], [0], [1], [0, 0, 1, 1], [], []>} : vector<8x128xf32>, vector<128x512xf32>, vector<8x512xf32> -> vector<8x512xf32>
    %389 = arith.addf %386, %388 : vector<8x512xf32>
    %390 = vector.extract_strided_slice %389 {offsets = [0, 0], sizes = [8, 128], strides = [1, 1]} : vector<8x512xf32> to vector<8x128xf32>
    %391 = arith.negf %390 : vector<8x128xf32>
    %392 = math.exp %391 : vector<8x128xf32>
    %cst_107 = arith.constant 1.000000e+00 : f32
    %393 = vector.broadcast %cst_107 : f32 to vector<8x128xf32>
    %394 = arith.addf %393, %392 : vector<8x128xf32>
    %395 = arith.divf %393, %394 : vector<8x128xf32>
    %396 = vector.extract_strided_slice %389 {offsets = [0, 128], sizes = [8, 128], strides = [1, 1]} : vector<8x512xf32> to vector<8x128xf32>
    %397 = arith.negf %396 : vector<8x128xf32>
    %398 = math.exp %397 : vector<8x128xf32>
    %cst_108 = arith.constant 1.000000e+00 : f32
    %399 = vector.broadcast %cst_108 : f32 to vector<8x128xf32>
    %400 = arith.addf %399, %398 : vector<8x128xf32>
    %401 = arith.divf %399, %400 : vector<8x128xf32>
    %402 = vector.extract_strided_slice %389 {offsets = [0, 256], sizes = [8, 128], strides = [1, 1]} : vector<8x512xf32> to vector<8x128xf32>
    %403 = math.tanh %402 : vector<8x128xf32>
    %404 = vector.extract_strided_slice %389 {offsets = [0, 384], sizes = [8, 128], strides = [1, 1]} : vector<8x512xf32> to vector<8x128xf32>
    %405 = arith.negf %404 : vector<8x128xf32>
    %406 = math.exp %405 : vector<8x128xf32>
    %cst_109 = arith.constant 1.000000e+00 : f32
    %407 = vector.broadcast %cst_109 : f32 to vector<8x128xf32>
    %408 = arith.addf %407, %406 : vector<8x128xf32>
    %409 = arith.divf %407, %408 : vector<8x128xf32>
    %410 = arith.mulf %401, %351 : vector<8x128xf32>
    %411 = arith.mulf %395, %403 : vector<8x128xf32>
    %412 = arith.addf %410, %411 : vector<8x128xf32>
    %413 = math.tanh %412 : vector<8x128xf32>
    %414 = arith.mulf %409, %413 : vector<8x128xf32>
    %415 = tpu.concatenate %414, %382 in 1 : vector<8x128xf32>, vector<8x128xf32> -> vector<8x256xf32>
    %c0_110 = arith.constant 0 : index
    %c0_111 = arith.constant 0 : index
    %416 = vector.load %arg5[%c0_110, %c0_111] : memref<256x512xf32, #tpu.memory_space<vmem>>, vector<256x512xf32>
    %cst_112 = arith.constant dense<0.000000e+00> : vector<8x512xf32>
    %417 = tpu.matmul %415, %416, %cst_112 {dimension_numbers = #tpu.dot_dimension_numbers<[1], [0], [0], [1], [0, 0, 1, 1], [], []>} : vector<8x256xf32>, vector<256x512xf32>, vector<8x512xf32> -> vector<8x512xf32>
    %418 = arith.addf %417, %12 : vector<8x512xf32>
    %419 = vector.extract_strided_slice %418 {offsets = [0, 0], sizes = [8, 128], strides = [1, 1]} : vector<8x512xf32> to vector<8x128xf32>
    %420 = arith.negf %419 : vector<8x128xf32>
    %421 = math.exp %420 : vector<8x128xf32>
    %cst_113 = arith.constant 1.000000e+00 : f32
    %422 = vector.broadcast %cst_113 : f32 to vector<8x128xf32>
    %423 = arith.addf %422, %421 : vector<8x128xf32>
    %424 = arith.divf %422, %423 : vector<8x128xf32>
    %425 = vector.extract_strided_slice %418 {offsets = [0, 128], sizes = [8, 128], strides = [1, 1]} : vector<8x512xf32> to vector<8x128xf32>
    %426 = arith.negf %425 : vector<8x128xf32>
    %427 = math.exp %426 : vector<8x128xf32>
    %cst_114 = arith.constant 1.000000e+00 : f32
    %428 = vector.broadcast %cst_114 : f32 to vector<8x128xf32>
    %429 = arith.addf %428, %427 : vector<8x128xf32>
    %430 = arith.divf %428, %429 : vector<8x128xf32>
    %431 = vector.extract_strided_slice %418 {offsets = [0, 256], sizes = [8, 128], strides = [1, 1]} : vector<8x512xf32> to vector<8x128xf32>
    %432 = math.tanh %431 : vector<8x128xf32>
    %433 = vector.extract_strided_slice %418 {offsets = [0, 384], sizes = [8, 128], strides = [1, 1]} : vector<8x512xf32> to vector<8x128xf32>
    %434 = arith.negf %433 : vector<8x128xf32>
    %435 = math.exp %434 : vector<8x128xf32>
    %cst_115 = arith.constant 1.000000e+00 : f32
    %436 = vector.broadcast %cst_115 : f32 to vector<8x128xf32>
    %437 = arith.addf %436, %435 : vector<8x128xf32>
    %438 = arith.divf %436, %437 : vector<8x128xf32>
    %439 = arith.mulf %430, %380 : vector<8x128xf32>
    %440 = arith.mulf %424, %432 : vector<8x128xf32>
    %441 = arith.addf %439, %440 : vector<8x128xf32>
    %442 = math.tanh %441 : vector<8x128xf32>
    %443 = arith.mulf %438, %442 : vector<8x128xf32>
    %c7_i32 = arith.constant 7 : i32
    %c8_i32_116 = arith.constant 8 : i32
    %444 = arith.muli %c7_i32, %c8_i32_116 : i32
    %445 = tpu.assume_multiple %444, 8 : i32
    %446 = arith.index_cast %445 : i32 to index
    %c0_117 = arith.constant 0 : index
    %447 = vector.load %arg12[%446, %c0_117] : memref<64x512xf32, #tpu.memory_space<vmem>>, vector<8x512xf32>
    %c0_118 = arith.constant 0 : index
    %c0_119 = arith.constant 0 : index
    %448 = vector.load %arg3[%c0_118, %c0_119] : memref<128x512xf32, #tpu.memory_space<vmem>>, vector<128x512xf32>
    %cst_120 = arith.constant dense<0.000000e+00> : vector<8x512xf32>
    %449 = tpu.matmul %414, %448, %cst_120 {dimension_numbers = #tpu.dot_dimension_numbers<[1], [0], [0], [1], [0, 0, 1, 1], [], []>} : vector<8x128xf32>, vector<128x512xf32>, vector<8x512xf32> -> vector<8x512xf32>
    %450 = arith.addf %447, %449 : vector<8x512xf32>
    %451 = vector.extract_strided_slice %450 {offsets = [0, 0], sizes = [8, 128], strides = [1, 1]} : vector<8x512xf32> to vector<8x128xf32>
    %452 = arith.negf %451 : vector<8x128xf32>
    %453 = math.exp %452 : vector<8x128xf32>
    %cst_121 = arith.constant 1.000000e+00 : f32
    %454 = vector.broadcast %cst_121 : f32 to vector<8x128xf32>
    %455 = arith.addf %454, %453 : vector<8x128xf32>
    %456 = arith.divf %454, %455 : vector<8x128xf32>
    %457 = vector.extract_strided_slice %450 {offsets = [0, 128], sizes = [8, 128], strides = [1, 1]} : vector<8x512xf32> to vector<8x128xf32>
    %458 = arith.negf %457 : vector<8x128xf32>
    %459 = math.exp %458 : vector<8x128xf32>
    %cst_122 = arith.constant 1.000000e+00 : f32
    %460 = vector.broadcast %cst_122 : f32 to vector<8x128xf32>
    %461 = arith.addf %460, %459 : vector<8x128xf32>
    %462 = arith.divf %460, %461 : vector<8x128xf32>
    %463 = vector.extract_strided_slice %450 {offsets = [0, 256], sizes = [8, 128], strides = [1, 1]} : vector<8x512xf32> to vector<8x128xf32>
    %464 = math.tanh %463 : vector<8x128xf32>
    %465 = vector.extract_strided_slice %450 {offsets = [0, 384], sizes = [8, 128], strides = [1, 1]} : vector<8x512xf32> to vector<8x128xf32>
    %466 = arith.negf %465 : vector<8x128xf32>
    %467 = math.exp %466 : vector<8x128xf32>
    %cst_123 = arith.constant 1.000000e+00 : f32
    %468 = vector.broadcast %cst_123 : f32 to vector<8x128xf32>
    %469 = arith.addf %468, %467 : vector<8x128xf32>
    %470 = arith.divf %468, %469 : vector<8x128xf32>
    %471 = arith.mulf %462, %412 : vector<8x128xf32>
    %472 = arith.mulf %456, %464 : vector<8x128xf32>
    %473 = arith.addf %471, %472 : vector<8x128xf32>
    %474 = math.tanh %473 : vector<8x128xf32>
    %475 = arith.mulf %470, %474 : vector<8x128xf32>
    %476 = tpu.concatenate %475, %443 in 1 : vector<8x128xf32>, vector<8x128xf32> -> vector<8x256xf32>
    %c0_124 = arith.constant 0 : index
    %c0_125 = arith.constant 0 : index
    %477 = vector.load %arg5[%c0_124, %c0_125] : memref<256x512xf32, #tpu.memory_space<vmem>>, vector<256x512xf32>
    %cst_126 = arith.constant dense<0.000000e+00> : vector<8x512xf32>
    %478 = tpu.matmul %476, %477, %cst_126 {dimension_numbers = #tpu.dot_dimension_numbers<[1], [0], [0], [1], [0, 0, 1, 1], [], []>} : vector<8x256xf32>, vector<256x512xf32>, vector<8x512xf32> -> vector<8x512xf32>
    %479 = arith.addf %478, %12 : vector<8x512xf32>
    %480 = vector.extract_strided_slice %479 {offsets = [0, 0], sizes = [8, 128], strides = [1, 1]} : vector<8x512xf32> to vector<8x128xf32>
    %481 = arith.negf %480 : vector<8x128xf32>
    %482 = math.exp %481 : vector<8x128xf32>
    %cst_127 = arith.constant 1.000000e+00 : f32
    %483 = vector.broadcast %cst_127 : f32 to vector<8x128xf32>
    %484 = arith.addf %483, %482 : vector<8x128xf32>
    %485 = arith.divf %483, %484 : vector<8x128xf32>
    %486 = vector.extract_strided_slice %479 {offsets = [0, 128], sizes = [8, 128], strides = [1, 1]} : vector<8x512xf32> to vector<8x128xf32>
    %487 = arith.negf %486 : vector<8x128xf32>
    %488 = math.exp %487 : vector<8x128xf32>
    %cst_128 = arith.constant 1.000000e+00 : f32
    %489 = vector.broadcast %cst_128 : f32 to vector<8x128xf32>
    %490 = arith.addf %489, %488 : vector<8x128xf32>
    %491 = arith.divf %489, %490 : vector<8x128xf32>
    %492 = vector.extract_strided_slice %479 {offsets = [0, 256], sizes = [8, 128], strides = [1, 1]} : vector<8x512xf32> to vector<8x128xf32>
    %493 = math.tanh %492 : vector<8x128xf32>
    %494 = vector.extract_strided_slice %479 {offsets = [0, 384], sizes = [8, 128], strides = [1, 1]} : vector<8x512xf32> to vector<8x128xf32>
    %495 = arith.negf %494 : vector<8x128xf32>
    %496 = math.exp %495 : vector<8x128xf32>
    %cst_129 = arith.constant 1.000000e+00 : f32
    %497 = vector.broadcast %cst_129 : f32 to vector<8x128xf32>
    %498 = arith.addf %497, %496 : vector<8x128xf32>
    %499 = arith.divf %497, %498 : vector<8x128xf32>
    %500 = arith.mulf %491, %441 : vector<8x128xf32>
    %501 = arith.mulf %485, %493 : vector<8x128xf32>
    %502 = arith.addf %500, %501 : vector<8x128xf32>
    %503 = math.tanh %502 : vector<8x128xf32>
    %504 = arith.mulf %499, %503 : vector<8x128xf32>
    %c8_i32_130 = arith.constant 8 : i32
    %c0_131 = arith.constant 0 : index
    %c0_132 = arith.constant 0 : index
    %505 = vector.load %arg13[%c0_131, %c0_132] : memref<8x128xf32, #tpu.memory_space<vmem>>, vector<8x128xf32>
    tpu.vector_store %arg13[%c0_131, %c0_132], %475 {strides = array<i32>} : memref<8x128xf32, #tpu.memory_space<vmem>>, vector<8x128xf32>,
    %c0_133 = arith.constant 0 : index
    %c0_134 = arith.constant 0 : index
    %506 = vector.load %arg14[%c0_133, %c0_134] : memref<8x128xf32, #tpu.memory_space<vmem>>, vector<8x128xf32>
    tpu.vector_store %arg14[%c0_133, %c0_134], %473 {strides = array<i32>} : memref<8x128xf32, #tpu.memory_space<vmem>>, vector<8x128xf32>,
    %c0_135 = arith.constant 0 : index
    %c0_136 = arith.constant 0 : index
    %507 = vector.load %arg15[%c0_135, %c0_136] : memref<8x128xf32, #tpu.memory_space<vmem>>, vector<8x128xf32>
    tpu.vector_store %arg15[%c0_135, %c0_136], %504 {strides = array<i32>} : memref<8x128xf32, #tpu.memory_space<vmem>>, vector<8x128xf32>,
    %c0_137 = arith.constant 0 : index
    %c0_138 = arith.constant 0 : index
    %508 = vector.load %arg16[%c0_137, %c0_138] : memref<8x128xf32, #tpu.memory_space<vmem>>, vector<8x128xf32>
    tpu.vector_store %arg16[%c0_137, %c0_138], %502 {strides = array<i32>} : memref<8x128xf32, #tpu.memory_space<vmem>>, vector<8x128xf32>,
    %c0_i32_139 = arith.constant 0 : i32
    %509 = arith.cmpi eq, %arg0, %c0_i32_139 : i32
    %510 = arith.extui %509 : i1 to i32
    %c0_i32_140 = arith.constant 0 : i32
    %511 = arith.cmpi ne, %510, %c0_i32_140 : i32
    scf.if %511 {
      %c0_141 = arith.constant 0 : index
      %c0_142 = arith.constant 0 : index
      %512 = vector.load %arg15[%c0_141, %c0_142] : memref<8x128xf32, #tpu.memory_space<vmem>>, vector<8x128xf32>
      %c0_143 = arith.constant 0 : index
      %c0_144 = arith.constant 0 : index
      %513 = vector.load %arg7[%c0_143, %c0_144] : memref<128x128xf32, #tpu.memory_space<vmem>>, vector<128x128xf32>
      %cst_145 = arith.constant dense<0.000000e+00> : vector<8x128xf32>
      %514 = tpu.matmul %512, %513, %cst_145 {dimension_numbers = #tpu.dot_dimension_numbers<[1], [0], [0], [1], [0, 0, 1, 1], [], []>} : vector<8x128xf32>, vector<128x128xf32>, vector<8x128xf32> -> vector<8x128xf32>
      %c0_146 = arith.constant 0 : index
      %c0_147 = arith.constant 0 : index
      %515 = vector.load %arg8[%c0_146, %c0_147] : memref<1x128xf32, #tpu.memory_space<vmem>>, vector<1x128xf32>
      %516 = vector.broadcast %515 : vector<1x128xf32> to vector<8x128xf32>
      %517 = arith.addf %514, %516 : vector<8x128xf32>
      %cst_148 = arith.constant 0.000000e+00 : f32
      %518 = vector.broadcast %cst_148 : f32 to vector<8x128xf32>
      %519 = arith.maximumf %517, %518 : vector<8x128xf32>
      %c0_149 = arith.constant 0 : index
      %c0_150 = arith.constant 0 : index
      %520 = vector.load %arg9[%c0_149, %c0_150] : memref<128x128xf32, #tpu.memory_space<vmem>>, vector<128x128xf32>
      %cst_151 = arith.constant dense<0.000000e+00> : vector<8x128xf32>
      %521 = tpu.matmul %519, %520, %cst_151 {dimension_numbers = #tpu.dot_dimension_numbers<[1], [0], [0], [1], [0, 0, 1, 1], [], []>} : vector<8x128xf32>, vector<128x128xf32>, vector<8x128xf32> -> vector<8x128xf32>
      %c0_152 = arith.constant 0 : index
      %c0_153 = arith.constant 0 : index
      %522 = vector.load %arg10[%c0_152, %c0_153] : memref<1x128xf32, #tpu.memory_space<vmem>>, vector<1x128xf32>
      %523 = vector.broadcast %522 : vector<1x128xf32> to vector<8x128xf32>
      %524 = arith.addf %521, %523 : vector<8x128xf32>
      %525 = arith.negf %524 : vector<8x128xf32>
      %526 = math.exp %525 : vector<8x128xf32>
      %cst_154 = arith.constant 1.000000e+00 : f32
      %527 = vector.broadcast %cst_154 : f32 to vector<8x128xf32>
      %528 = arith.addf %527, %526 : vector<8x128xf32>
      %529 = arith.divf %527, %528 : vector<8x128xf32>
      %c0_155 = arith.constant 0 : index
      %c0_156 = arith.constant 0 : index
      %530 = vector.load %arg11[%c0_155, %c0_156] : memref<8x128xf32, #tpu.memory_space<vmem>>, vector<8x128xf32>
      tpu.vector_store %arg11[%c0_155, %c0_156], %529 {strides = array<i32>} : memref<8x128xf32, #tpu.memory_space<vmem>>, vector<8x128xf32>,
    } else {
    }
    return
  }
  func.func @transform_0(%arg0: i32) -> (i32, i32) {
    %c0_i32 = arith.constant 0 : i32
    %c0_i32_0 = arith.constant 0 : i32
    return %arg0, %c0_i32 : i32, i32
  }
  func.func @transform_1(%arg0: i32) -> (i32, i32) {
    %c0_i32 = arith.constant 0 : i32
    %c0_i32_0 = arith.constant 0 : i32
    %c0_i32_1 = arith.constant 0 : i32
    return %c0_i32, %c0_i32_0 : i32, i32
  }
  func.func @transform_2(%arg0: i32) -> (i32, i32) {
    %c0_i32 = arith.constant 0 : i32
    %c0_i32_0 = arith.constant 0 : i32
    %c0_i32_1 = arith.constant 0 : i32
    return %c0_i32, %c0_i32_0 : i32, i32
  }
  func.func @transform_3(%arg0: i32) -> (i32, i32) {
    %c0_i32 = arith.constant 0 : i32
    %c0_i32_0 = arith.constant 0 : i32
    %c0_i32_1 = arith.constant 0 : i32
    return %c0_i32, %c0_i32_0 : i32, i32
  }
  func.func @transform_4(%arg0: i32) -> (i32, i32) {
    %c0_i32 = arith.constant 0 : i32
    %c0_i32_0 = arith.constant 0 : i32
    %c0_i32_1 = arith.constant 0 : i32
    return %c0_i32, %c0_i32_0 : i32, i32
  }
  func.func @transform_5(%arg0: i32) -> (i32, i32) {
    %c0_i32 = arith.constant 0 : i32
    %c0_i32_0 = arith.constant 0 : i32
    %c0_i32_1 = arith.constant 0 : i32
    return %c0_i32, %c0_i32_0 : i32, i32
  }
  func.func @transform_6(%arg0: i32) -> (i32, i32) {
    %c0_i32 = arith.constant 0 : i32
    %c0_i32_0 = arith.constant 0 : i32
    %c0_i32_1 = arith.constant 0 : i32
    return %c0_i32, %c0_i32_0 : i32, i32
  }
  func.func @transform_7(%arg0: i32) -> (i32, i32) {
    %c0_i32 = arith.constant 0 : i32
    %c0_i32_0 = arith.constant 0 : i32
    %c0_i32_1 = arith.constant 0 : i32
    return %c0_i32, %c0_i32_0 : i32, i32
  }
  func.func @transform_8(%arg0: i32) -> (i32, i32) {
    %c0_i32 = arith.constant 0 : i32
    %c0_i32_0 = arith.constant 0 : i32
    %c0_i32_1 = arith.constant 0 : i32
    return %c0_i32, %c0_i32_0 : i32, i32
  }
  func.func @transform_9(%arg0: i32) -> (i32, i32) {
    %c0_i32 = arith.constant 0 : i32
    %c0_i32_0 = arith.constant 0 : i32
    %c0_i32_1 = arith.constant 0 : i32
    return %c0_i32, %c0_i32_0 : i32, i32
  }
  func.func @transform_10(%arg0: i32) -> (i32, i32) {
    %c0_i32 = arith.constant 0 : i32
    %c0_i32_0 = arith.constant 0 : i32
    %c0_i32_1 = arith.constant 0 : i32
    return %c0_i32, %c0_i32_0 : i32, i32
  }
}

</mosaic_0001>

<bundles_post_ra>
// kernel: tpu_custom_call.1
= control target key start
LH: loop header
LB: loop body
LE: loop exit
PB: predicated region body
PF: predicated region fallthrough
CT: control target
= control target key end

     0   :  { %15 = vsyncpa [#allocation8], 0  ;;  %s7207_s0 = inlined_call_operand.vmem [shape: f32[64,16], index: 0, kind: input, shape index: {}]   ;;  %s7208_s1 = inlined_call_operand.vmem [shape: f32[16,512], index: 1, kind: input, shape index: {}]   ;;  %s7209_s2 = inlined_call_operand.hbm [shape: f32[128,512], index: 2, kind: input, shape index: {}]   ;;  %s7210_s3 = inlined_call_operand.vmem [shape: f32[1,512], index: 3, kind: input, shape index: {}]   ;;  %s7211_s4 = inlined_call_operand.hbm [shape: f32[256,512], index: 4, kind: input, shape index: {}]   ;;  %s7212_s5 = inlined_call_operand.vmem [shape: f32[1,512], index: 5, kind: input, shape index: {}]   ;;  %s7213_s6 = inlined_call_operand.hbm [shape: f32[128,128], index: 6, kind: input, shape index: {}]   ;;  %s7214_s7 = inlined_call_operand.vmem [shape: f32[1,128], index: 7, kind: input, shape index: {}]   ;;  %s7215_s8 = inlined_call_operand.hbm [shape: f32[128,128], index: 8, kind: input, shape index: {}]   ;;  %s7216_s9 = inlined_call_operand.vmem [shape: f32[1,128], index: 9, kind: input, shape index: {}]   ;;  %s7217_s10 = inlined_call_operand.hbm [shape: f32[8,128], index: 10, kind: output, shape index: {}]  }
   0x1   :  { %16 = vsyncpa [#allocation11], 0 }
   0x2   :  { %17 = vsyncpa [#allocation14], 0 }
   0x3   :  { %18 = vsyncpa [#allocation9], 0  ;;  %s5825_s13 = smov [#allocation10]   ;;  %s5826_s15 = smov [#allocation7]  }
   0x4   :  { %s42_s14 = sshll.u32 %s5825_s13, 4  ;;  %s28_s16 = sshll.u32 %s5826_s15, 4  ;;  %s43_s14 = int_to_ptr.vmem [resolvable:$true] %s42_s14  ;;  %s5892_s16 = int_to_ptr.vmem [resolvable:$true] %s28_s16 }
   0x5   :  { %s5707_s19 = scalar_lea.hbm %s7211_s4, 16384 }
   0x6   :  { %p5708_p0 = scmp.ne.s32.totalorder %s7211_s4, %s5707_s19  ;;  %p5711_p1 = scmp.lt.u32.totalorder %s5707_s19, %s7211_s4 }
   0x8   :  { %p5713_p2 = pnand %p5711_p1, %p5708_p0 }
   0xa   :  { %5716 = shalt.err (!%p5713_p2)
}
   0xb   :  { %s5717_s24 = scalar_lea.vmem %s43_s14, 16384  ;;  %p5722_p4 = scmp.lt.s32.totalorder %s43_s14, %s43_s14 }
   0xc   :  { %p5718_p3 = scmp.ne.s32.totalorder %s43_s14, %s5717_s24  ;;  %p5723_p5 = scmp.lt.s32.totalorder %s5717_s24, %s5717_s24 }
   0xe   :  { %p5724_p6 = por %p5723_p5, %p5722_p4 }
  0x10   :  { %p5725_p7 = pnand %p5724_p6, %p5718_p3 }
  0x12   :  { %5728 = shalt.err (!%p5725_p7)
}
  0x13   :  { %s5827_s25 = smov 512   ;;  %s5828_s26 = smov 32  }
  0x14   :  { %48 = dma.hbm_to_vmem [thread:$0]  %s7211_s4, 16384, %s43_s14, [#allocation11], %s5827_s25, %s5827_s25, %s5828_s26  }
  0x15   :  { %s5729_s11 = scalar_lea.hbm %s7209_s2, 8192 }
  0x16   :  { %p5730_p8 = scmp.ne.s32.totalorder %s7209_s2, %s5729_s11  ;;  %p5733_p9 = scmp.lt.u32.totalorder %s5729_s11, %s7209_s2 }
  0x18   :  { %p5735_p10 = pnand %p5733_p9, %p5730_p8 }
  0x1a   :  { %5738 = shalt.err (!%p5735_p10)
}
  0x1b   :  { %s5739_s18 = scalar_lea.vmem %s5892_s16, 8192  ;;  %p5744_p12 = scmp.lt.s32.totalorder %s5892_s16, %s5892_s16 }
  0x1c   :  { %p5740_p11 = scmp.ne.s32.totalorder %s5892_s16, %s5739_s18  ;;  %p5745_p13 = scmp.lt.s32.totalorder %s5739_s18, %s5739_s18 }
  0x1e   :  { %p5746_p0 = por %p5745_p13, %p5744_p12 }
  0x20   :  { %p5747_p1 = pnand %p5746_p0, %p5740_p11 }
  0x22   :  { %5750 = shalt.err (!%p5747_p1)
}
  0x23   :  { %34 = dma.hbm_to_vmem [thread:$0]  %s7209_s2, 8192, %s5892_s16, [#allocation8], %s5827_s25, %s5827_s25, %s5828_s26  }
  0x24   :  { %s5829_s19 = smov [#allocation12]   ;;  %s5751_s23 = scalar_lea.hbm %s7213_s6, 2048 }
  0x25   :  { %s56_s20 = sshll.u32 %s5829_s19, 4  ;;  %p5752_p2 = scmp.ne.s32.totalorder %s7213_s6, %s5751_s23  ;;  %s57_s20 = int_to_ptr.vmem [resolvable:$true] %s56_s20 }
  0x26   :  { %p5755_p3 = scmp.lt.u32.totalorder %s5751_s23, %s7213_s6 }
  0x28   :  { %p5757_p4 = pnand %p5755_p3, %p5752_p2 }
  0x2a   :  { %5760 = shalt.err (!%p5757_p4)
}
  0x2b   :  { %s5761_s30 = scalar_lea.vmem %s57_s20, 2048  ;;  %p5766_p6 = scmp.lt.s32.totalorder %s57_s20, %s57_s20 }
  0x2c   :  { %p5762_p5 = scmp.ne.s32.totalorder %s57_s20, %s5761_s30  ;;  %p5767_p7 = scmp.lt.s32.totalorder %s5761_s30, %s5761_s30 }
  0x2e   :  { %p5768_p8 = por %p5767_p7, %p5766_p6 }
  0x30   :  { %p5769_p9 = pnand %p5768_p8, %p5762_p5 }
  0x32   :  { %5772 = shalt.err (!%p5769_p9)
}
  0x33   :  { %s5830_s2 = smov 128   ;;  %s5831_s16 = smov 8  }
  0x34   :  { %62 = dma.hbm_to_vmem [thread:$0]  %s7213_s6, 2048, %s57_s20, [#allocation11], %s5830_s2, %s5830_s2, %s5831_s16  }
  0x35   :  { %s5832_s11 = smov [#allocation13]   ;;  %s5773_s17 = scalar_lea.hbm %s7215_s8, 2048 }
  0x36   :  { %s70_s12 = sshll.u32 %s5832_s11, 4  ;;  %p5774_p10 = scmp.ne.s32.totalorder %s7215_s8, %s5773_s17  ;;  %s71_s12 = int_to_ptr.vmem [resolvable:$true] %s70_s12 }
  0x37   :  { %p5777_p11 = scmp.lt.u32.totalorder %s5773_s17, %s7215_s8 }
  0x39   :  { %p5779_p12 = pnand %p5777_p11, %p5774_p10 }
  0x3b   :  { %5782 = shalt.err (!%p5779_p12)
}
  0x3c   :  { %s5783_s21 = scalar_lea.vmem %s71_s12, 2048  ;;  %p5788_p0 = scmp.lt.s32.totalorder %s71_s12, %s71_s12 }
  0x3d   :  { %p5784_p13 = scmp.ne.s32.totalorder %s71_s12, %s5783_s21  ;;  %p5789_p1 = scmp.lt.s32.totalorder %s5783_s21, %s5783_s21 }
  0x3f   :  { %p5790_p2 = por %p5789_p1, %p5788_p0 }
  0x41   :  { %p5791_p3 = pnand %p5790_p2, %p5784_p13 }
  0x43   :  { %5794 = shalt.err (!%p5791_p3)
}
  0x44   :  { %76 = dma.hbm_to_vmem [thread:$0]  %s7215_s8, 2048, %s71_s12, [#allocation14], %s5830_s2, %s5830_s2, %s5831_s16  }
  0x45   :  { %5817 = dma.done.wait [#allocation8], 8192  }
  0x46   :  { %5818 = vsyncadd [#allocation8], 4294959104 }
  0x47   :  { %5819 = dma.done.wait [#allocation11], 18432  }
  0x48   :  { %5820 = vsyncadd [#allocation11], 4294948864 }
  0x49   :  { %5821 = dma.done.wait [#allocation14], 2048  }
  0x4a   :  { %5822 = vsyncadd [#allocation14], 4294965248  ;;  %v7218_v0 = vmov 0.0   ;;  %v108_v1 = vld [vmem:[%s7208_s1 + $0x8] sm:$0xff]  ;;  %v110_v3 = vld [vmem:[%s7208_s1 + $0x18] sm:$0xff]  ;;  %vm137_vm0 = vcmask 130048  }
  0x4b   :  { %226 = vmatprep.mubr.f32.mxu0 %v7218_v0  ;;  %339 = vmatprep.mubr.f32.mxu1 %v7218_v0  ;;  %v112_v2 = vld [vmem:[%s7208_s1 + $0x28] sm:$0xff]  ;;  %v114_v5 = vld [vmem:[%s7208_s1 + $0x38] sm:$0xff]  ;;  %v107_v6 = vld [vmem:[%s7208_s1] sm:$0xff]  ;;  %vm5835_vm1 = vmmov 0   ;;  %s5836_s11 = smov [#allocation15]  }
  0x4c   :  { %v3779_v4 = vpack.c.bf16 %v112_v2, %v108_v1  ;;  %v111_v7 = vld [vmem:[%s7208_s1 + $0x20] sm:$0xff]  ;;  %v3783_v8 = vpack.c.bf16 %v114_v5, %v110_v3  ;;  %v109_v10 = vld [vmem:[%s7208_s1 + $0x10] sm:$0xff]  ;;  %v454_v14 = vld [vmem:[#allocation7 + $0x8] sm:$0xff]  ;;  %s3590_s12 = sshll.u32 %s5836_s11, 4  ;;  %s3591_s12 = int_to_ptr.vmem [resolvable:$true] %s3590_s12 }
  0x4d   :  { %v3781_v9 = vpack.c.bf16 %v111_v7, %v107_v6  ;;  %v113_v11 = vld [vmem:[%s7208_s1 + $0x30] sm:$0xff]  ;;  %v99_v12 = vld [vmem:[%s7207_s0] sm:$0xff]  ;;  %v458_v15 = vld [vmem:[#allocation7 + $0x28] sm:$0xff]  ;;  %p5800_p5 = scmp.lt.s32.totalorder %s3591_s12, %s3591_s12 }
  0x4e   :  { %3780 = vmatprep.subr.bf16.mxu0 %v3779_v4  ;;  %v3785_v13 = vpack.c.bf16 %v113_v11, %v109_v10  ;;  %v456_v16 = vld [vmem:[#allocation7 + $0x18] sm:$0xff]  ;;  %3784 = vmatprep.subr.bf16.mxu1 %v3783_v8  ;;  %v5976_v17 = vpack.c.bf16 %v458_v15, %v454_v14  ;;  %v453_v19 = vld [vmem:[#allocation7] sm:$0xff]  ;;  %v455_v23 = vld [vmem:[#allocation7 + $0x10] sm:$0xff] }
  0x4f   :  { %3782 = vmatpush1.bf16.msra.mxu0 %v3781_v9  ;;  %v460_v18 = vld [vmem:[#allocation7 + $0x38] sm:$0xff]  ;;  %v457_v20 = vld [vmem:[#allocation7 + $0x20] sm:$0xff]  ;;  %v459_v24 = vld [vmem:[#allocation7 + $0x30] sm:$0xff] }
  0x50   :  { %7352 = vst [vmem:[#allocation20_spill] sm:$0xff] %v5976_v17  ;;  %3786 = vmatpush1.bf16.msra.mxu1 %v3785_v13  ;;  %v5978_v21 = vpack.c.bf16 %v460_v18, %v456_v16  ;;  %v5980_v22 = vpack.c.bf16 %v457_v20, %v453_v19  ;;  %3788 = vmatprep.subr.bf16.mxu0 %v5976_v17  ;;  %v462_v26 = vld [vmem:[#allocation7 + $0x48] sm:$0xff]  ;;  %v464_v28 = vld [vmem:[#allocation7 + $0x58] sm:$0xff]  ;;  %v461_v31 = vld [vmem:[#allocation7 + $0x40] sm:$0xff] }
  0x51   :  { %v5983_v25 = vpack.c.bf16 %v459_v24, %v455_v23  ;;  %v466_v27 = vld [vmem:[#allocation7 + $0x68] sm:$0xff]  ;;  %v468_v30 = vld [vmem:[#allocation7 + $0x78] sm:$0xff]  ;;  %v465_v32 = vld [vmem:[#allocation7 + $0x60] sm:$0xff] }
  0x52   :  { %7353 = vst [vmem:[#allocation21_spill] sm:$0xff] %v5978_v21  ;;  %3608 = vmatmul.mubr.msk.f32.vlgmr.msra.gmra.mrb[0].mxu0 %vm137_vm0, %v99_v12  ;;  %3820 = vmatprep.subr.bf16.mxu1 %v5978_v21  ;;  %v5987_v29 = vpack.c.bf16 %v466_v27, %v462_v26  ;;  %v100_v33 = vld [vmem:[%s7207_s0 + $0x8] sm:$0xff]  ;;  %v5994_v34 = vpack.c.bf16 %v468_v30, %v464_v28  ;;  %v463_v36 = vld [vmem:[#allocation7 + $0x50] sm:$0xff]  ;;  %v472_v41 = vld [vmem:[#allocation7 + $0x98] sm:$0xff] }
  0x53   :  { %3616 = vmatmul.mubr.msk.f32.vlgmr.msra.gmra.mrb[0].mxu1 %vm137_vm0, %v99_v12  ;;  %3790 = vmatpush1.bf16.msra.mxu0 %v5980_v22  ;;  %v5996_v35 = vpack.c.bf16 %v465_v32, %v461_v31  ;;  %v467_v37 = vld [vmem:[#allocation7 + $0x70] sm:$0xff]  ;;  %v470_v39 = vld [vmem:[#allocation7 + $0x88] sm:$0xff]  ;;  %v476_v43 = vld [vmem:[#allocation7 + $0xb8] sm:$0xff] }
  0x54   :  { %3822 = vmatpush1.bf16.msra.mxu1 %v5983_v25  ;;  %232 = vmatprep.mubr.f32.mxu0 %v7218_v0  ;;  %v6000_v38 = vpack.c.bf16 %v467_v37, %v463_v36  ;;  %v474_v40 = vld [vmem:[#allocation7 + $0xa8] sm:$0xff]  ;;  %v469_v44 = vld [vmem:[#allocation7 + $0x80] sm:$0xff]  ;;  %v101_v46 = vld [vmem:[%s7207_s0 + $0x10] sm:$0xff]  ;;  %v6011_v47 = vpack.c.bf16 %v476_v43, %v472_v41 }
  0x55   :  { %345 = vmatprep.mubr.f32.mxu1 %v7218_v0  ;;  %3792 = vmatprep.subr.bf16.mxu0 %v5987_v29  ;;  %v6004_v42 = vpack.c.bf16 %v474_v40, %v470_v39  ;;  %v473_v45 = vld [vmem:[#allocation7 + $0xa0] sm:$0xff]  ;;  %v471_v48 = vld [vmem:[#allocation7 + $0x90] sm:$0xff]  ;;  %v478_v51 = vld [vmem:[#allocation7 + $0xc8] sm:$0xff] }
  0x56   :  { %3609 = vmatmul.mubr.msk.f32.gmra.mrb[2].mxu0 %vm137_vm0, %v100_v33  ;;  %3824 = vmatprep.subr.bf16.mxu1 %v5994_v34  ;;  %v475_v49 = vld [vmem:[#allocation7 + $0xb0] sm:$0xff]  ;;  %v6015_v50 = vpack.c.bf16 %v473_v45, %v469_v44  ;;  %v482_v52 = vld [vmem:[#allocation7 + $0xe8] sm:$0xff]  ;;  %v480_v53 = vld [vmem:[#allocation7 + $0xd8] sm:$0xff] }
  0x57   :  { %3617 = vmatmul.mubr.msk.f32.gmra.mrb[2].mxu1 %vm137_vm0, %v100_v33  ;;  %3794 = vmatpush1.bf16.msra.mxu0 %v5996_v35  ;;  %v6019_v54 = vpack.c.bf16 %v475_v49, %v471_v48  ;;  %v484_v55 = vld [vmem:[#allocation7 + $0xf8] sm:$0xff]  ;;  %v477_v56 = vld [vmem:[#allocation7 + $0xc0] sm:$0xff]  ;;  %v6023_v58 = vpack.c.bf16 %v482_v52, %v478_v51  ;;  %v479_v59 = vld [vmem:[#allocation7 + $0xd0] sm:$0xff] }
  0x58   :  { %3826 = vmatpush1.bf16.msra.mxu1 %v6000_v38  ;;  %238 = vmatprep.mubr.f32.mxu0 %v7218_v0  ;;  %v481_v57 = vld [vmem:[#allocation7 + $0xe0] sm:$0xff]  ;;  %v483_v60 = vld [vmem:[#allocation7 + $0xf0] sm:$0xff]  ;;  %v6027_v61 = vpack.c.bf16 %v484_v55, %v480_v53  ;;  %v486_v62 = vld [vmem:[#allocation7 + $0x108] sm:$0xff] }
  0x59   :  { %351 = vmatprep.mubr.f32.mxu1 %v7218_v0  ;;  %3796 = vmatprep.subr.bf16.mxu0 %v6004_v42  ;;  %v490_v63 = vld [vmem:[#allocation7 + $0x128] sm:$0xff]  ;;  %v102_v1 = vld [vmem:[%s7207_s0 + $0x18] sm:$0xff]  ;;  %v6034_v2 = vpack.c.bf16 %v481_v57, %v477_v56  ;;  %v6038_v5 = vpack.c.bf16 %v483_v60, %v479_v59  ;;  %v485_v6 = vld [vmem:[#allocation7 + $0x100] sm:$0xff] }
  0x5a   :  { %3610 = vmatmul.mubr.msk.f32.gmra.mrb[4].mxu0 %vm137_vm0, %v101_v46  ;;  %3828 = vmatprep.subr.bf16.mxu1 %v6011_v47  ;;  %v488_v3 = vld [vmem:[#allocation7 + $0x118] sm:$0xff]  ;;  %v489_v7 = vld [vmem:[#allocation7 + $0x120] sm:$0xff]  ;;  %v6042_v8 = vpack.c.bf16 %v490_v63, %v486_v62  ;;  %v487_v9 = vld [vmem:[#allocation7 + $0x110] sm:$0xff] }
  0x5b   :  { %3618 = vmatmul.mubr.msk.f32.gmra.mrb[4].mxu1 %vm137_vm0, %v101_v46  ;;  %3798 = vmatpush1.bf16.msra.mxu0 %v6015_v50  ;;  %v492_v4 = vld [vmem:[#allocation7 + $0x138] sm:$0xff]  ;;  %v491_v10 = vld [vmem:[#allocation7 + $0x130] sm:$0xff]  ;;  %v494_v12 = vld [vmem:[#allocation7 + $0x148] sm:$0xff]  ;;  %v6053_v15 = vpack.c.bf16 %v489_v7, %v485_v6 }
  0x5c   :  { %3830 = vmatpush1.bf16.msra.mxu1 %v6019_v54  ;;  %244 = vmatprep.mubr.f32.mxu0 %v7218_v0  ;;  %v6046_v11 = vpack.c.bf16 %v492_v4, %v488_v3  ;;  %v498_v13 = vld [vmem:[#allocation7 + $0x168] sm:$0xff]  ;;  %v103_v14 = vld [vmem:[%s7207_s0 + $0x20] sm:$0xff]  ;;  %v496_v16 = vld [vmem:[#allocation7 + $0x158] sm:$0xff]  ;;  %v6057_v19 = vpack.c.bf16 %v491_v10, %v487_v9 }
  0x5d   :  { %357 = vmatprep.mubr.f32.mxu1 %v7218_v0  ;;  %3800 = vmatprep.subr.bf16.mxu0 %v6023_v58  ;;  %v500_v18 = vld [vmem:[#allocation7 + $0x178] sm:$0xff]  ;;  %v493_v20 = vld [vmem:[#allocation7 + $0x140] sm:$0xff]  ;;  %v6061_v24 = vpack.c.bf16 %v498_v13, %v494_v12  ;;  %v495_v26 = vld [vmem:[#allocation7 + $0x150] sm:$0xff] }
  0x5e   :  { %3611 = vmatmul.mubr.msk.f32.gmra.mrb[6].mxu0 %vm137_vm0, %v102_v1  ;;  %3832 = vmatprep.subr.bf16.mxu1 %v6027_v61  ;;  %v497_v23 = vld [vmem:[#allocation7 + $0x160] sm:$0xff]  ;;  %v499_v27 = vld [vmem:[#allocation7 + $0x170] sm:$0xff]  ;;  %v6065_v28 = vpack.c.bf16 %v500_v18, %v496_v16  ;;  %v502_v30 = vld [vmem:[#allocation7 + $0x188] sm:$0xff] }
  0x5f   :  { %3619 = vmatmul.mubr.msk.f32.gmra.mrb[6].mxu1 %vm137_vm0, %v102_v1  ;;  %3802 = vmatpush1.bf16.msra.mxu0 %v6034_v2  ;;  %v506_v31 = vld [vmem:[#allocation7 + $0x1a8] sm:$0xff]  ;;  %v6072_v33 = vpack.c.bf16 %v497_v23, %v493_v20  ;;  %v504_v36 = vld [vmem:[#allocation7 + $0x198] sm:$0xff]  ;;  %v6076_v39 = vpack.c.bf16 %v499_v27, %v495_v26  ;;  %v501_v40 = vld [vmem:[#allocation7 + $0x180] sm:$0xff] }
  0x60   :  { %3834 = vmatpush1.bf16.msra.mxu1 %v6038_v5  ;;  %250 = vmatprep.mubr.f32.mxu0 %v7218_v0  ;;  %v104_v32 = vld [vmem:[%s7207_s0 + $0x28] sm:$0xff]  ;;  %v508_v37 = vld [vmem:[#allocation7 + $0x1b8] sm:$0xff]  ;;  %v505_v41 = vld [vmem:[#allocation7 + $0x1a0] sm:$0xff]  ;;  %v6080_v43 = vpack.c.bf16 %v506_v31, %v502_v30 }
  0x61   :  { %363 = vmatprep.mubr.f32.mxu1 %v7218_v0  ;;  %3804 = vmatprep.subr.bf16.mxu0 %v6042_v8  ;;  %v503_v44 = vld [vmem:[#allocation7 + $0x190] sm:$0xff]  ;;  %v6084_v46 = vpack.c.bf16 %v508_v37, %v504_v36  ;;  %v510_v48 = vld [vmem:[#allocation7 + $0x1c8] sm:$0xff]  ;;  %v6091_v52 = vpack.c.bf16 %v505_v41, %v501_v40  ;;  %v512_v53 = vld [vmem:[#allocation7 + $0x1d8] sm:$0xff] }
  0x62   :  { %3612 = vmatmul.mubr.msk.f32.gmra.mrb[8].mxu0 %vm137_vm0, %v103_v14  ;;  %3836 = vmatprep.subr.bf16.mxu1 %v6046_v11  ;;  %v507_v45 = vld [vmem:[#allocation7 + $0x1b0] sm:$0xff]  ;;  %v514_v49 = vld [vmem:[#allocation7 + $0x1e8] sm:$0xff]  ;;  %v516_v55 = vld [vmem:[#allocation7 + $0x1f8] sm:$0xff] }
  0x63   :  { %3620 = vmatmul.mubr.msk.f32.gmra.mrb[8].mxu1 %vm137_vm0, %v103_v14  ;;  %3806 = vmatpush1.bf16.msra.mxu0 %v6053_v15  ;;  %v105_v51 = vld [vmem:[%s7207_s0 + $0x30] sm:$0xff]  ;;  %v6095_v56 = vpack.c.bf16 %v507_v45, %v503_v44  ;;  %v509_v57 = vld [vmem:[#allocation7 + $0x1c0] sm:$0xff]  ;;  %v6099_v60 = vpack.c.bf16 %v514_v49, %v510_v48  ;;  %v6103_v1 = vpack.c.bf16 %v516_v55, %v512_v53  ;;  %v688_v3 = vld [vmem:[#allocation10 + $0x8] sm:$0xff] }
  0x64   :  { %3838 = vmatpush1.bf16.msra.mxu1 %v6057_v19  ;;  %256 = vmatprep.mubr.f32.mxu0 %v7218_v0  ;;  %v513_v59 = vld [vmem:[#allocation7 + $0x1e0] sm:$0xff]  ;;  %v511_v62 = vld [vmem:[#allocation7 + $0x1d0] sm:$0xff]  ;;  %v692_v4 = vld [vmem:[#allocation10 + $0x28] sm:$0xff] }
  0x65   :  { %369 = vmatprep.mubr.f32.mxu1 %v7218_v0  ;;  %3808 = vmatprep.subr.bf16.mxu0 %v6061_v24  ;;  %v515_v63 = vld [vmem:[#allocation7 + $0x1f0] sm:$0xff]  ;;  %v106_v6 = vld [vmem:[%s7207_s0 + $0x38] sm:$0xff]  ;;  %v6110_v7 = vpack.c.bf16 %v513_v59, %v509_v57  ;;  %v687_v13 = vld [vmem:[#allocation10] sm:$0xff]  ;;  %v6118_v18 = vpack.c.bf16 %v692_v4, %v688_v3 }
  0x66   :  { %3613 = vmatmul.mubr.msk.f32.gmra.mrb[10].mxu0 %vm137_vm0, %v104_v32  ;;  %3840 = vmatprep.subr.bf16.mxu1 %v6065_v28  ;;  %v690_v9 = vld [vmem:[#allocation10 + $0x18] sm:$0xff]  ;;  %v6114_v12 = vpack.c.bf16 %v515_v63, %v511_v62  ;;  %v691_v14 = vld [vmem:[#allocation10 + $0x20] sm:$0xff]  ;;  %v689_v16 = vld [vmem:[#allocation10 + $0x10] sm:$0xff] }
  0x67   :  { %3621 = vmatmul.mubr.msk.f32.gmra.mrb[10].mxu1 %vm137_vm0, %v104_v32  ;;  %3810 = vmatpush1.bf16.msra.mxu0 %v6072_v33  ;;  %v694_v10 = vld [vmem:[#allocation10 + $0x38] sm:$0xff]  ;;  %v693_v20 = vld [vmem:[#allocation10 + $0x30] sm:$0xff]  ;;  %v696_v23 = vld [vmem:[#allocation10 + $0x48] sm:$0xff]  ;;  %v6126_v32 = vpack.c.bf16 %v691_v14, %v687_v13 }
  0x68   :  { %3842 = vmatpush1.bf16.msra.mxu1 %v6076_v39  ;;  %262 = vmatprep.mubr.f32.mxu0 %v7218_v0  ;;  %v700_v26 = vld [vmem:[#allocation10 + $0x68] sm:$0xff]  ;;  %v6122_v27 = vpack.c.bf16 %v694_v10, %v690_v9  ;;  %v698_v30 = vld [vmem:[#allocation10 + $0x58] sm:$0xff]  ;;  %v6130_v36 = vpack.c.bf16 %v693_v20, %v689_v16  ;;  %v695_v40 = vld [vmem:[#allocation10 + $0x40] sm:$0xff] }
  0x69   :  { %375 = vmatprep.mubr.f32.mxu1 %v7218_v0  ;;  %3812 = vmatprep.subr.bf16.mxu0 %v6080_v43  ;;  %v702_v31 = vld [vmem:[#allocation10 + $0x78] sm:$0xff]  ;;  %v6132_v37 = vpack.c.bf16 %v700_v26, %v696_v23  ;;  %v699_v41 = vld [vmem:[#allocation10 + $0x60] sm:$0xff]  ;;  %v697_v44 = vld [vmem:[#allocation10 + $0x50] sm:$0xff] }
  0x6a   :  { %3614 = vmatmul.mubr.msk.f32.gmra.mrb[12].mxu0 %vm137_vm0, %v105_v51  ;;  %3844 = vmatprep.subr.bf16.mxu1 %v6084_v46  ;;  %v6136_v45 = vpack.c.bf16 %v702_v31, %v698_v30  ;;  %v701_v48 = vld [vmem:[#allocation10 + $0x70] sm:$0xff]  ;;  %v704_v49 = vld [vmem:[#allocation10 + $0x88] sm:$0xff]  ;;  %v706_v53 = vld [vmem:[#allocation10 + $0x98] sm:$0xff]  ;;  %v6142_v57 = vpack.c.bf16 %v699_v41, %v695_v40 }
  0x6b   :  { %3622 = vmatmul.mubr.msk.f32.gmra.mrb[12].mxu1 %vm137_vm0, %v105_v51  ;;  %3814 = vmatpush1.bf16.msra.mxu0 %v6091_v52  ;;  %v708_v51 = vld [vmem:[#allocation10 + $0xa8] sm:$0xff]  ;;  %v710_v55 = vld [vmem:[#allocation10 + $0xb8] sm:$0xff]  ;;  %v6146_v59 = vpack.c.bf16 %v701_v48, %v697_v44  ;;  %v703_v63 = vld [vmem:[#allocation10 + $0x80] sm:$0xff] }
  0x6c   :  { %3846 = vmatpush1.bf16.msra.mxu1 %v6095_v56  ;;  %268 = vmatprep.mubr.f32.mxu0 %v7218_v0  ;;  %v6148_v62 = vpack.c.bf16 %v708_v51, %v704_v49  ;;  %v707_v3 = vld [vmem:[#allocation10 + $0xa0] sm:$0xff]  ;;  %v705_v4 = vld [vmem:[#allocation10 + $0x90] sm:$0xff]  ;;  %v712_v10 = vld [vmem:[#allocation10 + $0xc8] sm:$0xff] }
  0x6d   :  { %381 = vmatprep.mubr.f32.mxu1 %v7218_v0  ;;  %3816 = vmatprep.subr.bf16.mxu0 %v6099_v60  ;;  %v709_v9 = vld [vmem:[#allocation10 + $0xb0] sm:$0xff]  ;;  %v716_v13 = vld [vmem:[#allocation10 + $0xe8] sm:$0xff]  ;;  %v714_v14 = vld [vmem:[#allocation10 + $0xd8] sm:$0xff]  ;;  %v6156_v20 = vpack.c.bf16 %v707_v3, %v703_v63 }
  0x6e   :  { %3615 = vmatmul.mubr.msk.f32.gmra.mrb[14].mxu0 %vm137_vm0, %v106_v6  ;;  %3848 = vmatprep.subr.bf16.mxu1 %v6103_v1  ;;  %v718_v16 = vld [vmem:[#allocation10 + $0xf8] sm:$0xff]  ;;  %v6160_v23 = vpack.c.bf16 %v709_v9, %v705_v4  ;;  %v6162_v26 = vpack.c.bf16 %v716_v13, %v712_v10  ;;  %v711_v30 = vld [vmem:[#allocation10 + $0xc0] sm:$0xff]  ;;  %v713_v40 = vld [vmem:[#allocation10 + $0xd0] sm:$0xff] }
  0x6f   :  { %3623 = vmatmul.mubr.msk.f32.gmra.mrb[14].mxu1 %vm137_vm0, %v106_v6  ;;  %3818 = vmatpush1.bf16.msra.mxu0 %v6110_v7  ;;  %v6151_v6 = vpack.c.bf16 %v710_v55, %v706_v53  ;;  %7354 = vst [vmem:[#allocation22_spill] sm:$0xff] %v6156_v20  ;;  %v715_v31 = vld [vmem:[#allocation10 + $0xe0] sm:$0xff]  ;;  %v6165_v41 = vpack.c.bf16 %v718_v16, %v714_v14  ;;  %v717_v44 = vld [vmem:[#allocation10 + $0xf0] sm:$0xff]  ;;  %v720_v48 = vld [vmem:[#allocation10 + $0x108] sm:$0xff] }
  0x70   :  { %3850 = vmatpush1.bf16.msra.mxu1 %v6114_v12  ;;  %581 = vmatprep.mubr.f32.mxu0 %v7218_v0  ;;  %7355 = vst [vmem:[#allocation23_spill] sm:$0xff] %v6160_v23  ;;  %7356 = vst [vmem:[#allocation24_spill] sm:$0xff] %v6162_v26  ;;  %v724_v49 = vld [vmem:[#allocation10 + $0x128] sm:$0xff]  ;;  %v722_v51 = vld [vmem:[#allocation10 + $0x118] sm:$0xff]  ;;  %v6168_v55 = vpack.c.bf16 %v715_v31, %v711_v30  ;;  %v6172_v63 = vpack.c.bf16 %v717_v44, %v713_v40 }
  0x71   :  { %652 = vmatprep.mubr.f32.mxu1 %v7218_v0  ;;  %3852 = vmatprep.subr.bf16.mxu0 %v6118_v18  ;;  %7357 = vst [vmem:[#allocation25_spill] sm:$0xff] %v6165_v41  ;;  %v726_v53 = vld [vmem:[#allocation10 + $0x138] sm:$0xff]  ;;  %v6174_v3 = vpack.c.bf16 %v724_v49, %v720_v48  ;;  %v719_v4 = vld [vmem:[#allocation10 + $0x100] sm:$0xff]  ;;  %v721_v13 = vld [vmem:[#allocation10 + $0x110] sm:$0xff] }
  0x72   :  { %582 = vmatmul.mubr.f32.vlgmr.msra.gmra.mrb[0].mxu0 %v7218_v0  ;;  %3916 = vmatprep.subr.bf16.mxu1 %v6122_v27  ;;  %7358 = vst [vmem:[#allocation26_spill] sm:$0xff] %v6168_v55  ;;  %7359 = vst [vmem:[#allocation27_spill] sm:$0xff] %v6172_v63  ;;  %v723_v9 = vld [vmem:[#allocation10 + $0x120] sm:$0xff]  ;;  %v6177_v10 = vpack.c.bf16 %v726_v53, %v722_v51  ;;  %v725_v14 = vld [vmem:[#allocation10 + $0x130] sm:$0xff] }
  0x73   :  { %653 = vmatmul.mubr.f32.vlgmr.msra.gmra.mrb[0].mxu1 %v7218_v0  ;;  %3854 = vmatpush1.bf16.msra.mxu0 %v6126_v32  ;;  %7360 = vst [vmem:[#allocation28_spill] sm:$0xff] %v6174_v3  ;;  %v6180_v16 = vpack.c.bf16 %v723_v9, %v719_v4  ;;  %v6184_v30 = vpack.c.bf16 %v725_v14, %v721_v13  ;;  %v728_v31 = vld [vmem:[#allocation10 + $0x148] sm:$0xff]  ;;  %v730_v44 = vld [vmem:[#allocation10 + $0x158] sm:$0xff]  ;;  %v727_v51 = vld [vmem:[#allocation10 + $0x140] sm:$0xff] }
  0x74   :  { %3918 = vmatpush1.bf16.msra.mxu1 %v6130_v36  ;;  %3856 = vmatprep.subr.bf16.mxu0 %v6132_v37  ;;  %7361 = vst [vmem:[#allocation29_spill] sm:$0xff] %v6177_v10  ;;  %v732_v40 = vld [vmem:[#allocation10 + $0x168] sm:$0xff]  ;;  %v734_v49 = vld [vmem:[#allocation10 + $0x178] sm:$0xff]  ;;  %v731_v53 = vld [vmem:[#allocation10 + $0x160] sm:$0xff] }
  0x75   :  { %3920 = vmatprep.subr.bf16.mxu1 %v6136_v45  ;;  %879 = vmatprep.mubr.f32.mxu0 %v7218_v0  ;;  %7362 = vst [vmem:[#allocation30_spill] sm:$0xff] %v6180_v16  ;;  %7363 = vst [vmem:[#allocation31_spill] sm:$0xff] %v6184_v30  ;;  %v6189_v48 = vpack.c.bf16 %v732_v40, %v728_v31  ;;  %v6191_v4 = vpack.c.bf16 %v734_v49, %v730_v44  ;;  %v729_v13 = vld [vmem:[#allocation10 + $0x150] sm:$0xff]  ;;  %v740_v31 = vld [vmem:[#allocation10 + $0x1a8] sm:$0xff] }
  0x76   :  { %950 = vmatprep.mubr.f32.mxu1 %v7218_v0  ;;  %v6193_v9 = vpack.c.bf16 %v731_v53, %v727_v51  ;;  %v733_v14 = vld [vmem:[#allocation10 + $0x170] sm:$0xff]  ;;  %v738_v40 = vld [vmem:[#allocation10 + $0x198] sm:$0xff]  ;;  %v735_v49 = vld [vmem:[#allocation10 + $0x180] sm:$0xff] }
  0x77   :  { %3858 = vmatpush1.bf16.msra.mxu0 %v6142_v57  ;;  %7364 = vst [vmem:[#allocation32_spill] sm:$0xff] %v6189_v48  ;;  %7365 = vst [vmem:[#allocation33_spill] sm:$0xff] %v6191_v4  ;;  %v6196_v0 = vpack.c.bf16 %v733_v14, %v729_v13  ;;  %v742_v44 = vld [vmem:[#allocation10 + $0x1b8] sm:$0xff]  ;;  %v739_v51 = vld [vmem:[#allocation10 + $0x1a0] sm:$0xff] }
  0x78   :  { %3922 = vmatpush1.bf16.msra.mxu1 %v6146_v59  ;;  %3860 = vmatprep.subr.bf16.mxu0 %v6148_v62  ;;  %7366 = vst [vmem:[#allocation34_spill] sm:$0xff] %v6193_v9  ;;  %v6203_v53 = vpack.c.bf16 %v742_v44, %v738_v40  ;;  %v737_v13 = vld [vmem:[#allocation10 + $0x190] sm:$0xff]  ;;  %v750_v40 = vld [vmem:[#allocation10 + $0x1f8] sm:$0xff]  ;;  %v743_v44 = vld [vmem:[#allocation10 + $0x1c0] sm:$0xff] }
  0x79   :  { %3924 = vmatprep.subr.bf16.mxu1 %v6151_v6  ;;  %7367 = vst [vmem:[#allocation35_spill] sm:$0xff] %v6196_v0  ;;  %v741_v14 = vld [vmem:[#allocation10 + $0x1b0] sm:$0xff] }
  0x7a   :  { %7369 = vst [vmem:[#allocation37_spill] sm:$0xff] %v6203_v53 }
  0x7b   :  { %3862 = vmatpush1.bf16.msra.mxu0 %v6156_v20 }
  0x7c   :  { %3926 = vmatpush1.bf16.msra.mxu1 %v6160_v23  ;;  %3864 = vmatprep.subr.bf16.mxu0 %v6162_v26 }
  0x7d   :  { %3928 = vmatprep.subr.bf16.mxu1 %v6165_v41 }
  0x7f   :  { %3866 = vmatpush1.bf16.msra.mxu0 %v6168_v55 }
  0x80   :  { %3930 = vmatpush1.bf16.msra.mxu1 %v6172_v63  ;;  %3868 = vmatprep.subr.bf16.mxu0 %v6174_v3  ;;  %v802_v3 = vld [vmem:[#allocation10 + $0x398] sm:$0xff] }
  0x81   :  { %3932 = vmatprep.subr.bf16.mxu1 %v6177_v10  ;;  %v6205_v10 = vpack.c.bf16 %v739_v51, %v735_v49  ;;  %v747_v49 = vld [vmem:[#allocation10 + $0x1e0] sm:$0xff]  ;;  %v806_v63 = vld [vmem:[#allocation10 + $0x3b8] sm:$0xff] }
  0x83   :  { %3870 = vmatpush1.bf16.msra.mxu0 %v6180_v16  ;;  %7370 = vst [vmem:[#allocation38_spill] sm:$0xff] %v6205_v10 }
  0x84   :  { %3934 = vmatpush1.bf16.msra.mxu1 %v6184_v30  ;;  %3872 = vmatprep.subr.bf16.mxu0 %v6189_v48  ;;  %v736_v30 = vld [vmem:[#allocation10 + $0x188] sm:$0xff]  ;;  %v6217_v48 = vpack.c.bf16 %v747_v49, %v743_v44  ;;  %v755_v44 = vld [vmem:[#allocation10 + $0x220] sm:$0xff] }
  0x85   :  { %3936 = vmatprep.subr.bf16.mxu1 %v6191_v4  ;;  %v6201_v16 = vpack.c.bf16 %v740_v31, %v736_v30  ;;  %v6208_v4 = vpack.c.bf16 %v741_v14, %v737_v13  ;;  %v748_v30 = vld [vmem:[#allocation10 + $0x1e8] sm:$0xff]  ;;  %v746_v31 = vld [vmem:[#allocation10 + $0x1d8] sm:$0xff]  ;;  %v745_v13 = vld [vmem:[#allocation10 + $0x1d0] sm:$0xff] }
  0x86   :  { %v6215_v51 = vpack.c.bf16 %v750_v40, %v746_v31  ;;  %7374 = vst [vmem:[#allocation42_spill] sm:$0xff] %v6217_v48  ;;  %v749_v14 = vld [vmem:[#allocation10 + $0x1f0] sm:$0xff]  ;;  %v758_v31 = vld [vmem:[#allocation10 + $0x238] sm:$0xff]  ;;  %v751_v40 = vld [vmem:[#allocation10 + $0x200] sm:$0xff] }
  0x87   :  { %3874 = vmatpush1.bf16.msra.mxu0 %v6193_v9  ;;  %7368 = vst [vmem:[#allocation36_spill] sm:$0xff] %v6201_v16  ;;  %7371 = vst [vmem:[#allocation39_spill] sm:$0xff] %v6208_v4 }
  0x88   :  { %3938 = vmatpush1.bf16.msra.mxu1 %v6196_v0  ;;  %3876 = vmatprep.subr.bf16.mxu0 %v6201_v16  ;;  %v744_v0 = vld [vmem:[#allocation10 + $0x1c8] sm:$0xff]  ;;  %7373 = vst [vmem:[#allocation41_spill] sm:$0xff] %v6215_v51  ;;  %v6229_v16 = vpack.c.bf16 %v755_v44, %v751_v40  ;;  %v763_v40 = vld [vmem:[#allocation10 + $0x260] sm:$0xff] }
  0x89   :  { %3940 = vmatprep.subr.bf16.mxu1 %v6203_v53  ;;  %v6213_v9 = vpack.c.bf16 %v748_v30, %v744_v0  ;;  %v6220_v53 = vpack.c.bf16 %v749_v14, %v745_v13  ;;  %v756_v0 = vld [vmem:[#allocation10 + $0x228] sm:$0xff]  ;;  %v754_v30 = vld [vmem:[#allocation10 + $0x218] sm:$0xff]  ;;  %v753_v13 = vld [vmem:[#allocation10 + $0x210] sm:$0xff] }
  0x8a   :  { %v6227_v49 = vpack.c.bf16 %v758_v31, %v754_v30  ;;  %7378 = vst [vmem:[#allocation46_spill] sm:$0xff] %v6229_v16  ;;  %v757_v14 = vld [vmem:[#allocation10 + $0x230] sm:$0xff]  ;;  %v766_v30 = vld [vmem:[#allocation10 + $0x278] sm:$0xff]  ;;  %v759_v31 = vld [vmem:[#allocation10 + $0x240] sm:$0xff] }
  0x8b   :  { %3878 = vmatpush1.bf16.msra.mxu0 %v6205_v10  ;;  %7372 = vst [vmem:[#allocation40_spill] sm:$0xff] %v6213_v9  ;;  %7375 = vst [vmem:[#allocation43_spill] sm:$0xff] %v6220_v53 }
  0x8c   :  { %3942 = vmatpush1.bf16.msra.mxu1 %v6208_v4  ;;  %3880 = vmatprep.subr.bf16.mxu0 %v6213_v9  ;;  %v752_v4 = vld [vmem:[#allocation10 + $0x208] sm:$0xff]  ;;  %7377 = vst [vmem:[#allocation45_spill] sm:$0xff] %v6227_v49  ;;  %v6241_v9 = vpack.c.bf16 %v763_v40, %v759_v31  ;;  %v771_v31 = vld [vmem:[#allocation10 + $0x2a0] sm:$0xff] }
  0x8d   :  { %3944 = vmatprep.subr.bf16.mxu1 %v6215_v51  ;;  %v6225_v10 = vpack.c.bf16 %v756_v0, %v752_v4  ;;  %v6232_v51 = vpack.c.bf16 %v757_v14, %v753_v13  ;;  %v764_v4 = vld [vmem:[#allocation10 + $0x268] sm:$0xff]  ;;  %v762_v0 = vld [vmem:[#allocation10 + $0x258] sm:$0xff]  ;;  %v761_v13 = vld [vmem:[#allocation10 + $0x250] sm:$0xff] }
  0x8e   :  { %v6239_v44 = vpack.c.bf16 %v766_v30, %v762_v0  ;;  %7382 = vst [vmem:[#allocation50_spill] sm:$0xff] %v6241_v9  ;;  %v765_v14 = vld [vmem:[#allocation10 + $0x270] sm:$0xff]  ;;  %v774_v0 = vld [vmem:[#allocation10 + $0x2b8] sm:$0xff]  ;;  %v767_v30 = vld [vmem:[#allocation10 + $0x280] sm:$0xff] }
  0x8f   :  { %3882 = vmatpush1.bf16.msra.mxu0 %v6217_v48  ;;  %7376 = vst [vmem:[#allocation44_spill] sm:$0xff] %v6225_v10  ;;  %7379 = vst [vmem:[#allocation47_spill] sm:$0xff] %v6232_v51 }
  0x90   :  { %3946 = vmatpush1.bf16.msra.mxu1 %v6220_v53  ;;  %3884 = vmatprep.subr.bf16.mxu0 %v6225_v10  ;;  %v760_v53 = vld [vmem:[#allocation10 + $0x248] sm:$0xff]  ;;  %7381 = vst [vmem:[#allocation49_spill] sm:$0xff] %v6239_v44  ;;  %v6253_v10 = vpack.c.bf16 %v771_v31, %v767_v30  ;;  %v779_v30 = vld [vmem:[#allocation10 + $0x2e0] sm:$0xff] }
  0x91   :  { %3948 = vmatprep.subr.bf16.mxu1 %v6227_v49  ;;  %v6237_v48 = vpack.c.bf16 %v764_v4, %v760_v53  ;;  %v6244_v49 = vpack.c.bf16 %v765_v14, %v761_v13  ;;  %v772_v53 = vld [vmem:[#allocation10 + $0x2a8] sm:$0xff]  ;;  %v770_v4 = vld [vmem:[#allocation10 + $0x298] sm:$0xff]  ;;  %v769_v13 = vld [vmem:[#allocation10 + $0x290] sm:$0xff] }
  0x92   :  { %v6251_v40 = vpack.c.bf16 %v774_v0, %v770_v4  ;;  %7386 = vst [vmem:[#allocation54_spill] sm:$0xff] %v6253_v10  ;;  %v773_v14 = vld [vmem:[#allocation10 + $0x2b0] sm:$0xff]  ;;  %v782_v4 = vld [vmem:[#allocation10 + $0x2f8] sm:$0xff]  ;;  %v775_v0 = vld [vmem:[#allocation10 + $0x2c0] sm:$0xff] }
  0x93   :  { %3886 = vmatpush1.bf16.msra.mxu0 %v6229_v16  ;;  %7380 = vst [vmem:[#allocation48_spill] sm:$0xff] %v6237_v48  ;;  %7383 = vst [vmem:[#allocation51_spill] sm:$0xff] %v6244_v49 }
  0x94   :  { %3950 = vmatpush1.bf16.msra.mxu1 %v6232_v51  ;;  %3888 = vmatprep.subr.bf16.mxu0 %v6237_v48  ;;  %v768_v51 = vld [vmem:[#allocation10 + $0x288] sm:$0xff]  ;;  %7385 = vst [vmem:[#allocation53_spill] sm:$0xff] %v6251_v40  ;;  %v6265_v48 = vpack.c.bf16 %v779_v30, %v775_v0  ;;  %v787_v0 = vld [vmem:[#allocation10 + $0x320] sm:$0xff] }
  0x95   :  { %3952 = vmatprep.subr.bf16.mxu1 %v6239_v44  ;;  %v6249_v16 = vpack.c.bf16 %v772_v53, %v768_v51  ;;  %v6256_v44 = vpack.c.bf16 %v773_v14, %v769_v13  ;;  %v780_v51 = vld [vmem:[#allocation10 + $0x2e8] sm:$0xff]  ;;  %v778_v53 = vld [vmem:[#allocation10 + $0x2d8] sm:$0xff]  ;;  %v777_v13 = vld [vmem:[#allocation10 + $0x2d0] sm:$0xff] }
  0x96   :  { %v6263_v31 = vpack.c.bf16 %v782_v4, %v778_v53  ;;  %7390 = vst [vmem:[#allocation58_spill] sm:$0xff] %v6265_v48  ;;  %v781_v14 = vld [vmem:[#allocation10 + $0x2f0] sm:$0xff]  ;;  %v790_v53 = vld [vmem:[#allocation10 + $0x338] sm:$0xff]  ;;  %v783_v4 = vld [vmem:[#allocation10 + $0x300] sm:$0xff] }
  0x97   :  { %3890 = vmatpush1.bf16.msra.mxu0 %v6241_v9  ;;  %7384 = vst [vmem:[#allocation52_spill] sm:$0xff] %v6249_v16  ;;  %7387 = vst [vmem:[#allocation55_spill] sm:$0xff] %v6256_v44 }
  0x98   :  { %3954 = vmatpush1.bf16.msra.mxu1 %v6244_v49  ;;  %3892 = vmatprep.subr.bf16.mxu0 %v6249_v16  ;;  %v776_v49 = vld [vmem:[#allocation10 + $0x2c8] sm:$0xff]  ;;  %7389 = vst [vmem:[#allocation57_spill] sm:$0xff] %v6263_v31  ;;  %v6277_v16 = vpack.c.bf16 %v787_v0, %v783_v4  ;;  %v795_v4 = vld [vmem:[#allocation10 + $0x360] sm:$0xff] }
  0x99   :  { %3956 = vmatprep.subr.bf16.mxu1 %v6251_v40  ;;  %v6261_v9 = vpack.c.bf16 %v780_v51, %v776_v49  ;;  %v6268_v40 = vpack.c.bf16 %v781_v14, %v777_v13  ;;  %v788_v49 = vld [vmem:[#allocation10 + $0x328] sm:$0xff]  ;;  %v786_v51 = vld [vmem:[#allocation10 + $0x318] sm:$0xff]  ;;  %v785_v13 = vld [vmem:[#allocation10 + $0x310] sm:$0xff] }
  0x9a   :  { %v6275_v30 = vpack.c.bf16 %v790_v53, %v786_v51  ;;  %7394 = vst [vmem:[#allocation62_spill] sm:$0xff] %v6277_v16  ;;  %v789_v14 = vld [vmem:[#allocation10 + $0x330] sm:$0xff]  ;;  %v798_v51 = vld [vmem:[#allocation10 + $0x378] sm:$0xff]  ;;  %v791_v53 = vld [vmem:[#allocation10 + $0x340] sm:$0xff] }
  0x9b   :  { %3894 = vmatpush1.bf16.msra.mxu0 %v6253_v10  ;;  %7388 = vst [vmem:[#allocation56_spill] sm:$0xff] %v6261_v9  ;;  %7391 = vst [vmem:[#allocation59_spill] sm:$0xff] %v6268_v40 }
  0x9c   :  { %3958 = vmatpush1.bf16.msra.mxu1 %v6256_v44  ;;  %3896 = vmatprep.subr.bf16.mxu0 %v6261_v9  ;;  %v784_v44 = vld [vmem:[#allocation10 + $0x308] sm:$0xff]  ;;  %7393 = vst [vmem:[#allocation61_spill] sm:$0xff] %v6275_v30  ;;  %v6289_v9 = vpack.c.bf16 %v795_v4, %v791_v53  ;;  %v801_v53 = vld [vmem:[#allocation10 + $0x390] sm:$0xff] }
  0x9d   :  { %3960 = vmatprep.subr.bf16.mxu1 %v6263_v31  ;;  %v6273_v10 = vpack.c.bf16 %v788_v49, %v784_v44  ;;  %v6280_v31 = vpack.c.bf16 %v789_v14, %v785_v13  ;;  %v796_v44 = vld [vmem:[#allocation10 + $0x368] sm:$0xff]  ;;  %v794_v49 = vld [vmem:[#allocation10 + $0x358] sm:$0xff]  ;;  %v793_v13 = vld [vmem:[#allocation10 + $0x350] sm:$0xff] }
  0x9e   :  { %v6287_v0 = vpack.c.bf16 %v798_v51, %v794_v49  ;;  %7398 = vst [vmem:[#allocation66_spill] sm:$0xff] %v6289_v9  ;;  %v797_v14 = vld [vmem:[#allocation10 + $0x370] sm:$0xff]  ;;  %v799_v49 = vld [vmem:[#allocation10 + $0x380] sm:$0xff] }
  0x9f   :  { %3898 = vmatpush1.bf16.msra.mxu0 %v6265_v48  ;;  %7392 = vst [vmem:[#allocation60_spill] sm:$0xff] %v6273_v10  ;;  %7395 = vst [vmem:[#allocation63_spill] sm:$0xff] %v6280_v31  ;;  %v803_v51 = vld [vmem:[#allocation10 + $0x3a0] sm:$0xff] }
  0xa0   :  { %3962 = vmatpush1.bf16.msra.mxu1 %v6268_v40  ;;  %3900 = vmatprep.subr.bf16.mxu0 %v6273_v10  ;;  %v792_v40 = vld [vmem:[#allocation10 + $0x348] sm:$0xff]  ;;  %7397 = vst [vmem:[#allocation65_spill] sm:$0xff] %v6287_v0  ;;  %v6301_v4 = vpack.c.bf16 %v803_v51, %v799_v49  ;;  %v813_v49 = vld [vmem:[#allocation10 + $0x3f0] sm:$0xff] }
  0xa1   :  { %3964 = vmatprep.subr.bf16.mxu1 %v6275_v30  ;;  %v6285_v48 = vpack.c.bf16 %v796_v44, %v792_v40  ;;  %v800_v10 = vld [vmem:[#allocation10 + $0x388] sm:$0xff]  ;;  %v6298_v44 = vpack.c.bf16 %v806_v63, %v802_v3  ;;  %v810_v63 = vld [vmem:[#allocation10 + $0x3d8] sm:$0xff] }
  0xa2   :  { %v804_v30 = vld [vmem:[#allocation10 + $0x3a8] sm:$0xff]  ;;  %7402 = vst [vmem:[#allocation70_spill] sm:$0xff] %v6301_v4  ;;  %v814_v3 = vld [vmem:[#allocation10 + $0x3f8] sm:$0xff] }
  0xa3   :  { %3902 = vmatpush1.bf16.msra.mxu0 %v6277_v16  ;;  %7396 = vst [vmem:[#allocation64_spill] sm:$0xff] %v6285_v48  ;;  %v6292_v16 = vpack.c.bf16 %v797_v14, %v793_v13  ;;  %v6296_v40 = vpack.c.bf16 %v804_v30, %v800_v10  ;;  %7401 = vst [vmem:[#allocation69_spill] sm:$0xff] %v6298_v44  ;;  %v805_v13 = vld [vmem:[#allocation10 + $0x3b0] sm:$0xff]  ;;  %v808_v14 = vld [vmem:[#allocation10 + $0x3c8] sm:$0xff] }
  0xa4   :  { %3966 = vmatpush1.bf16.msra.mxu1 %v6280_v31  ;;  %3904 = vmatprep.subr.bf16.mxu0 %v6285_v48  ;;  %v812_v48 = vld [vmem:[#allocation10 + $0x3e8] sm:$0xff]  ;;  %v807_v30 = vld [vmem:[#allocation10 + $0x3c0] sm:$0xff] }
  0xa5   :  { %7399 = vst [vmem:[#allocation67_spill] sm:$0xff] %v6292_v16  ;;  %3968 = vmatprep.subr.bf16.mxu1 %v6287_v0  ;;  %7400 = vst [vmem:[#allocation68_spill] sm:$0xff] %v6296_v40  ;;  %v6305_v0 = vpack.c.bf16 %v805_v13, %v801_v53  ;;  %v6307_v10 = vpack.c.bf16 %v812_v48, %v808_v14  ;;  %v811_v31 = vld [vmem:[#allocation10 + $0x3e0] sm:$0xff]  ;;  %v117_v48 = vlaneseq }
  0xa6   :  { %v6312_v51 = vpack.c.bf16 %v811_v31, %v807_v30 }
  0xa7   :  { %3906 = vmatpush1.bf16.msra.mxu0 %v6289_v9  ;;  %7403 = vst [vmem:[#allocation71_spill] sm:$0xff] %v6305_v0  ;;  %7404 = vst [vmem:[#allocation72_spill] sm:$0xff] %v6307_v10  ;;  %v6309_v9 = vpack.c.bf16 %v814_v3, %v810_v63  ;;  %v6323_v13 = vshrl.u32 %v117_v48, 7 }
  0xa8   :  { %3970 = vmatpush1.bf16.msra.mxu1 %v6292_v16  ;;  %3908 = vmatprep.subr.bf16.mxu0 %v6296_v40  ;;  %v809_v16 = vld [vmem:[#allocation10 + $0x3d0] sm:$0xff]  ;;  %7406 = vst [vmem:[#allocation74_spill] sm:$0xff] %v6312_v51 }
  0xa9   :  { %3972 = vmatprep.subr.bf16.mxu1 %v6298_v44  ;;  %7405 = vst [vmem:[#allocation73_spill] sm:$0xff] %v6309_v9  ;;  %v6316_v53 = vpack.c.bf16 %v813_v49, %v809_v16  ;;  %7408 = vst [vmem:[#allocation76_spill] sm:$0xff] %v6323_v13  ;;  %v7314_v31 = vsub.s32 0, %v6323_v13  ;;  %v115_v16 = vld [vmem:[%s7210_s3] sm:$0xf]  ;;  %v7315_v14 = vsub.s32 1, %v6323_v13 }
  0xaa   :  { %v7322_v49 = vsub.s32 3, %v6323_v13 }
  0xab   :  { %3910 = vmatpush1.bf16.msra.mxu0 %v6301_v4  ;;  %7407 = vst [vmem:[#allocation75_spill] sm:$0xff] %v6316_v53  ;;  %v6332_v63 = vrot.slane %v115_v16, %v7314_v31  ;;  %v6336_v3 = vrot.slane %v115_v16, %v7315_v14  ;;  %v7331_v14 = vsub.s32 2, %v6323_v13 }
  0xac   :  { %3974 = vmatpush1.bf16.msra.mxu1 %v6305_v0  ;;  %3912 = vmatprep.subr.bf16.mxu0 %v6307_v10  ;;  %v6343_v31 = vrot.slane %v115_v16, %v7322_v49 }
  0xad   :  { %3976 = vmatprep.subr.bf16.mxu1 %v6309_v9  ;;  %7409 = vst [vmem:[#allocation77_spill] sm:$0xff] %v6332_v63  ;;  %7410 = vst [vmem:[#allocation78_spill] sm:$0xff] %v6336_v3 }
  0xae   :  { %7411 = vst [vmem:[#allocation79_spill] sm:$0xff] %v6343_v31 }
  0xaf   :  { %3914 = vmatpush1.bf16.msra.mxu0 %v6312_v51 }
  0xb0   :  { %3978 = vmatpush1.bf16.msra.mxu1 %v6316_v53  ;;  %3980 = vmatprep.subr.bf16.mxu0 %v5976_v17 }
  0xb1   :  { %4012 = vmatprep.subr.bf16.mxu1 %v5978_v21 }
 0x145   :  { %v583_v30 = vpop.f32.mrb[0].mxu0 }
 0x146   :  { %v5371_v48 = vadd.f32 %v583_v30, %v6332_v63  ;;  %v654_v21 = vpop.f32.mrb[0].mxu1  ;;  %v585_v17 = vpop.f32.mrb[1].mxu0  ;;  %v6349_v30 = vrot.slane %v115_v16, %v7331_v14  ;;  %v7427_v14 = vld [vmem:[#allocation41_spill] sm:$0xff] }
 0x147   :  { %v5372_v53 = vadd.f32 %v585_v17, %v6336_v3  ;;  %v656_v51 = vpop.f32.mrb[1].mxu1 }
 0x148   :  { %v3624_v9 = vmul.f32 -1.442695, %v5371_v48  ;;  %v5388_v0 = vadd.f32 %v656_v51, %v6343_v31  ;;  %v5387_v17 = vadd.f32 %v654_v21, %v6349_v30 }
 0x149   :  { %v3625_v10 = vmul.f32 -1.442695, %v5372_v53 }
 0x14a   :  { %5447 = vpow2.f32 %v3624_v9  ;;  %v3626_v63 = vmul.f32 -1.442695, %v5388_v0 }
 0x14b   :  { %5449 = vpow2.f32 %v3625_v10 }
 0x14c   :  { %5451 = vpow2.f32 %v3626_v63  ;;  %v7416_v63 = vld [vmem:[#allocation30_spill] sm:$0xff] }
 0x14d   :  { %5453 = vtanh.f32 %v5387_v17  ;;  %v7418_v17 = vld [vmem:[#allocation32_spill] sm:$0xff] }
 0x154   :  { %v5448_v3 = vpop.eup %5447 }
 0x155   :  { %v5450_v48 = vpop.eup %5449  ;;  %v666_v53 = vadd.f32 1.0, %v5448_v3 }
 0x156   :  { %v672_v49 = vadd.f32 1.0, %v5450_v48  ;;  %v5452_v9 = vpop.eup %5451  ;;  %v7419_v48 = vld [vmem:[#allocation33_spill] sm:$0xff] }
 0x157   :  { %5455 = vrcp.f32 %v666_v53  ;;  %v5454_v4 = vpop.eup %5453  ;;  %v679_v31 = vadd.f32 1.0, %v5452_v9  ;;  %v7420_v53 = vld [vmem:[#allocation34_spill] sm:$0xff]  ;;  %v7421_v9 = vld [vmem:[#allocation35_spill] sm:$0xff] }
 0x158   :  { %5457 = vrcp.f32 %v672_v49  ;;  %v7417_v49 = vld [vmem:[#allocation31_spill] sm:$0xff] }
 0x159   :  { %5459 = vrcp.f32 %v679_v31  ;;  %v7415_v31 = vld [vmem:[#allocation29_spill] sm:$0xff] }
 0x161   :  { %v5456_v10 = vpop.eup %5455 }
 0x162   :  { %v5458_v44 = vpop.eup %5457  ;;  %v683_v51 = vmul.f32 %v5456_v10, %v5454_v4  ;;  %v7412_v4 = vmov 0.0   ;;  %v7422_v10 = vld [vmem:[#allocation36_spill] sm:$0xff] }
 0x163   :  { %v682_v13 = vmul.f32 0.0, %v5458_v44  ;;  %v5460_v21 = vpop.eup %5459  ;;  %v7413_v44 = vld [vmem:[#allocation27_spill] sm:$0xff] }
 0x165   :  { %v6352_v16 = vadd.f32 %v683_v51, %v682_v13  ;;  %v7414_v13 = vld [vmem:[#allocation28_spill] sm:$0xff]  ;;  %v7423_v51 = vld [vmem:[#allocation37_spill] sm:$0xff] }
 0x167   :  { %5461 = vtanh.f32 %v6352_v16 }
 0x171   :  { %v5462_v0 = vpop.eup %5461 }
 0x172   :  { %v686_v3 = vmul.f32 %v5462_v0, %v5460_v21  ;;  %v7424_v21 = vld [vmem:[#allocation38_spill] sm:$0xff]  ;;  %v7425_v0 = vld [vmem:[#allocation39_spill] sm:$0xff] }
 0x174   :  { %880 = vmatmul.mubr.f32.vlgmr.msra.gmra.mrb[16].mxu0 %v686_v3  ;;  %951 = vmatmul.mubr.f32.vlgmr.msra.gmra.mrb[16].mxu1 %v686_v3 }
 0x175   :  { %3982 = vmatpush1.bf16.msra.mxu0 %v5980_v22  ;;  %4014 = vmatpush1.bf16.msra.mxu1 %v5983_v25 }
 0x176   :  { %3984 = vmatprep.subr.bf16.mxu0 %v5987_v29  ;;  %4016 = vmatprep.subr.bf16.mxu1 %v5994_v34 }
 0x177   :  { %1052 = vmatprep.mubr.f32.mxu0 %v7412_v4  ;;  %1123 = vmatprep.mubr.f32.mxu1 %v7412_v4 }
 0x179   :  { %3986 = vmatpush1.bf16.msra.mxu0 %v5996_v35  ;;  %4018 = vmatpush1.bf16.msra.mxu1 %v6000_v38 }
 0x17a   :  { %3988 = vmatprep.subr.bf16.mxu0 %v6004_v42  ;;  %4020 = vmatprep.subr.bf16.mxu1 %v6011_v47 }
 0x17d   :  { %3990 = vmatpush1.bf16.msra.mxu0 %v6015_v50  ;;  %4022 = vmatpush1.bf16.msra.mxu1 %v6019_v54 }
 0x17e   :  { %3992 = vmatprep.subr.bf16.mxu0 %v6023_v58  ;;  %4024 = vmatprep.subr.bf16.mxu1 %v6027_v61 }
 0x181   :  { %3994 = vmatpush1.bf16.msra.mxu0 %v6034_v2  ;;  %4026 = vmatpush1.bf16.msra.mxu1 %v6038_v5 }
 0x182   :  { %3996 = vmatprep.subr.bf16.mxu0 %v6042_v8  ;;  %4028 = vmatprep.subr.bf16.mxu1 %v6046_v11 }
 0x185   :  { %3998 = vmatpush1.bf16.msra.mxu0 %v6053_v15  ;;  %4030 = vmatpush1.bf16.msra.mxu1 %v6057_v19 }
 0x186   :  { %4000 = vmatprep.subr.bf16.mxu0 %v6061_v24  ;;  %4032 = vmatprep.subr.bf16.mxu1 %v6065_v28 }
 0x189   :  { %4002 = vmatpush1.bf16.msra.mxu0 %v6072_v33  ;;  %4034 = vmatpush1.bf16.msra.mxu1 %v6076_v39 }
 0x18a   :  { %4004 = vmatprep.subr.bf16.mxu0 %v6080_v43  ;;  %4036 = vmatprep.subr.bf16.mxu1 %v6084_v46 }
 0x18d   :  { %4006 = vmatpush1.bf16.msra.mxu0 %v6091_v52  ;;  %4038 = vmatpush1.bf16.msra.mxu1 %v6095_v56 }
 0x18e   :  { %4008 = vmatprep.subr.bf16.mxu0 %v6099_v60  ;;  %4040 = vmatprep.subr.bf16.mxu1 %v6103_v1 }
 0x191   :  { %4010 = vmatpush1.bf16.msra.mxu0 %v6110_v7  ;;  %4042 = vmatpush1.bf16.msra.mxu1 %v6114_v12 }
 0x192   :  { %4044 = vmatprep.subr.bf16.mxu0 %v6118_v18  ;;  %4108 = vmatprep.subr.bf16.mxu1 %v6122_v27 }
 0x194   :  { %1053 = vmatmul.mubr.f32.vlgmr.msra.gmra.mrb[2].mxu0 %v686_v3  ;;  %1124 = vmatmul.mubr.f32.vlgmr.msra.gmra.mrb[2].mxu1 %v686_v3  ;;  %v7426_v3 = vld [vmem:[#allocation40_spill] sm:$0xff] }
 0x195   :  { %4046 = vmatpush1.bf16.msra.mxu0 %v6126_v32  ;;  %4110 = vmatpush1.bf16.msra.mxu1 %v6130_v36 }
 0x196   :  { %4048 = vmatprep.subr.bf16.mxu0 %v6132_v37  ;;  %4112 = vmatprep.subr.bf16.mxu1 %v6136_v45 }
 0x199   :  { %4050 = vmatpush1.bf16.msra.mxu0 %v6142_v57  ;;  %4114 = vmatpush1.bf16.msra.mxu1 %v6146_v59 }
 0x19a   :  { %4052 = vmatprep.subr.bf16.mxu0 %v6148_v62  ;;  %4116 = vmatprep.subr.bf16.mxu1 %v6151_v6 }
 0x19d   :  { %4054 = vmatpush1.bf16.msra.mxu0 %v6156_v20  ;;  %4118 = vmatpush1.bf16.msra.mxu1 %v6160_v23 }
 0x19e   :  { %4056 = vmatprep.subr.bf16.mxu0 %v6162_v26  ;;  %4120 = vmatprep.subr.bf16.mxu1 %v6165_v41 }
 0x1a1   :  { %4058 = vmatpush1.bf16.msra.mxu0 %v6168_v55  ;;  %4122 = vmatpush1.bf16.msra.mxu1 %v7413_v44 }
 0x1a2   :  { %4060 = vmatprep.subr.bf16.mxu0 %v7414_v13  ;;  %4124 = vmatprep.subr.bf16.mxu1 %v7415_v31 }
 0x1a5   :  { %4062 = vmatpush1.bf16.msra.mxu0 %v7416_v63  ;;  %4126 = vmatpush1.bf16.msra.mxu1 %v7417_v49  ;;  %v7428_v49 = vld [vmem:[#allocation42_spill] sm:$0xff] }
 0x1a6   :  { %4064 = vmatprep.subr.bf16.mxu0 %v7418_v17  ;;  %4128 = vmatprep.subr.bf16.mxu1 %v7419_v48  ;;  %v7429_v17 = vld [vmem:[#allocation43_spill] sm:$0xff]  ;;  %v7430_v48 = vld [vmem:[#allocation44_spill] sm:$0xff] }
 0x1a9   :  { %4066 = vmatpush1.bf16.msra.mxu0 %v7420_v53  ;;  %4130 = vmatpush1.bf16.msra.mxu1 %v7421_v9  ;;  %v7431_v53 = vld [vmem:[#allocation45_spill] sm:$0xff]  ;;  %v7432_v9 = vld [vmem:[#allocation46_spill] sm:$0xff] }
 0x1aa   :  { %4068 = vmatprep.subr.bf16.mxu0 %v7422_v10  ;;  %4132 = vmatprep.subr.bf16.mxu1 %v7423_v51  ;;  %v7433_v10 = vld [vmem:[#allocation47_spill] sm:$0xff]  ;;  %v7434_v51 = vld [vmem:[#allocation48_spill] sm:$0xff] }
 0x1ad   :  { %4070 = vmatpush1.bf16.msra.mxu0 %v7424_v21  ;;  %4134 = vmatpush1.bf16.msra.mxu1 %v7425_v0  ;;  %v7435_v21 = vld [vmem:[#allocation49_spill] sm:$0xff]  ;;  %v7436_v0 = vld [vmem:[#allocation50_spill] sm:$0xff] }
 0x1ae   :  { %4072 = vmatprep.subr.bf16.mxu0 %v7426_v3  ;;  %4136 = vmatprep.subr.bf16.mxu1 %v7427_v14  ;;  %v7437_v3 = vld [vmem:[#allocation51_spill] sm:$0xff]  ;;  %v7438_v14 = vld [vmem:[#allocation52_spill] sm:$0xff] }
 0x1b1   :  { %4074 = vmatpush1.bf16.msra.mxu0 %v7428_v49  ;;  %4138 = vmatpush1.bf16.msra.mxu1 %v7429_v17  ;;  %v7439_v49 = vld [vmem:[#allocation53_spill] sm:$0xff]  ;;  %v7440_v17 = vld [vmem:[#allocation54_spill] sm:$0xff] }
 0x1b2   :  { %4076 = vmatprep.subr.bf16.mxu0 %v7430_v48  ;;  %4140 = vmatprep.subr.bf16.mxu1 %v7431_v53  ;;  %v7441_v48 = vld [vmem:[#allocation55_spill] sm:$0xff]  ;;  %v7442_v53 = vld [vmem:[#allocation56_spill] sm:$0xff] }
 0x1b5   :  { %4078 = vmatpush1.bf16.msra.mxu0 %v7432_v9  ;;  %4142 = vmatpush1.bf16.msra.mxu1 %v7433_v10  ;;  %v7443_v9 = vld [vmem:[#allocation57_spill] sm:$0xff]  ;;  %v7444_v10 = vld [vmem:[#allocation58_spill] sm:$0xff] }
 0x1b6   :  { %4080 = vmatprep.subr.bf16.mxu0 %v7434_v51  ;;  %4144 = vmatprep.subr.bf16.mxu1 %v7435_v21  ;;  %v7445_v51 = vld [vmem:[#allocation59_spill] sm:$0xff]  ;;  %v7446_v21 = vld [vmem:[#allocation60_spill] sm:$0xff] }
 0x1b9   :  { %4082 = vmatpush1.bf16.msra.mxu0 %v7436_v0  ;;  %4146 = vmatpush1.bf16.msra.mxu1 %v7437_v3  ;;  %v7447_v0 = vld [vmem:[#allocation61_spill] sm:$0xff]  ;;  %v7448_v3 = vld [vmem:[#allocation62_spill] sm:$0xff] }
 0x1ba   :  { %4084 = vmatprep.subr.bf16.mxu0 %v7438_v14  ;;  %4148 = vmatprep.subr.bf16.mxu1 %v7439_v49  ;;  %v7449_v14 = vld [vmem:[#allocation63_spill] sm:$0xff]  ;;  %v7450_v49 = vld [vmem:[#allocation64_spill] sm:$0xff] }
 0x1bd   :  { %4086 = vmatpush1.bf16.msra.mxu0 %v7440_v17  ;;  %4150 = vmatpush1.bf16.msra.mxu1 %v7441_v48  ;;  %v7451_v17 = vld [vmem:[#allocation65_spill] sm:$0xff]  ;;  %v7452_v48 = vld [vmem:[#allocation66_spill] sm:$0xff] }
 0x1be   :  { %4088 = vmatprep.subr.bf16.mxu0 %v7442_v53  ;;  %4152 = vmatprep.subr.bf16.mxu1 %v7443_v9  ;;  %v7453_v53 = vld [vmem:[#allocation67_spill] sm:$0xff] }
 0x1c1   :  { %4090 = vmatpush1.bf16.msra.mxu0 %v7444_v10  ;;  %4154 = vmatpush1.bf16.msra.mxu1 %v7445_v51  ;;  %v7454_v10 = vld [vmem:[#allocation69_spill] sm:$0xff]  ;;  %v7455_v51 = vld [vmem:[#allocation70_spill] sm:$0xff] }
 0x1c2   :  { %4092 = vmatprep.subr.bf16.mxu0 %v7446_v21  ;;  %4156 = vmatprep.subr.bf16.mxu1 %v7447_v0  ;;  %v7456_v21 = vld [vmem:[#allocation71_spill] sm:$0xff]  ;;  %v7457_v0 = vld [vmem:[#allocation72_spill] sm:$0xff] }
 0x1c5   :  { %4094 = vmatpush1.bf16.msra.mxu0 %v7448_v3  ;;  %4158 = vmatpush1.bf16.msra.mxu1 %v7449_v14  ;;  %v7458_v3 = vld [vmem:[#allocation73_spill] sm:$0xff]  ;;  %v7459_v14 = vld [vmem:[#allocation74_spill] sm:$0xff] }
 0x1c6   :  { %4096 = vmatprep.subr.bf16.mxu0 %v7450_v49  ;;  %4160 = vmatprep.subr.bf16.mxu1 %v7451_v17  ;;  %v7460_v49 = vld [vmem:[#allocation75_spill] sm:$0xff]  ;;  %v7461_v17 = vld [vmem:[#allocation20_spill] sm:$0xff] }
 0x1c9   :  { %4098 = vmatpush1.bf16.msra.mxu0 %v7452_v48  ;;  %4162 = vmatpush1.bf16.msra.mxu1 %v7453_v53  ;;  %v7462_v48 = vld [vmem:[#allocation21_spill] sm:$0xff] }
 0x1ca   :  { %4100 = vmatprep.subr.bf16.mxu0 %v6296_v40  ;;  %4164 = vmatprep.subr.bf16.mxu1 %v7454_v10  ;;  %v420_v10 = vld [vmem:[%s7212_s5] sm:$0xf]  ;;  %v7463_v40 = vld [vmem:[#allocation76_spill] sm:$0xff] }
 0x1cb   :  { %v7468_v13 = vsub.s32 3, %v7463_v40 }
 0x1cd   :  { %4102 = vmatpush1.bf16.msra.mxu0 %v7455_v51  ;;  %4166 = vmatpush1.bf16.msra.mxu1 %v7456_v21  ;;  %v7464_v51 = vsub.s32 0, %v7463_v40  ;;  %v6468_v44 = vrot.slane %v420_v10, %v7468_v13 }
 0x1ce   :  { %4104 = vmatprep.subr.bf16.mxu0 %v7457_v0  ;;  %4168 = vmatprep.subr.bf16.mxu1 %v7458_v3  ;;  %v7466_v0 = vsub.s32 1, %v7463_v40 }
 0x1cf   :  { %v6458_v53 = vrot.slane %v420_v10, %v7464_v51  ;;  %7469 = vst [vmem:[#allocation81_spill] sm:$0xff] %v6468_v44 }
 0x1d0   :  { %v6462_v21 = vrot.slane %v420_v10, %v7466_v0  ;;  %v7470_v0 = vsub.s32 2, %v7463_v40 }
 0x1d1   :  { %4106 = vmatpush1.bf16.msra.mxu0 %v7459_v14  ;;  %4170 = vmatpush1.bf16.msra.mxu1 %v7460_v49  ;;  %7465 = vst [vmem:[#allocation76_spill] sm:$0xff] %v6458_v53 }
 0x1d2   :  { %4172 = vmatprep.subr.bf16.mxu0 %v7461_v17  ;;  %4204 = vmatprep.subr.bf16.mxu1 %v7462_v48  ;;  %7467 = vst [vmem:[#allocation80_spill] sm:$0xff] %v6462_v21  ;;  %v6473_v55 = vrot.slane %v420_v10, %v7470_v0 }
 0x1d4   :  { %7471 = vst [vmem:[#allocation82_spill] sm:$0xff] %v6473_v55 }
 0x247   :  { %v881_v3 = vpop.f32.mrb[16].mxu0  ;;  %v952_v14 = vpop.f32.mrb[16].mxu1 }
 0x248   :  { %v882_v49 = vadd.f32 %v881_v3, %v6458_v53  ;;  %v883_v9 = vpop.f32.mrb[17].mxu0  ;;  %v954_v17 = vpop.f32.mrb[17].mxu1  ;;  %v953_v3 = vadd.f32 %v952_v14, %v6473_v55  ;;  %v7472_v14 = vld [vmem:[#allocation77_spill] sm:$0xff] }
 0x249   :  { %v884_v48 = vadd.f32 %v883_v9, %v6462_v21  ;;  %v955_v51 = vadd.f32 %v954_v17, %v6468_v44 }
 0x24a   :  { %v3627_v63 = vmul.f32 -1.442695, %v882_v49 }
 0x24b   :  { %v3628_v31 = vmul.f32 -1.442695, %v884_v48  ;;  %v3629_v41 = vmul.f32 -1.442695, %v955_v51 }
 0x24c   :  { %5463 = vpow2.f32 %v3627_v63 }
 0x24d   :  { %5465 = vpow2.f32 %v3628_v31 }
 0x24e   :  { %5467 = vpow2.f32 %v3629_v41 }
 0x24f   :  { %5469 = vtanh.f32 %v953_v3 }
 0x256   :  { %v5464_v53 = vpop.eup %5463 }
 0x257   :  { %v5466_v26 = vpop.eup %5465  ;;  %v960_v9 = vadd.f32 1.0, %v5464_v53 }
 0x258   :  { %v966_v49 = vadd.f32 1.0, %v5466_v26  ;;  %v5468_v13 = vpop.eup %5467  ;;  %v7473_v26 = vld [vmem:[#allocation78_spill] sm:$0xff] }
 0x259   :  { %5471 = vrcp.f32 %v960_v9  ;;  %v5470_v63 = vpop.eup %5469  ;;  %v973_v44 = vadd.f32 1.0, %v5468_v13 }
 0x25a   :  { %5473 = vrcp.f32 %v966_v49 }
 0x25b   :  { %5475 = vrcp.f32 %v973_v44 }
 0x263   :  { %v5472_v31 = vpop.eup %5471 }
 0x264   :  { %v5474_v48 = vpop.eup %5473  ;;  %v977_v17 = vmul.f32 %v5472_v31, %v5470_v63  ;;  %v7474_v63 = vld [vmem:[#allocation79_spill] sm:$0xff] }
 0x265   :  { %v976_v40 = vmul.f32 0.0, %v5474_v48  ;;  %v5476_v31 = vpop.eup %5475 }
 0x267   :  { %v6476_v10 = vadd.f32 %v977_v17, %v976_v40  ;;  %v1054_v51 = vpop.f32.mrb[2].mxu0  ;;  %v1125_v0 = vpop.f32.mrb[2].mxu1 }
 0x268   :  { %v5373_v55 = vadd.f32 %v1054_v51, %v7472_v14  ;;  %v1056_v53 = vpop.f32.mrb[3].mxu0  ;;  %v1127_v41 = vpop.f32.mrb[3].mxu1  ;;  %v5389_v40 = vadd.f32 %v1125_v0, %v6349_v30 }
 0x269   :  { %5477 = vtanh.f32 %v6476_v10  ;;  %v5374_v3 = vadd.f32 %v1056_v53, %v7473_v26  ;;  %v5390_v13 = vadd.f32 %v1127_v41, %v7474_v63 }
 0x26a   :  { %v3630_v9 = vmul.f32 -1.442695, %v5373_v55 }
 0x26b   :  { %v3631_v49 = vmul.f32 -1.442695, %v5374_v3  ;;  %v3632_v17 = vmul.f32 -1.442695, %v5390_v13 }
 0x26c   :  { %5479 = vpow2.f32 %v3630_v9 }
 0x26d   :  { %5481 = vpow2.f32 %v3631_v49 }
 0x26e   :  { %5483 = vpow2.f32 %v3632_v17  ;;  %v7478_v17 = vld [vmem:[#allocation27_spill] sm:$0xff] }
 0x26f   :  { %5485 = vtanh.f32 %v5389_v40  ;;  %v7479_v40 = vld [vmem:[#allocation28_spill] sm:$0xff] }
 0x273   :  { %v5478_v48 = vpop.eup %5477 }
 0x274   :  { %v980_v44 = vmul.f32 %v5478_v48, %v5476_v31 }
 0x276   :  { %v5480_v21 = vpop.eup %5479  ;;  %1222 = vmatprep.mubr.f32.mxu0 %v980_v44  ;;  %1293 = vmatprep.mubr.f32.mxu1 %v980_v44  ;;  %v7480_v44 = vld [vmem:[#allocation29_spill] sm:$0xff] }
 0x277   :  { %v5482_v51 = vpop.eup %5481  ;;  %v1137_v14 = vadd.f32 1.0, %v5480_v21 }
 0x278   :  { %v1143_v53 = vadd.f32 1.0, %v5482_v51  ;;  %v5484_v55 = vpop.eup %5483  ;;  %v7481_v51 = vld [vmem:[#allocation30_spill] sm:$0xff] }
 0x279   :  { %5487 = vrcp.f32 %v1137_v14  ;;  %v5486_v3 = vpop.eup %5485  ;;  %v1150_v63 = vadd.f32 1.0, %v5484_v55  ;;  %v7476_v14 = vld [vmem:[#allocation25_spill] sm:$0xff]  ;;  %v7483_v55 = vld [vmem:[#allocation32_spill] sm:$0xff] }
 0x27a   :  { %5489 = vrcp.f32 %v1143_v53  ;;  %v7482_v53 = vld [vmem:[#allocation31_spill] sm:$0xff] }
 0x27b   :  { %5491 = vrcp.f32 %v1150_v63  ;;  %v7477_v63 = vld [vmem:[#allocation26_spill] sm:$0xff] }
 0x283   :  { %v5488_v9 = vpop.eup %5487 }
 0x284   :  { %v5490_v41 = vpop.eup %5489  ;;  %v1154_v49 = vmul.f32 %v5488_v9, %v5486_v3  ;;  %v7484_v3 = vld [vmem:[#allocation33_spill] sm:$0xff]  ;;  %v7485_v9 = vld [vmem:[#allocation34_spill] sm:$0xff] }
 0x285   :  { %v1153_v13 = vmul.f32 %v5490_v41, %v6352_v16  ;;  %v5492_v31 = vpop.eup %5491  ;;  %v7475_v16 = vld [vmem:[#allocation24_spill] sm:$0xff]  ;;  %v7486_v41 = vld [vmem:[#allocation35_spill] sm:$0xff] }
 0x287   :  { %v6484_v0 = vadd.f32 %v1154_v49, %v1153_v13  ;;  %v7487_v49 = vld [vmem:[#allocation36_spill] sm:$0xff]  ;;  %v7488_v13 = vld [vmem:[#allocation37_spill] sm:$0xff] }
 0x289   :  { %5493 = vtanh.f32 %v6484_v0 }
 0x293   :  { %v5494_v21 = vpop.eup %5493 }
 0x294   :  { %v1157_v48 = vmul.f32 %v5494_v21, %v5492_v31  ;;  %v7489_v31 = vld [vmem:[#allocation38_spill] sm:$0xff]  ;;  %v7490_v21 = vld [vmem:[#allocation39_spill] sm:$0xff] }
 0x296   :  { %1223 = vmatmul.mubr.f32.vlgmr.msra.gmra.mrb[18].mxu0 %v1157_v48  ;;  %1294 = vmatmul.mubr.f32.vlgmr.msra.gmra.mrb[18].mxu1 %v1157_v48 }
 0x297   :  { %4174 = vmatpush1.bf16.msra.mxu0 %v5980_v22  ;;  %4206 = vmatpush1.bf16.msra.mxu1 %v5983_v25 }
 0x298   :  { %4176 = vmatprep.subr.bf16.mxu0 %v5987_v29  ;;  %4208 = vmatprep.subr.bf16.mxu1 %v5994_v34 }
 0x299   :  { %1395 = vmatprep.mubr.f32.mxu0 %v7412_v4  ;;  %1466 = vmatprep.mubr.f32.mxu1 %v7412_v4 }
 0x29b   :  { %4178 = vmatpush1.bf16.msra.mxu0 %v5996_v35  ;;  %4210 = vmatpush1.bf16.msra.mxu1 %v6000_v38 }
 0x29c   :  { %4180 = vmatprep.subr.bf16.mxu0 %v6004_v42  ;;  %4212 = vmatprep.subr.bf16.mxu1 %v6011_v47 }
 0x29f   :  { %4182 = vmatpush1.bf16.msra.mxu0 %v6015_v50  ;;  %4214 = vmatpush1.bf16.msra.mxu1 %v6019_v54 }
 0x2a0   :  { %4184 = vmatprep.subr.bf16.mxu0 %v6023_v58  ;;  %4216 = vmatprep.subr.bf16.mxu1 %v6027_v61 }
 0x2a3   :  { %4186 = vmatpush1.bf16.msra.mxu0 %v6034_v2  ;;  %4218 = vmatpush1.bf16.msra.mxu1 %v6038_v5 }
 0x2a4   :  { %4188 = vmatprep.subr.bf16.mxu0 %v6042_v8  ;;  %4220 = vmatprep.subr.bf16.mxu1 %v6046_v11 }
 0x2a7   :  { %4190 = vmatpush1.bf16.msra.mxu0 %v6053_v15  ;;  %4222 = vmatpush1.bf16.msra.mxu1 %v6057_v19 }
 0x2a8   :  { %4192 = vmatprep.subr.bf16.mxu0 %v6061_v24  ;;  %4224 = vmatprep.subr.bf16.mxu1 %v6065_v28 }
 0x2ab   :  { %4194 = vmatpush1.bf16.msra.mxu0 %v6072_v33  ;;  %4226 = vmatpush1.bf16.msra.mxu1 %v6076_v39 }
 0x2ac   :  { %4196 = vmatprep.subr.bf16.mxu0 %v6080_v43  ;;  %4228 = vmatprep.subr.bf16.mxu1 %v6084_v46 }
 0x2af   :  { %4198 = vmatpush1.bf16.msra.mxu0 %v6091_v52  ;;  %4230 = vmatpush1.bf16.msra.mxu1 %v6095_v56 }
 0x2b0   :  { %4200 = vmatprep.subr.bf16.mxu0 %v6099_v60  ;;  %4232 = vmatprep.subr.bf16.mxu1 %v6103_v1 }
 0x2b3   :  { %4202 = vmatpush1.bf16.msra.mxu0 %v6110_v7  ;;  %4234 = vmatpush1.bf16.msra.mxu1 %v6114_v12 }
 0x2b4   :  { %4236 = vmatprep.subr.bf16.mxu0 %v6118_v18  ;;  %4300 = vmatprep.subr.bf16.mxu1 %v6122_v27 }
 0x2b6   :  { %1396 = vmatmul.mubr.f32.vlgmr.msra.gmra.mrb[4].mxu0 %v1157_v48  ;;  %1467 = vmatmul.mubr.f32.vlgmr.msra.gmra.mrb[4].mxu1 %v1157_v48  ;;  %v7491_v48 = vld [vmem:[#allocation40_spill] sm:$0xff] }
 0x2b7   :  { %4238 = vmatpush1.bf16.msra.mxu0 %v6126_v32  ;;  %4302 = vmatpush1.bf16.msra.mxu1 %v6130_v36 }
 0x2b8   :  { %4240 = vmatprep.subr.bf16.mxu0 %v6132_v37  ;;  %4304 = vmatprep.subr.bf16.mxu1 %v6136_v45 }
 0x2bb   :  { %4242 = vmatpush1.bf16.msra.mxu0 %v6142_v57  ;;  %4306 = vmatpush1.bf16.msra.mxu1 %v6146_v59 }
 0x2bc   :  { %4244 = vmatprep.subr.bf16.mxu0 %v6148_v62  ;;  %4308 = vmatprep.subr.bf16.mxu1 %v6151_v6 }
 0x2bf   :  { %4246 = vmatpush1.bf16.msra.mxu0 %v6156_v20  ;;  %4310 = vmatpush1.bf16.msra.mxu1 %v6160_v23 }
 0x2c0   :  { %4248 = vmatprep.subr.bf16.mxu0 %v7475_v16  ;;  %4312 = vmatprep.subr.bf16.mxu1 %v7476_v14 }
 0x2c3   :  { %4250 = vmatpush1.bf16.msra.mxu0 %v7477_v63  ;;  %4314 = vmatpush1.bf16.msra.mxu1 %v7478_v17  ;;  %v7530_v17 = vld [vmem:[#allocation80_spill] sm:$0xff] }
 0x2c4   :  { %4252 = vmatprep.subr.bf16.mxu0 %v7479_v40  ;;  %4316 = vmatprep.subr.bf16.mxu1 %v7480_v44  ;;  %v7529_v44 = vld [vmem:[#allocation76_spill] sm:$0xff] }
 0x2c7   :  { %4254 = vmatpush1.bf16.msra.mxu0 %v7481_v51  ;;  %4318 = vmatpush1.bf16.msra.mxu1 %v7482_v53  ;;  %v7492_v51 = vld [vmem:[#allocation41_spill] sm:$0xff]  ;;  %v7493_v53 = vld [vmem:[#allocation42_spill] sm:$0xff] }
 0x2c8   :  { %4256 = vmatprep.subr.bf16.mxu0 %v7483_v55  ;;  %4320 = vmatprep.subr.bf16.mxu1 %v7484_v3  ;;  %v7494_v55 = vld [vmem:[#allocation43_spill] sm:$0xff]  ;;  %v7495_v3 = vld [vmem:[#allocation44_spill] sm:$0xff] }
 0x2cb   :  { %4258 = vmatpush1.bf16.msra.mxu0 %v7485_v9  ;;  %4322 = vmatpush1.bf16.msra.mxu1 %v7486_v41  ;;  %v7496_v9 = vld [vmem:[#allocation45_spill] sm:$0xff]  ;;  %v7497_v41 = vld [vmem:[#allocation46_spill] sm:$0xff] }
 0x2cc   :  { %4260 = vmatprep.subr.bf16.mxu0 %v7487_v49  ;;  %4324 = vmatprep.subr.bf16.mxu1 %v7488_v13  ;;  %v7498_v49 = vld [vmem:[#allocation47_spill] sm:$0xff]  ;;  %v7499_v13 = vld [vmem:[#allocation48_spill] sm:$0xff] }
 0x2cf   :  { %4262 = vmatpush1.bf16.msra.mxu0 %v7489_v31  ;;  %4326 = vmatpush1.bf16.msra.mxu1 %v7490_v21  ;;  %v7500_v31 = vld [vmem:[#allocation49_spill] sm:$0xff]  ;;  %v7501_v21 = vld [vmem:[#allocation50_spill] sm:$0xff] }
 0x2d0   :  { %4264 = vmatprep.subr.bf16.mxu0 %v7491_v48  ;;  %4328 = vmatprep.subr.bf16.mxu1 %v7492_v51  ;;  %v7502_v48 = vld [vmem:[#allocation51_spill] sm:$0xff]  ;;  %v7503_v51 = vld [vmem:[#allocation52_spill] sm:$0xff] }
 0x2d3   :  { %4266 = vmatpush1.bf16.msra.mxu0 %v7493_v53  ;;  %4330 = vmatpush1.bf16.msra.mxu1 %v7494_v55  ;;  %v7504_v53 = vld [vmem:[#allocation53_spill] sm:$0xff]  ;;  %v7505_v55 = vld [vmem:[#allocation54_spill] sm:$0xff] }
 0x2d4   :  { %4268 = vmatprep.subr.bf16.mxu0 %v7495_v3  ;;  %4332 = vmatprep.subr.bf16.mxu1 %v7496_v9  ;;  %v7506_v3 = vld [vmem:[#allocation55_spill] sm:$0xff]  ;;  %v7507_v9 = vld [vmem:[#allocation56_spill] sm:$0xff] }
 0x2d7   :  { %4270 = vmatpush1.bf16.msra.mxu0 %v7497_v41  ;;  %4334 = vmatpush1.bf16.msra.mxu1 %v7498_v49  ;;  %v7508_v41 = vld [vmem:[#allocation57_spill] sm:$0xff]  ;;  %v7509_v49 = vld [vmem:[#allocation58_spill] sm:$0xff] }
 0x2d8   :  { %4272 = vmatprep.subr.bf16.mxu0 %v7499_v13  ;;  %4336 = vmatprep.subr.bf16.mxu1 %v7500_v31  ;;  %v7510_v13 = vld [vmem:[#allocation59_spill] sm:$0xff]  ;;  %v7511_v31 = vld [vmem:[#allocation60_spill] sm:$0xff] }
 0x2db   :  { %4274 = vmatpush1.bf16.msra.mxu0 %v7501_v21  ;;  %4338 = vmatpush1.bf16.msra.mxu1 %v7502_v48  ;;  %v7512_v21 = vld [vmem:[#allocation61_spill] sm:$0xff]  ;;  %v7513_v48 = vld [vmem:[#allocation62_spill] sm:$0xff] }
 0x2dc   :  { %4276 = vmatprep.subr.bf16.mxu0 %v7503_v51  ;;  %4340 = vmatprep.subr.bf16.mxu1 %v7504_v53  ;;  %v7514_v51 = vld [vmem:[#allocation63_spill] sm:$0xff]  ;;  %v7515_v53 = vld [vmem:[#allocation64_spill] sm:$0xff] }
 0x2df   :  { %4278 = vmatpush1.bf16.msra.mxu0 %v7505_v55  ;;  %4342 = vmatpush1.bf16.msra.mxu1 %v7506_v3  ;;  %v7516_v55 = vld [vmem:[#allocation65_spill] sm:$0xff]  ;;  %v7517_v3 = vld [vmem:[#allocation66_spill] sm:$0xff] }
 0x2e0   :  { %4280 = vmatprep.subr.bf16.mxu0 %v7507_v9  ;;  %4344 = vmatprep.subr.bf16.mxu1 %v7508_v41  ;;  %v7518_v9 = vld [vmem:[#allocation67_spill] sm:$0xff]  ;;  %v7519_v41 = vld [vmem:[#allocation68_spill] sm:$0xff] }
 0x2e3   :  { %4282 = vmatpush1.bf16.msra.mxu0 %v7509_v49  ;;  %4346 = vmatpush1.bf16.msra.mxu1 %v7510_v13  ;;  %v7520_v49 = vld [vmem:[#allocation69_spill] sm:$0xff]  ;;  %v7521_v13 = vld [vmem:[#allocation70_spill] sm:$0xff] }
 0x2e4   :  { %4284 = vmatprep.subr.bf16.mxu0 %v7511_v31  ;;  %4348 = vmatprep.subr.bf16.mxu1 %v7512_v21  ;;  %v7522_v31 = vld [vmem:[#allocation71_spill] sm:$0xff]  ;;  %v7523_v21 = vld [vmem:[#allocation72_spill] sm:$0xff] }
 0x2e7   :  { %4286 = vmatpush1.bf16.msra.mxu0 %v7513_v48  ;;  %4350 = vmatpush1.bf16.msra.mxu1 %v7514_v51  ;;  %v7524_v48 = vld [vmem:[#allocation73_spill] sm:$0xff]  ;;  %v7525_v51 = vld [vmem:[#allocation74_spill] sm:$0xff] }
 0x2e8   :  { %4288 = vmatprep.subr.bf16.mxu0 %v7515_v53  ;;  %4352 = vmatprep.subr.bf16.mxu1 %v7516_v55  ;;  %v7526_v53 = vld [vmem:[#allocation75_spill] sm:$0xff]  ;;  %v7527_v55 = vld [vmem:[#allocation20_spill] sm:$0xff] }
 0x2eb   :  { %4290 = vmatpush1.bf16.msra.mxu0 %v7517_v3  ;;  %4354 = vmatpush1.bf16.msra.mxu1 %v7518_v9  ;;  %v7528_v3 = vld [vmem:[#allocation21_spill] sm:$0xff] }
 0x2ec   :  { %4292 = vmatprep.subr.bf16.mxu0 %v7519_v41  ;;  %4356 = vmatprep.subr.bf16.mxu1 %v7520_v49 }
 0x2ef   :  { %4294 = vmatpush1.bf16.msra.mxu0 %v7521_v13  ;;  %4358 = vmatpush1.bf16.msra.mxu1 %v7522_v31 }
 0x2f0   :  { %4296 = vmatprep.subr.bf16.mxu0 %v7523_v21  ;;  %4360 = vmatprep.subr.bf16.mxu1 %v7524_v48  ;;  %v7531_v48 = vld [vmem:[#allocation81_spill] sm:$0xff] }
 0x2f3   :  { %4298 = vmatpush1.bf16.msra.mxu0 %v7525_v51  ;;  %4362 = vmatpush1.bf16.msra.mxu1 %v7526_v53  ;;  %v7532_v53 = vld [vmem:[#allocation82_spill] sm:$0xff] }
 0x2f4   :  { %4364 = vmatprep.subr.bf16.mxu0 %v7527_v55  ;;  %4396 = vmatprep.subr.bf16.mxu1 %v7528_v3 }
 0x369   :  { %v1224_v9 = vpop.f32.mrb[18].mxu0  ;;  %v1295_v41 = vpop.f32.mrb[18].mxu1 }
 0x36a   :  { %v1225_v49 = vadd.f32 %v1224_v9, %v7529_v44  ;;  %v1226_v40 = vpop.f32.mrb[19].mxu0  ;;  %v1297_v13 = vpop.f32.mrb[19].mxu1  ;;  %v1296_v16 = vadd.f32 %v1295_v41, %v7532_v53  ;;  %v7533_v41 = vld [vmem:[#allocation77_spill] sm:$0xff] }
 0x36b   :  { %v1227_v31 = vadd.f32 %v1226_v40, %v7530_v17  ;;  %v1298_v51 = vadd.f32 %v1297_v13, %v7531_v48 }
 0x36c   :  { %v3633_v63 = vmul.f32 -1.442695, %v1225_v49 }
 0x36d   :  { %v3634_v21 = vmul.f32 -1.442695, %v1227_v31  ;;  %v3635_v14 = vmul.f32 -1.442695, %v1298_v51 }
 0x36e   :  { %5495 = vpow2.f32 %v3633_v63 }
 0x36f   :  { %5497 = vpow2.f32 %v3634_v21 }
 0x370   :  { %5499 = vpow2.f32 %v3635_v14 }
 0x371   :  { %5501 = vtanh.f32 %v1296_v16 }
 0x378   :  { %v5496_v55 = vpop.eup %5495 }
 0x379   :  { %v5498_v23 = vpop.eup %5497  ;;  %v1303_v3 = vadd.f32 1.0, %v5496_v55 }
 0x37a   :  { %v1309_v20 = vadd.f32 1.0, %v5498_v23  ;;  %v5500_v9 = vpop.eup %5499 }
 0x37b   :  { %5503 = vrcp.f32 %v1303_v3  ;;  %v5502_v44 = vpop.eup %5501  ;;  %v1316_v63 = vadd.f32 1.0, %v5500_v9 }
 0x37c   :  { %5505 = vrcp.f32 %v1309_v20 }
 0x37d   :  { %5507 = vrcp.f32 %v1316_v63 }
 0x385   :  { %v5504_v40 = vpop.eup %5503 }
 0x386   :  { %v5506_v49 = vpop.eup %5505  ;;  %v1320_v31 = vmul.f32 %v5504_v40, %v5502_v44  ;;  %v7534_v44 = vld [vmem:[#allocation79_spill] sm:$0xff] }
 0x387   :  { %v1319_v21 = vmul.f32 %v5506_v49, %v6476_v10  ;;  %v5508_v10 = vpop.eup %5507 }
 0x389   :  { %v1397_v13 = vpop.f32.mrb[4].mxu0  ;;  %v1468_v51 = vpop.f32.mrb[4].mxu1  ;;  %v6590_v48 = vadd.f32 %v1320_v31, %v1319_v21 }
 0x38a   :  { %v5375_v55 = vadd.f32 %v1397_v13, %v7533_v41  ;;  %v1399_v14 = vpop.f32.mrb[5].mxu0  ;;  %v1470_v16 = vpop.f32.mrb[5].mxu1  ;;  %v5391_v31 = vadd.f32 %v1468_v51, %v6349_v30 }
 0x38b   :  { %v5376_v23 = vadd.f32 %v1399_v14, %v7473_v26  ;;  %5509 = vtanh.f32 %v6590_v48  ;;  %v5392_v9 = vadd.f32 %v1470_v16, %v7534_v44 }
 0x38c   :  { %v3636_v20 = vmul.f32 -1.442695, %v5375_v55 }
 0x38d   :  { %v3637_v3 = vmul.f32 -1.442695, %v5376_v23  ;;  %v3638_v49 = vmul.f32 -1.442695, %v5392_v9 }
 0x38e   :  { %5511 = vpow2.f32 %v3636_v20 }
 0x38f   :  { %5513 = vpow2.f32 %v3637_v3 }
 0x390   :  { %5515 = vpow2.f32 %v3638_v49 }
 0x391   :  { %5517 = vtanh.f32 %v5391_v31  ;;  %v7538_v31 = vld [vmem:[#allocation25_spill] sm:$0xff] }
 0x395   :  { %v5510_v40 = vpop.eup %5509 }
 0x396   :  { %v1323_v63 = vmul.f32 %v5510_v40, %v5508_v10 }
 0x398   :  { %v5512_v21 = vpop.eup %5511  ;;  %1565 = vmatprep.mubr.f32.mxu0 %v1323_v63  ;;  %1636 = vmatprep.mubr.f32.mxu1 %v1323_v63  ;;  %v7539_v63 = vld [vmem:[#allocation26_spill] sm:$0xff] }
 0x399   :  { %v5514_v13 = vpop.eup %5513  ;;  %v1480_v41 = vadd.f32 1.0, %v5512_v21  ;;  %v7540_v21 = vld [vmem:[#allocation27_spill] sm:$0xff] }
 0x39a   :  { %v1486_v14 = vadd.f32 1.0, %v5514_v13  ;;  %v5516_v55 = vpop.eup %5515  ;;  %v7541_v13 = vld [vmem:[#allocation28_spill] sm:$0xff] }
 0x39b   :  { %5519 = vrcp.f32 %v1480_v41  ;;  %v5518_v23 = vpop.eup %5517  ;;  %v1493_v44 = vadd.f32 1.0, %v5516_v55  ;;  %v7536_v41 = vld [vmem:[#allocation23_spill] sm:$0xff]  ;;  %v7543_v55 = vld [vmem:[#allocation30_spill] sm:$0xff] }
 0x39c   :  { %5521 = vrcp.f32 %v1486_v14  ;;  %v7542_v14 = vld [vmem:[#allocation29_spill] sm:$0xff] }
 0x39d   :  { %5523 = vrcp.f32 %v1493_v44  ;;  %v7537_v44 = vld [vmem:[#allocation24_spill] sm:$0xff] }
 0x3a5   :  { %v5520_v20 = vpop.eup %5519 }
 0x3a6   :  { %v5522_v16 = vpop.eup %5521  ;;  %v1497_v3 = vmul.f32 %v5520_v20, %v5518_v23  ;;  %v7544_v23 = vld [vmem:[#allocation31_spill] sm:$0xff]  ;;  %v7545_v20 = vld [vmem:[#allocation32_spill] sm:$0xff] }
 0x3a7   :  { %v1496_v9 = vmul.f32 %v5522_v16, %v6484_v0  ;;  %v5524_v10 = vpop.eup %5523  ;;  %v7535_v0 = vld [vmem:[#allocation22_spill] sm:$0xff]  ;;  %v7546_v16 = vld [vmem:[#allocation33_spill] sm:$0xff] }
 0x3a9   :  { %v6598_v51 = vadd.f32 %v1497_v3, %v1496_v9  ;;  %v7547_v3 = vld [vmem:[#allocation34_spill] sm:$0xff]  ;;  %v7548_v9 = vld [vmem:[#allocation35_spill] sm:$0xff] }
 0x3ab   :  { %5525 = vtanh.f32 %v6598_v51 }
 0x3b5   :  { %v5526_v40 = vpop.eup %5525 }
 0x3b6   :  { %v1500_v49 = vmul.f32 %v5526_v40, %v5524_v10  ;;  %v7549_v10 = vld [vmem:[#allocation36_spill] sm:$0xff]  ;;  %v7550_v40 = vld [vmem:[#allocation37_spill] sm:$0xff] }
 0x3b8   :  { %1566 = vmatmul.mubr.f32.vlgmr.msra.gmra.mrb[20].mxu0 %v1500_v49  ;;  %1637 = vmatmul.mubr.f32.vlgmr.msra.gmra.mrb[20].mxu1 %v1500_v49 }
 0x3b9   :  { %4366 = vmatpush1.bf16.msra.mxu0 %v5980_v22  ;;  %4398 = vmatpush1.bf16.msra.mxu1 %v5983_v25 }
 0x3ba   :  { %4368 = vmatprep.subr.bf16.mxu0 %v5987_v29  ;;  %4400 = vmatprep.subr.bf16.mxu1 %v5994_v34 }
 0x3bb   :  { %1738 = vmatprep.mubr.f32.mxu0 %v7412_v4  ;;  %1809 = vmatprep.mubr.f32.mxu1 %v7412_v4 }
 0x3bd   :  { %4370 = vmatpush1.bf16.msra.mxu0 %v5996_v35  ;;  %4402 = vmatpush1.bf16.msra.mxu1 %v6000_v38 }
 0x3be   :  { %4372 = vmatprep.subr.bf16.mxu0 %v6004_v42  ;;  %4404 = vmatprep.subr.bf16.mxu1 %v6011_v47 }
 0x3c1   :  { %4374 = vmatpush1.bf16.msra.mxu0 %v6015_v50  ;;  %4406 = vmatpush1.bf16.msra.mxu1 %v6019_v54 }
 0x3c2   :  { %4376 = vmatprep.subr.bf16.mxu0 %v6023_v58  ;;  %4408 = vmatprep.subr.bf16.mxu1 %v6027_v61 }
 0x3c5   :  { %4378 = vmatpush1.bf16.msra.mxu0 %v6034_v2  ;;  %4410 = vmatpush1.bf16.msra.mxu1 %v6038_v5 }
 0x3c6   :  { %4380 = vmatprep.subr.bf16.mxu0 %v6042_v8  ;;  %4412 = vmatprep.subr.bf16.mxu1 %v6046_v11 }
 0x3c9   :  { %4382 = vmatpush1.bf16.msra.mxu0 %v6053_v15  ;;  %4414 = vmatpush1.bf16.msra.mxu1 %v6057_v19 }
 0x3ca   :  { %4384 = vmatprep.subr.bf16.mxu0 %v6061_v24  ;;  %4416 = vmatprep.subr.bf16.mxu1 %v6065_v28 }
 0x3cd   :  { %4386 = vmatpush1.bf16.msra.mxu0 %v6072_v33  ;;  %4418 = vmatpush1.bf16.msra.mxu1 %v6076_v39 }
 0x3ce   :  { %4388 = vmatprep.subr.bf16.mxu0 %v6080_v43  ;;  %4420 = vmatprep.subr.bf16.mxu1 %v6084_v46 }
 0x3d1   :  { %4390 = vmatpush1.bf16.msra.mxu0 %v6091_v52  ;;  %4422 = vmatpush1.bf16.msra.mxu1 %v6095_v56 }
 0x3d2   :  { %4392 = vmatprep.subr.bf16.mxu0 %v6099_v60  ;;  %4424 = vmatprep.subr.bf16.mxu1 %v6103_v1 }
 0x3d5   :  { %4394 = vmatpush1.bf16.msra.mxu0 %v6110_v7  ;;  %4426 = vmatpush1.bf16.msra.mxu1 %v6114_v12 }
 0x3d6   :  { %4428 = vmatprep.subr.bf16.mxu0 %v6118_v18  ;;  %4492 = vmatprep.subr.bf16.mxu1 %v6122_v27 }
 0x3d8   :  { %1739 = vmatmul.mubr.f32.vlgmr.msra.gmra.mrb[6].mxu0 %v1500_v49  ;;  %1810 = vmatmul.mubr.f32.vlgmr.msra.gmra.mrb[6].mxu1 %v1500_v49  ;;  %v7551_v49 = vld [vmem:[#allocation38_spill] sm:$0xff] }
 0x3d9   :  { %4430 = vmatpush1.bf16.msra.mxu0 %v6126_v32  ;;  %4494 = vmatpush1.bf16.msra.mxu1 %v6130_v36 }
 0x3da   :  { %4432 = vmatprep.subr.bf16.mxu0 %v6132_v37  ;;  %4496 = vmatprep.subr.bf16.mxu1 %v6136_v45 }
 0x3dd   :  { %4434 = vmatpush1.bf16.msra.mxu0 %v6142_v57  ;;  %4498 = vmatpush1.bf16.msra.mxu1 %v6146_v59 }
 0x3de   :  { %4436 = vmatprep.subr.bf16.mxu0 %v6148_v62  ;;  %4500 = vmatprep.subr.bf16.mxu1 %v6151_v6 }
 0x3e1   :  { %4438 = vmatpush1.bf16.msra.mxu0 %v7535_v0  ;;  %4502 = vmatpush1.bf16.msra.mxu1 %v7536_v41 }
 0x3e2   :  { %4440 = vmatprep.subr.bf16.mxu0 %v7537_v44  ;;  %4504 = vmatprep.subr.bf16.mxu1 %v7538_v31 }
 0x3e5   :  { %4442 = vmatpush1.bf16.msra.mxu0 %v7539_v63  ;;  %4506 = vmatpush1.bf16.msra.mxu1 %v7540_v21  ;;  %v7591_v21 = vld [vmem:[#allocation76_spill] sm:$0xff] }
 0x3e6   :  { %4444 = vmatprep.subr.bf16.mxu0 %v7541_v13  ;;  %4508 = vmatprep.subr.bf16.mxu1 %v7542_v14  ;;  %v7552_v13 = vld [vmem:[#allocation39_spill] sm:$0xff]  ;;  %v7553_v14 = vld [vmem:[#allocation40_spill] sm:$0xff] }
 0x3e9   :  { %4446 = vmatpush1.bf16.msra.mxu0 %v7543_v55  ;;  %4510 = vmatpush1.bf16.msra.mxu1 %v7544_v23  ;;  %v7554_v55 = vld [vmem:[#allocation41_spill] sm:$0xff]  ;;  %v7555_v23 = vld [vmem:[#allocation42_spill] sm:$0xff] }
 0x3ea   :  { %4448 = vmatprep.subr.bf16.mxu0 %v7545_v20  ;;  %4512 = vmatprep.subr.bf16.mxu1 %v7546_v16  ;;  %v7556_v20 = vld [vmem:[#allocation43_spill] sm:$0xff]  ;;  %v7557_v16 = vld [vmem:[#allocation44_spill] sm:$0xff] }
 0x3ed   :  { %4450 = vmatpush1.bf16.msra.mxu0 %v7547_v3  ;;  %4514 = vmatpush1.bf16.msra.mxu1 %v7548_v9  ;;  %v7558_v3 = vld [vmem:[#allocation45_spill] sm:$0xff]  ;;  %v7559_v9 = vld [vmem:[#allocation46_spill] sm:$0xff] }
 0x3ee   :  { %4452 = vmatprep.subr.bf16.mxu0 %v7549_v10  ;;  %4516 = vmatprep.subr.bf16.mxu1 %v7550_v40  ;;  %v7560_v10 = vld [vmem:[#allocation47_spill] sm:$0xff]  ;;  %v7561_v40 = vld [vmem:[#allocation48_spill] sm:$0xff] }
 0x3f1   :  { %4454 = vmatpush1.bf16.msra.mxu0 %v7551_v49  ;;  %4518 = vmatpush1.bf16.msra.mxu1 %v7552_v13  ;;  %v7562_v49 = vld [vmem:[#allocation49_spill] sm:$0xff]  ;;  %v7563_v13 = vld [vmem:[#allocation50_spill] sm:$0xff] }
 0x3f2   :  { %4456 = vmatprep.subr.bf16.mxu0 %v7553_v14  ;;  %4520 = vmatprep.subr.bf16.mxu1 %v7554_v55  ;;  %v7564_v14 = vld [vmem:[#allocation51_spill] sm:$0xff]  ;;  %v7565_v55 = vld [vmem:[#allocation52_spill] sm:$0xff] }
 0x3f5   :  { %4458 = vmatpush1.bf16.msra.mxu0 %v7555_v23  ;;  %4522 = vmatpush1.bf16.msra.mxu1 %v7556_v20  ;;  %v7566_v23 = vld [vmem:[#allocation53_spill] sm:$0xff]  ;;  %v7567_v20 = vld [vmem:[#allocation54_spill] sm:$0xff] }
 0x3f6   :  { %4460 = vmatprep.subr.bf16.mxu0 %v7557_v16  ;;  %4524 = vmatprep.subr.bf16.mxu1 %v7558_v3  ;;  %v7568_v16 = vld [vmem:[#allocation55_spill] sm:$0xff]  ;;  %v7569_v3 = vld [vmem:[#allocation56_spill] sm:$0xff] }
 0x3f9   :  { %4462 = vmatpush1.bf16.msra.mxu0 %v7559_v9  ;;  %4526 = vmatpush1.bf16.msra.mxu1 %v7560_v10  ;;  %v7570_v9 = vld [vmem:[#allocation57_spill] sm:$0xff]  ;;  %v7571_v10 = vld [vmem:[#allocation58_spill] sm:$0xff] }
 0x3fa   :  { %4464 = vmatprep.subr.bf16.mxu0 %v7561_v40  ;;  %4528 = vmatprep.subr.bf16.mxu1 %v7562_v49  ;;  %v7572_v40 = vld [vmem:[#allocation59_spill] sm:$0xff]  ;;  %v7573_v49 = vld [vmem:[#allocation60_spill] sm:$0xff] }
 0x3fd   :  { %4466 = vmatpush1.bf16.msra.mxu0 %v7563_v13  ;;  %4530 = vmatpush1.bf16.msra.mxu1 %v7564_v14  ;;  %v7574_v13 = vld [vmem:[#allocation61_spill] sm:$0xff]  ;;  %v7575_v14 = vld [vmem:[#allocation62_spill] sm:$0xff] }
 0x3fe   :  { %4468 = vmatprep.subr.bf16.mxu0 %v7565_v55  ;;  %4532 = vmatprep.subr.bf16.mxu1 %v7566_v23  ;;  %v7576_v55 = vld [vmem:[#allocation63_spill] sm:$0xff]  ;;  %v7577_v23 = vld [vmem:[#allocation64_spill] sm:$0xff] }
 0x401   :  { %4470 = vmatpush1.bf16.msra.mxu0 %v7567_v20  ;;  %4534 = vmatpush1.bf16.msra.mxu1 %v7568_v16  ;;  %v7578_v20 = vld [vmem:[#allocation65_spill] sm:$0xff]  ;;  %v7579_v16 = vld [vmem:[#allocation66_spill] sm:$0xff] }
 0x402   :  { %4472 = vmatprep.subr.bf16.mxu0 %v7569_v3  ;;  %4536 = vmatprep.subr.bf16.mxu1 %v7570_v9  ;;  %v7580_v3 = vld [vmem:[#allocation67_spill] sm:$0xff]  ;;  %v7581_v9 = vld [vmem:[#allocation68_spill] sm:$0xff] }
 0x405   :  { %4474 = vmatpush1.bf16.msra.mxu0 %v7571_v10  ;;  %4538 = vmatpush1.bf16.msra.mxu1 %v7572_v40  ;;  %v7582_v10 = vld [vmem:[#allocation69_spill] sm:$0xff]  ;;  %v7583_v40 = vld [vmem:[#allocation70_spill] sm:$0xff] }
 0x406   :  { %4476 = vmatprep.subr.bf16.mxu0 %v7573_v49  ;;  %4540 = vmatprep.subr.bf16.mxu1 %v7574_v13  ;;  %v7584_v49 = vld [vmem:[#allocation71_spill] sm:$0xff]  ;;  %v7585_v13 = vld [vmem:[#allocation72_spill] sm:$0xff] }
 0x409   :  { %4478 = vmatpush1.bf16.msra.mxu0 %v7575_v14  ;;  %4542 = vmatpush1.bf16.msra.mxu1 %v7576_v55  ;;  %v7586_v14 = vld [vmem:[#allocation73_spill] sm:$0xff]  ;;  %v7587_v55 = vld [vmem:[#allocation74_spill] sm:$0xff] }
 0x40a   :  { %4480 = vmatprep.subr.bf16.mxu0 %v7577_v23  ;;  %4544 = vmatprep.subr.bf16.mxu1 %v7578_v20  ;;  %v7588_v23 = vld [vmem:[#allocation75_spill] sm:$0xff]  ;;  %v7589_v20 = vld [vmem:[#allocation20_spill] sm:$0xff] }
 0x40d   :  { %4482 = vmatpush1.bf16.msra.mxu0 %v7579_v16  ;;  %4546 = vmatpush1.bf16.msra.mxu1 %v7580_v3  ;;  %v7590_v16 = vld [vmem:[#allocation21_spill] sm:$0xff] }
 0x40e   :  { %4484 = vmatprep.subr.bf16.mxu0 %v7581_v9  ;;  %4548 = vmatprep.subr.bf16.mxu1 %v7582_v10 }
 0x411   :  { %4486 = vmatpush1.bf16.msra.mxu0 %v7583_v40  ;;  %4550 = vmatpush1.bf16.msra.mxu1 %v7584_v49 }
 0x412   :  { %4488 = vmatprep.subr.bf16.mxu0 %v7585_v13  ;;  %4552 = vmatprep.subr.bf16.mxu1 %v7586_v14  ;;  %v7592_v14 = vld [vmem:[#allocation81_spill] sm:$0xff] }
 0x415   :  { %4490 = vmatpush1.bf16.msra.mxu0 %v7587_v55  ;;  %4554 = vmatpush1.bf16.msra.mxu1 %v7588_v23 }
 0x416   :  { %4556 = vmatprep.subr.bf16.mxu0 %v7589_v20  ;;  %4588 = vmatprep.subr.bf16.mxu1 %v7590_v16 }
 0x48b   :  { %v1567_v3 = vpop.f32.mrb[20].mxu0  ;;  %v1638_v9 = vpop.f32.mrb[20].mxu1 }
 0x48c   :  { %v1568_v10 = vadd.f32 %v1567_v3, %v7591_v21  ;;  %v1569_v63 = vpop.f32.mrb[21].mxu0  ;;  %v1640_v40 = vpop.f32.mrb[21].mxu1  ;;  %v1639_v23 = vadd.f32 %v1638_v9, %v7532_v53  ;;  %v7593_v9 = vld [vmem:[#allocation77_spill] sm:$0xff] }
 0x48d   :  { %v1570_v49 = vadd.f32 %v1569_v63, %v7530_v17  ;;  %v1641_v55 = vadd.f32 %v1640_v40, %v7592_v14 }
 0x48e   :  { %v3639_v31 = vmul.f32 -1.442695, %v1568_v10 }
 0x48f   :  { %v3640_v13 = vmul.f32 -1.442695, %v1570_v49  ;;  %v3641_v44 = vmul.f32 -1.442695, %v1641_v55 }
 0x490   :  { %5527 = vpow2.f32 %v3639_v31 }
 0x491   :  { %5529 = vpow2.f32 %v3640_v13 }
 0x492   :  { %5531 = vpow2.f32 %v3641_v44 }
 0x493   :  { %5533 = vtanh.f32 %v1639_v23 }
 0x49a   :  { %v5528_v20 = vpop.eup %5527 }
 0x49b   :  { %v5530_v41 = vpop.eup %5529  ;;  %v1646_v16 = vadd.f32 1.0, %v5528_v20 }
 0x49c   :  { %v1652_v0 = vadd.f32 1.0, %v5530_v41  ;;  %v5532_v3 = vpop.eup %5531 }
 0x49d   :  { %5535 = vrcp.f32 %v1646_v16  ;;  %v5534_v21 = vpop.eup %5533  ;;  %v1659_v31 = vadd.f32 1.0, %v5532_v3 }
 0x49e   :  { %5537 = vrcp.f32 %v1652_v0 }
 0x49f   :  { %5539 = vrcp.f32 %v1659_v31 }
 0x4a7   :  { %v5536_v63 = vpop.eup %5535 }
 0x4a8   :  { %v5538_v10 = vpop.eup %5537  ;;  %v1663_v49 = vmul.f32 %v5536_v63, %v5534_v21  ;;  %v7594_v21 = vld [vmem:[#allocation79_spill] sm:$0xff] }
 0x4a9   :  { %v1662_v13 = vmul.f32 %v5538_v10, %v6590_v48  ;;  %v5540_v48 = vpop.eup %5539 }
 0x4ab   :  { %v1740_v40 = vpop.f32.mrb[6].mxu0  ;;  %v1811_v55 = vpop.f32.mrb[6].mxu1  ;;  %v6704_v14 = vadd.f32 %v1663_v49, %v1662_v13 }
 0x4ac   :  { %v5377_v20 = vadd.f32 %v1740_v40, %v7593_v9  ;;  %v1742_v44 = vpop.f32.mrb[7].mxu0  ;;  %v1813_v23 = vpop.f32.mrb[7].mxu1  ;;  %v5393_v49 = vadd.f32 %v1811_v55, %v6349_v30 }
 0x4ad   :  { %v5378_v41 = vadd.f32 %v1742_v44, %v7473_v26  ;;  %5541 = vtanh.f32 %v6704_v14  ;;  %v5394_v3 = vadd.f32 %v1813_v23, %v7594_v21 }
 0x4ae   :  { %v3642_v0 = vmul.f32 -1.442695, %v5377_v20 }
 0x4af   :  { %v3643_v16 = vmul.f32 -1.442695, %v5378_v41  ;;  %v3644_v10 = vmul.f32 -1.442695, %v5394_v3 }
 0x4b0   :  { %5543 = vpow2.f32 %v3642_v0 }
 0x4b1   :  { %5545 = vpow2.f32 %v3643_v16 }
 0x4b2   :  { %5547 = vpow2.f32 %v3644_v10 }
 0x4b3   :  { %5549 = vtanh.f32 %v5393_v49  ;;  %v7598_v49 = vld [vmem:[#allocation25_spill] sm:$0xff] }
 0x4b7   :  { %v5542_v63 = vpop.eup %5541 }
 0x4b8   :  { %v1666_v31 = vmul.f32 %v5542_v63, %v5540_v48 }
 0x4ba   :  { %v5544_v13 = vpop.eup %5543  ;;  %1908 = vmatprep.mubr.f32.mxu0 %v1666_v31  ;;  %1979 = vmatprep.mubr.f32.mxu1 %v1666_v31  ;;  %v7599_v31 = vld [vmem:[#allocation26_spill] sm:$0xff] }
 0x4bb   :  { %v5546_v40 = vpop.eup %5545  ;;  %v1823_v9 = vadd.f32 1.0, %v5544_v13  ;;  %v7600_v13 = vld [vmem:[#allocation27_spill] sm:$0xff] }
 0x4bc   :  { %v1829_v44 = vadd.f32 1.0, %v5546_v40  ;;  %v5548_v20 = vpop.eup %5547  ;;  %v7601_v40 = vld [vmem:[#allocation28_spill] sm:$0xff] }
 0x4bd   :  { %5551 = vrcp.f32 %v1823_v9  ;;  %v5550_v41 = vpop.eup %5549  ;;  %v1836_v21 = vadd.f32 1.0, %v5548_v20  ;;  %v7596_v9 = vld [vmem:[#allocation23_spill] sm:$0xff]  ;;  %v7603_v20 = vld [vmem:[#allocation30_spill] sm:$0xff] }
 0x4be   :  { %5553 = vrcp.f32 %v1829_v44  ;;  %v7602_v44 = vld [vmem:[#allocation29_spill] sm:$0xff] }
 0x4bf   :  { %5555 = vrcp.f32 %v1836_v21  ;;  %v7597_v21 = vld [vmem:[#allocation24_spill] sm:$0xff] }
 0x4c7   :  { %v5552_v0 = vpop.eup %5551 }
 0x4c8   :  { %v5554_v23 = vpop.eup %5553  ;;  %v1840_v16 = vmul.f32 %v5552_v0, %v5550_v41  ;;  %v7604_v41 = vld [vmem:[#allocation31_spill] sm:$0xff]  ;;  %v7605_v0 = vld [vmem:[#allocation32_spill] sm:$0xff] }
 0x4c9   :  { %v1839_v3 = vmul.f32 %v5554_v23, %v6598_v51  ;;  %v5556_v48 = vpop.eup %5555  ;;  %v7595_v51 = vld [vmem:[#allocation22_spill] sm:$0xff]  ;;  %v7606_v23 = vld [vmem:[#allocation33_spill] sm:$0xff] }
 0x4cb   :  { %v6712_v55 = vadd.f32 %v1840_v16, %v1839_v3  ;;  %v7607_v16 = vld [vmem:[#allocation34_spill] sm:$0xff]  ;;  %v7608_v3 = vld [vmem:[#allocation35_spill] sm:$0xff] }
 0x4cd   :  { %5557 = vtanh.f32 %v6712_v55 }
 0x4d7   :  { %v5558_v63 = vpop.eup %5557 }
 0x4d8   :  { %v1843_v10 = vmul.f32 %v5558_v63, %v5556_v48  ;;  %v7609_v48 = vld [vmem:[#allocation36_spill] sm:$0xff]  ;;  %v7610_v63 = vld [vmem:[#allocation37_spill] sm:$0xff] }
 0x4da   :  { %1909 = vmatmul.mubr.f32.vlgmr.msra.gmra.mrb[22].mxu0 %v1843_v10  ;;  %1980 = vmatmul.mubr.f32.vlgmr.msra.gmra.mrb[22].mxu1 %v1843_v10 }
 0x4db   :  { %4558 = vmatpush1.bf16.msra.mxu0 %v5980_v22  ;;  %4590 = vmatpush1.bf16.msra.mxu1 %v5983_v25 }
 0x4dc   :  { %4560 = vmatprep.subr.bf16.mxu0 %v5987_v29  ;;  %4592 = vmatprep.subr.bf16.mxu1 %v5994_v34 }
 0x4dd   :  { %2081 = vmatprep.mubr.f32.mxu0 %v7412_v4  ;;  %2152 = vmatprep.mubr.f32.mxu1 %v7412_v4 }
 0x4df   :  { %4562 = vmatpush1.bf16.msra.mxu0 %v5996_v35  ;;  %4594 = vmatpush1.bf16.msra.mxu1 %v6000_v38 }
 0x4e0   :  { %4564 = vmatprep.subr.bf16.mxu0 %v6004_v42  ;;  %4596 = vmatprep.subr.bf16.mxu1 %v6011_v47 }
 0x4e3   :  { %4566 = vmatpush1.bf16.msra.mxu0 %v6015_v50  ;;  %4598 = vmatpush1.bf16.msra.mxu1 %v6019_v54 }
 0x4e4   :  { %4568 = vmatprep.subr.bf16.mxu0 %v6023_v58  ;;  %4600 = vmatprep.subr.bf16.mxu1 %v6027_v61 }
 0x4e7   :  { %4570 = vmatpush1.bf16.msra.mxu0 %v6034_v2  ;;  %4602 = vmatpush1.bf16.msra.mxu1 %v6038_v5 }
 0x4e8   :  { %4572 = vmatprep.subr.bf16.mxu0 %v6042_v8  ;;  %4604 = vmatprep.subr.bf16.mxu1 %v6046_v11 }
 0x4eb   :  { %4574 = vmatpush1.bf16.msra.mxu0 %v6053_v15  ;;  %4606 = vmatpush1.bf16.msra.mxu1 %v6057_v19 }
 0x4ec   :  { %4576 = vmatprep.subr.bf16.mxu0 %v6061_v24  ;;  %4608 = vmatprep.subr.bf16.mxu1 %v6065_v28 }
 0x4ef   :  { %4578 = vmatpush1.bf16.msra.mxu0 %v6072_v33  ;;  %4610 = vmatpush1.bf16.msra.mxu1 %v6076_v39 }
 0x4f0   :  { %4580 = vmatprep.subr.bf16.mxu0 %v6080_v43  ;;  %4612 = vmatprep.subr.bf16.mxu1 %v6084_v46 }
 0x4f3   :  { %4582 = vmatpush1.bf16.msra.mxu0 %v6091_v52  ;;  %4614 = vmatpush1.bf16.msra.mxu1 %v6095_v56 }
 0x4f4   :  { %4584 = vmatprep.subr.bf16.mxu0 %v6099_v60  ;;  %4616 = vmatprep.subr.bf16.mxu1 %v6103_v1 }
 0x4f7   :  { %4586 = vmatpush1.bf16.msra.mxu0 %v6110_v7  ;;  %4618 = vmatpush1.bf16.msra.mxu1 %v6114_v12 }
 0x4f8   :  { %4620 = vmatprep.subr.bf16.mxu0 %v6118_v18  ;;  %4684 = vmatprep.subr.bf16.mxu1 %v6122_v27 }
 0x4fa   :  { %2082 = vmatmul.mubr.f32.vlgmr.msra.gmra.mrb[8].mxu0 %v1843_v10  ;;  %2153 = vmatmul.mubr.f32.vlgmr.msra.gmra.mrb[8].mxu1 %v1843_v10  ;;  %v7611_v10 = vld [vmem:[#allocation38_spill] sm:$0xff] }
 0x4fb   :  { %4622 = vmatpush1.bf16.msra.mxu0 %v6126_v32  ;;  %4686 = vmatpush1.bf16.msra.mxu1 %v6130_v36 }
 0x4fc   :  { %4624 = vmatprep.subr.bf16.mxu0 %v6132_v37  ;;  %4688 = vmatprep.subr.bf16.mxu1 %v6136_v45 }
 0x4ff   :  { %4626 = vmatpush1.bf16.msra.mxu0 %v6142_v57  ;;  %4690 = vmatpush1.bf16.msra.mxu1 %v6146_v59 }
 0x500   :  { %4628 = vmatprep.subr.bf16.mxu0 %v6148_v62  ;;  %4692 = vmatprep.subr.bf16.mxu1 %v6151_v6 }
 0x503   :  { %4630 = vmatpush1.bf16.msra.mxu0 %v7595_v51  ;;  %4694 = vmatpush1.bf16.msra.mxu1 %v7596_v9 }
 0x504   :  { %4632 = vmatprep.subr.bf16.mxu0 %v7597_v21  ;;  %4696 = vmatprep.subr.bf16.mxu1 %v7598_v49 }
 0x507   :  { %4634 = vmatpush1.bf16.msra.mxu0 %v7599_v31  ;;  %4698 = vmatpush1.bf16.msra.mxu1 %v7600_v13  ;;  %v7651_v13 = vld [vmem:[#allocation76_spill] sm:$0xff] }
 0x508   :  { %4636 = vmatprep.subr.bf16.mxu0 %v7601_v40  ;;  %4700 = vmatprep.subr.bf16.mxu1 %v7602_v44  ;;  %v7612_v40 = vld [vmem:[#allocation39_spill] sm:$0xff]  ;;  %v7613_v44 = vld [vmem:[#allocation40_spill] sm:$0xff] }
 0x50b   :  { %4638 = vmatpush1.bf16.msra.mxu0 %v7603_v20  ;;  %4702 = vmatpush1.bf16.msra.mxu1 %v7604_v41  ;;  %v7614_v20 = vld [vmem:[#allocation41_spill] sm:$0xff]  ;;  %v7615_v41 = vld [vmem:[#allocation42_spill] sm:$0xff] }
 0x50c   :  { %4640 = vmatprep.subr.bf16.mxu0 %v7605_v0  ;;  %4704 = vmatprep.subr.bf16.mxu1 %v7606_v23  ;;  %v7616_v0 = vld [vmem:[#allocation43_spill] sm:$0xff]  ;;  %v7617_v23 = vld [vmem:[#allocation44_spill] sm:$0xff] }
 0x50f   :  { %4642 = vmatpush1.bf16.msra.mxu0 %v7607_v16  ;;  %4706 = vmatpush1.bf16.msra.mxu1 %v7608_v3  ;;  %v7618_v16 = vld [vmem:[#allocation45_spill] sm:$0xff]  ;;  %v7619_v3 = vld [vmem:[#allocation46_spill] sm:$0xff] }
 0x510   :  { %4644 = vmatprep.subr.bf16.mxu0 %v7609_v48  ;;  %4708 = vmatprep.subr.bf16.mxu1 %v7610_v63  ;;  %v7620_v48 = vld [vmem:[#allocation47_spill] sm:$0xff]  ;;  %v7621_v63 = vld [vmem:[#allocation48_spill] sm:$0xff] }
 0x513   :  { %4646 = vmatpush1.bf16.msra.mxu0 %v7611_v10  ;;  %4710 = vmatpush1.bf16.msra.mxu1 %v7612_v40  ;;  %v7622_v10 = vld [vmem:[#allocation49_spill] sm:$0xff]  ;;  %v7623_v40 = vld [vmem:[#allocation50_spill] sm:$0xff] }
 0x514   :  { %4648 = vmatprep.subr.bf16.mxu0 %v7613_v44  ;;  %4712 = vmatprep.subr.bf16.mxu1 %v7614_v20  ;;  %v7624_v44 = vld [vmem:[#allocation51_spill] sm:$0xff]  ;;  %v7625_v20 = vld [vmem:[#allocation52_spill] sm:$0xff] }
 0x517   :  { %4650 = vmatpush1.bf16.msra.mxu0 %v7615_v41  ;;  %4714 = vmatpush1.bf16.msra.mxu1 %v7616_v0  ;;  %v7626_v41 = vld [vmem:[#allocation53_spill] sm:$0xff]  ;;  %v7627_v0 = vld [vmem:[#allocation54_spill] sm:$0xff] }
 0x518   :  { %4652 = vmatprep.subr.bf16.mxu0 %v7617_v23  ;;  %4716 = vmatprep.subr.bf16.mxu1 %v7618_v16  ;;  %v7628_v23 = vld [vmem:[#allocation55_spill] sm:$0xff]  ;;  %v7629_v16 = vld [vmem:[#allocation56_spill] sm:$0xff] }
 0x51b   :  { %4654 = vmatpush1.bf16.msra.mxu0 %v7619_v3  ;;  %4718 = vmatpush1.bf16.msra.mxu1 %v7620_v48  ;;  %v7630_v3 = vld [vmem:[#allocation57_spill] sm:$0xff]  ;;  %v7631_v48 = vld [vmem:[#allocation58_spill] sm:$0xff] }
 0x51c   :  { %4656 = vmatprep.subr.bf16.mxu0 %v7621_v63  ;;  %4720 = vmatprep.subr.bf16.mxu1 %v7622_v10  ;;  %v7632_v63 = vld [vmem:[#allocation59_spill] sm:$0xff]  ;;  %v7633_v10 = vld [vmem:[#allocation60_spill] sm:$0xff] }
 0x51f   :  { %4658 = vmatpush1.bf16.msra.mxu0 %v7623_v40  ;;  %4722 = vmatpush1.bf16.msra.mxu1 %v7624_v44  ;;  %v7634_v40 = vld [vmem:[#allocation61_spill] sm:$0xff]  ;;  %v7635_v44 = vld [vmem:[#allocation62_spill] sm:$0xff] }
 0x520   :  { %4660 = vmatprep.subr.bf16.mxu0 %v7625_v20  ;;  %4724 = vmatprep.subr.bf16.mxu1 %v7626_v41  ;;  %v7636_v20 = vld [vmem:[#allocation63_spill] sm:$0xff]  ;;  %v7637_v41 = vld [vmem:[#allocation64_spill] sm:$0xff] }
 0x523   :  { %4662 = vmatpush1.bf16.msra.mxu0 %v7627_v0  ;;  %4726 = vmatpush1.bf16.msra.mxu1 %v7628_v23  ;;  %v7638_v0 = vld [vmem:[#allocation65_spill] sm:$0xff]  ;;  %v7639_v23 = vld [vmem:[#allocation66_spill] sm:$0xff] }
 0x524   :  { %4664 = vmatprep.subr.bf16.mxu0 %v7629_v16  ;;  %4728 = vmatprep.subr.bf16.mxu1 %v7630_v3  ;;  %v7640_v16 = vld [vmem:[#allocation67_spill] sm:$0xff]  ;;  %v7641_v3 = vld [vmem:[#allocation68_spill] sm:$0xff] }
 0x527   :  { %4666 = vmatpush1.bf16.msra.mxu0 %v7631_v48  ;;  %4730 = vmatpush1.bf16.msra.mxu1 %v7632_v63  ;;  %v7642_v48 = vld [vmem:[#allocation69_spill] sm:$0xff]  ;;  %v7643_v63 = vld [vmem:[#allocation70_spill] sm:$0xff] }
 0x528   :  { %4668 = vmatprep.subr.bf16.mxu0 %v7633_v10  ;;  %4732 = vmatprep.subr.bf16.mxu1 %v7634_v40  ;;  %v7644_v10 = vld [vmem:[#allocation71_spill] sm:$0xff]  ;;  %v7645_v40 = vld [vmem:[#allocation72_spill] sm:$0xff] }
 0x52b   :  { %4670 = vmatpush1.bf16.msra.mxu0 %v7635_v44  ;;  %4734 = vmatpush1.bf16.msra.mxu1 %v7636_v20  ;;  %v7646_v44 = vld [vmem:[#allocation73_spill] sm:$0xff]  ;;  %v7647_v20 = vld [vmem:[#allocation74_spill] sm:$0xff] }
 0x52c   :  { %4672 = vmatprep.subr.bf16.mxu0 %v7637_v41  ;;  %4736 = vmatprep.subr.bf16.mxu1 %v7638_v0  ;;  %v7648_v41 = vld [vmem:[#allocation75_spill] sm:$0xff]  ;;  %v7649_v0 = vld [vmem:[#allocation20_spill] sm:$0xff] }
 0x52f   :  { %4674 = vmatpush1.bf16.msra.mxu0 %v7639_v23  ;;  %4738 = vmatpush1.bf16.msra.mxu1 %v7640_v16  ;;  %v7650_v23 = vld [vmem:[#allocation21_spill] sm:$0xff] }
 0x530   :  { %4676 = vmatprep.subr.bf16.mxu0 %v7641_v3  ;;  %4740 = vmatprep.subr.bf16.mxu1 %v7642_v48 }
 0x533   :  { %4678 = vmatpush1.bf16.msra.mxu0 %v7643_v63  ;;  %4742 = vmatpush1.bf16.msra.mxu1 %v7644_v10 }
 0x534   :  { %4680 = vmatprep.subr.bf16.mxu0 %v7645_v40  ;;  %4744 = vmatprep.subr.bf16.mxu1 %v7646_v44  ;;  %v7652_v44 = vld [vmem:[#allocation81_spill] sm:$0xff] }
 0x537   :  { %4682 = vmatpush1.bf16.msra.mxu0 %v7647_v20  ;;  %4746 = vmatpush1.bf16.msra.mxu1 %v7648_v41 }
 0x538   :  { %4748 = vmatprep.subr.bf16.mxu0 %v7649_v0  ;;  %4780 = vmatprep.subr.bf16.mxu1 %v7650_v23 }
 0x5ad   :  { %v1910_v16 = vpop.f32.mrb[22].mxu0  ;;  %v1981_v3 = vpop.f32.mrb[22].mxu1 }
 0x5ae   :  { %v1911_v48 = vadd.f32 %v1910_v16, %v7651_v13  ;;  %v1912_v31 = vpop.f32.mrb[23].mxu0  ;;  %v1983_v63 = vpop.f32.mrb[23].mxu1  ;;  %v1982_v41 = vadd.f32 %v1981_v3, %v7532_v53  ;;  %v7653_v3 = vld [vmem:[#allocation77_spill] sm:$0xff] }
 0x5af   :  { %v1913_v10 = vadd.f32 %v1912_v31, %v7530_v17  ;;  %v1984_v20 = vadd.f32 %v1983_v63, %v7652_v44 }
 0x5b0   :  { %v3645_v49 = vmul.f32 -1.442695, %v1911_v48 }
 0x5b1   :  { %v3646_v40 = vmul.f32 -1.442695, %v1913_v10  ;;  %v3647_v21 = vmul.f32 -1.442695, %v1984_v20 }
 0x5b2   :  { %5559 = vpow2.f32 %v3645_v49 }
 0x5b3   :  { %5561 = vpow2.f32 %v3646_v40 }
 0x5b4   :  { %5563 = vpow2.f32 %v3647_v21 }
 0x5b5   :  { %5565 = vtanh.f32 %v1982_v41 }
 0x5bc   :  { %v5560_v0 = vpop.eup %5559 }
 0x5bd   :  { %v5562_v9 = vpop.eup %5561  ;;  %v1989_v23 = vadd.f32 1.0, %v5560_v0 }
 0x5be   :  { %v1995_v51 = vadd.f32 1.0, %v5562_v9  ;;  %v5564_v16 = vpop.eup %5563 }
 0x5bf   :  { %5567 = vrcp.f32 %v1989_v23  ;;  %v5566_v13 = vpop.eup %5565  ;;  %v2002_v49 = vadd.f32 1.0, %v5564_v16 }
 0x5c0   :  { %5569 = vrcp.f32 %v1995_v51 }
 0x5c1   :  { %5571 = vrcp.f32 %v2002_v49 }
 0x5c9   :  { %v5568_v31 = vpop.eup %5567 }
 0x5ca   :  { %v5570_v48 = vpop.eup %5569  ;;  %v2006_v10 = vmul.f32 %v5568_v31, %v5566_v13  ;;  %v7654_v13 = vld [vmem:[#allocation79_spill] sm:$0xff] }
 0x5cb   :  { %v2005_v40 = vmul.f32 %v5570_v48, %v6704_v14  ;;  %v5572_v14 = vpop.eup %5571 }
 0x5cd   :  { %v2083_v63 = vpop.f32.mrb[8].mxu0  ;;  %v2154_v20 = vpop.f32.mrb[8].mxu1  ;;  %v6818_v44 = vadd.f32 %v2006_v10, %v2005_v40 }
 0x5ce   :  { %v5379_v0 = vadd.f32 %v2083_v63, %v7653_v3  ;;  %v2085_v21 = vpop.f32.mrb[9].mxu0  ;;  %v2156_v41 = vpop.f32.mrb[9].mxu1  ;;  %v5395_v10 = vadd.f32 %v2154_v20, %v6349_v30 }
 0x5cf   :  { %v5380_v9 = vadd.f32 %v2085_v21, %v7473_v26  ;;  %5573 = vtanh.f32 %v6818_v44  ;;  %v5396_v16 = vadd.f32 %v2156_v41, %v7654_v13 }
 0x5d0   :  { %v3648_v51 = vmul.f32 -1.442695, %v5379_v0 }
 0x5d1   :  { %v3649_v23 = vmul.f32 -1.442695, %v5380_v9  ;;  %v3650_v48 = vmul.f32 -1.442695, %v5396_v16 }
 0x5d2   :  { %5575 = vpow2.f32 %v3648_v51 }
 0x5d3   :  { %5577 = vpow2.f32 %v3649_v23 }
 0x5d4   :  { %5579 = vpow2.f32 %v3650_v48 }
 0x5d5   :  { %5581 = vtanh.f32 %v5395_v10  ;;  %v7658_v10 = vld [vmem:[#allocation25_spill] sm:$0xff] }
 0x5d9   :  { %v5574_v31 = vpop.eup %5573 }
 0x5da   :  { %v2009_v49 = vmul.f32 %v5574_v31, %v5572_v14 }
 0x5dc   :  { %v5576_v40 = vpop.eup %5575  ;;  %2251 = vmatprep.mubr.f32.mxu0 %v2009_v49  ;;  %2322 = vmatprep.mubr.f32.mxu1 %v2009_v49  ;;  %v7659_v49 = vld [vmem:[#allocation26_spill] sm:$0xff] }
 0x5dd   :  { %v5578_v63 = vpop.eup %5577  ;;  %v2166_v3 = vadd.f32 1.0, %v5576_v40  ;;  %v7660_v40 = vld [vmem:[#allocation27_spill] sm:$0xff] }
 0x5de   :  { %v2172_v21 = vadd.f32 1.0, %v5578_v63  ;;  %v5580_v0 = vpop.eup %5579  ;;  %v7661_v63 = vld [vmem:[#allocation28_spill] sm:$0xff] }
 0x5df   :  { %5583 = vrcp.f32 %v2166_v3  ;;  %v5582_v9 = vpop.eup %5581  ;;  %v2179_v13 = vadd.f32 1.0, %v5580_v0  ;;  %v7656_v3 = vld [vmem:[#allocation23_spill] sm:$0xff]  ;;  %v7663_v0 = vld [vmem:[#allocation30_spill] sm:$0xff] }
 0x5e0   :  { %5585 = vrcp.f32 %v2172_v21  ;;  %v7662_v21 = vld [vmem:[#allocation29_spill] sm:$0xff] }
 0x5e1   :  { %5587 = vrcp.f32 %v2179_v13  ;;  %v7657_v13 = vld [vmem:[#allocation24_spill] sm:$0xff] }
 0x5e9   :  { %v5584_v51 = vpop.eup %5583 }
 0x5ea   :  { %v5586_v41 = vpop.eup %5585  ;;  %v2183_v23 = vmul.f32 %v5584_v51, %v5582_v9  ;;  %v7664_v9 = vld [vmem:[#allocation31_spill] sm:$0xff]  ;;  %v7665_v51 = vld [vmem:[#allocation32_spill] sm:$0xff] }
 0x5eb   :  { %v2182_v16 = vmul.f32 %v5586_v41, %v6712_v55  ;;  %v5588_v14 = vpop.eup %5587  ;;  %v7655_v55 = vld [vmem:[#allocation22_spill] sm:$0xff]  ;;  %v7666_v41 = vld [vmem:[#allocation33_spill] sm:$0xff] }
 0x5ed   :  { %v6826_v20 = vadd.f32 %v2183_v23, %v2182_v16  ;;  %v7667_v23 = vld [vmem:[#allocation34_spill] sm:$0xff]  ;;  %v7668_v16 = vld [vmem:[#allocation35_spill] sm:$0xff] }
 0x5ef   :  { %5589 = vtanh.f32 %v6826_v20 }
 0x5f9   :  { %v5590_v31 = vpop.eup %5589 }
 0x5fa   :  { %v2186_v48 = vmul.f32 %v5590_v31, %v5588_v14  ;;  %v7669_v14 = vld [vmem:[#allocation36_spill] sm:$0xff]  ;;  %v7670_v31 = vld [vmem:[#allocation37_spill] sm:$0xff] }
 0x5fc   :  { %2252 = vmatmul.mubr.f32.vlgmr.msra.gmra.mrb[24].mxu0 %v2186_v48  ;;  %2323 = vmatmul.mubr.f32.vlgmr.msra.gmra.mrb[24].mxu1 %v2186_v48 }
 0x5fd   :  { %4750 = vmatpush1.bf16.msra.mxu0 %v5980_v22  ;;  %4782 = vmatpush1.bf16.msra.mxu1 %v5983_v25 }
 0x5fe   :  { %4752 = vmatprep.subr.bf16.mxu0 %v5987_v29  ;;  %4784 = vmatprep.subr.bf16.mxu1 %v5994_v34 }
 0x5ff   :  { %2424 = vmatprep.mubr.f32.mxu0 %v7412_v4  ;;  %2495 = vmatprep.mubr.f32.mxu1 %v7412_v4 }
 0x601   :  { %4754 = vmatpush1.bf16.msra.mxu0 %v5996_v35  ;;  %4786 = vmatpush1.bf16.msra.mxu1 %v6000_v38 }
 0x602   :  { %4756 = vmatprep.subr.bf16.mxu0 %v6004_v42  ;;  %4788 = vmatprep.subr.bf16.mxu1 %v6011_v47 }
 0x605   :  { %4758 = vmatpush1.bf16.msra.mxu0 %v6015_v50  ;;  %4790 = vmatpush1.bf16.msra.mxu1 %v6019_v54 }
 0x606   :  { %4760 = vmatprep.subr.bf16.mxu0 %v6023_v58  ;;  %4792 = vmatprep.subr.bf16.mxu1 %v6027_v61 }
 0x609   :  { %4762 = vmatpush1.bf16.msra.mxu0 %v6034_v2  ;;  %4794 = vmatpush1.bf16.msra.mxu1 %v6038_v5 }
 0x60a   :  { %4764 = vmatprep.subr.bf16.mxu0 %v6042_v8  ;;  %4796 = vmatprep.subr.bf16.mxu1 %v6046_v11 }
 0x60d   :  { %4766 = vmatpush1.bf16.msra.mxu0 %v6053_v15  ;;  %4798 = vmatpush1.bf16.msra.mxu1 %v6057_v19 }
 0x60e   :  { %4768 = vmatprep.subr.bf16.mxu0 %v6061_v24  ;;  %4800 = vmatprep.subr.bf16.mxu1 %v6065_v28 }
 0x611   :  { %4770 = vmatpush1.bf16.msra.mxu0 %v6072_v33  ;;  %4802 = vmatpush1.bf16.msra.mxu1 %v6076_v39 }
 0x612   :  { %4772 = vmatprep.subr.bf16.mxu0 %v6080_v43  ;;  %4804 = vmatprep.subr.bf16.mxu1 %v6084_v46 }
 0x615   :  { %4774 = vmatpush1.bf16.msra.mxu0 %v6091_v52  ;;  %4806 = vmatpush1.bf16.msra.mxu1 %v6095_v56 }
 0x616   :  { %4776 = vmatprep.subr.bf16.mxu0 %v6099_v60  ;;  %4808 = vmatprep.subr.bf16.mxu1 %v6103_v1 }
 0x619   :  { %4778 = vmatpush1.bf16.msra.mxu0 %v6110_v7  ;;  %4810 = vmatpush1.bf16.msra.mxu1 %v6114_v12 }
 0x61a   :  { %4812 = vmatprep.subr.bf16.mxu0 %v6118_v18  ;;  %4876 = vmatprep.subr.bf16.mxu1 %v6122_v27 }
 0x61c   :  { %2425 = vmatmul.mubr.f32.vlgmr.msra.gmra.mrb[10].mxu0 %v2186_v48  ;;  %2496 = vmatmul.mubr.f32.vlgmr.msra.gmra.mrb[10].mxu1 %v2186_v48  ;;  %v7671_v48 = vld [vmem:[#allocation38_spill] sm:$0xff] }
 0x61d   :  { %4814 = vmatpush1.bf16.msra.mxu0 %v6126_v32  ;;  %4878 = vmatpush1.bf16.msra.mxu1 %v6130_v36 }
 0x61e   :  { %4816 = vmatprep.subr.bf16.mxu0 %v6132_v37  ;;  %4880 = vmatprep.subr.bf16.mxu1 %v6136_v45 }
 0x621   :  { %4818 = vmatpush1.bf16.msra.mxu0 %v6142_v57  ;;  %4882 = vmatpush1.bf16.msra.mxu1 %v6146_v59 }
 0x622   :  { %4820 = vmatprep.subr.bf16.mxu0 %v6148_v62  ;;  %4884 = vmatprep.subr.bf16.mxu1 %v6151_v6 }
 0x625   :  { %4822 = vmatpush1.bf16.msra.mxu0 %v7655_v55  ;;  %4886 = vmatpush1.bf16.msra.mxu1 %v7656_v3 }
 0x626   :  { %4824 = vmatprep.subr.bf16.mxu0 %v7657_v13  ;;  %4888 = vmatprep.subr.bf16.mxu1 %v7658_v10 }
 0x629   :  { %4826 = vmatpush1.bf16.msra.mxu0 %v7659_v49  ;;  %4890 = vmatpush1.bf16.msra.mxu1 %v7660_v40  ;;  %v7711_v40 = vld [vmem:[#allocation76_spill] sm:$0xff] }
 0x62a   :  { %4828 = vmatprep.subr.bf16.mxu0 %v7661_v63  ;;  %4892 = vmatprep.subr.bf16.mxu1 %v7662_v21  ;;  %v7672_v63 = vld [vmem:[#allocation39_spill] sm:$0xff]  ;;  %v7673_v21 = vld [vmem:[#allocation40_spill] sm:$0xff] }
 0x62d   :  { %4830 = vmatpush1.bf16.msra.mxu0 %v7663_v0  ;;  %4894 = vmatpush1.bf16.msra.mxu1 %v7664_v9  ;;  %v7674_v0 = vld [vmem:[#allocation41_spill] sm:$0xff]  ;;  %v7675_v9 = vld [vmem:[#allocation42_spill] sm:$0xff] }
 0x62e   :  { %4832 = vmatprep.subr.bf16.mxu0 %v7665_v51  ;;  %4896 = vmatprep.subr.bf16.mxu1 %v7666_v41  ;;  %v7676_v51 = vld [vmem:[#allocation43_spill] sm:$0xff]  ;;  %v7677_v41 = vld [vmem:[#allocation44_spill] sm:$0xff] }
 0x631   :  { %4834 = vmatpush1.bf16.msra.mxu0 %v7667_v23  ;;  %4898 = vmatpush1.bf16.msra.mxu1 %v7668_v16  ;;  %v7678_v23 = vld [vmem:[#allocation45_spill] sm:$0xff]  ;;  %v7679_v16 = vld [vmem:[#allocation46_spill] sm:$0xff] }
 0x632   :  { %4836 = vmatprep.subr.bf16.mxu0 %v7669_v14  ;;  %4900 = vmatprep.subr.bf16.mxu1 %v7670_v31  ;;  %v7680_v14 = vld [vmem:[#allocation47_spill] sm:$0xff]  ;;  %v7681_v31 = vld [vmem:[#allocation48_spill] sm:$0xff] }
 0x635   :  { %4838 = vmatpush1.bf16.msra.mxu0 %v7671_v48  ;;  %4902 = vmatpush1.bf16.msra.mxu1 %v7672_v63  ;;  %v7682_v48 = vld [vmem:[#allocation49_spill] sm:$0xff]  ;;  %v7683_v63 = vld [vmem:[#allocation50_spill] sm:$0xff] }
 0x636   :  { %4840 = vmatprep.subr.bf16.mxu0 %v7673_v21  ;;  %4904 = vmatprep.subr.bf16.mxu1 %v7674_v0  ;;  %v7684_v21 = vld [vmem:[#allocation51_spill] sm:$0xff]  ;;  %v7685_v0 = vld [vmem:[#allocation52_spill] sm:$0xff] }
 0x639   :  { %4842 = vmatpush1.bf16.msra.mxu0 %v7675_v9  ;;  %4906 = vmatpush1.bf16.msra.mxu1 %v7676_v51  ;;  %v7686_v9 = vld [vmem:[#allocation53_spill] sm:$0xff]  ;;  %v7687_v51 = vld [vmem:[#allocation54_spill] sm:$0xff] }
 0x63a   :  { %4844 = vmatprep.subr.bf16.mxu0 %v7677_v41  ;;  %4908 = vmatprep.subr.bf16.mxu1 %v7678_v23  ;;  %v7688_v41 = vld [vmem:[#allocation55_spill] sm:$0xff]  ;;  %v7689_v23 = vld [vmem:[#allocation56_spill] sm:$0xff] }
 0x63d   :  { %4846 = vmatpush1.bf16.msra.mxu0 %v7679_v16  ;;  %4910 = vmatpush1.bf16.msra.mxu1 %v7680_v14  ;;  %v7690_v16 = vld [vmem:[#allocation57_spill] sm:$0xff]  ;;  %v7691_v14 = vld [vmem:[#allocation58_spill] sm:$0xff] }
 0x63e   :  { %4848 = vmatprep.subr.bf16.mxu0 %v7681_v31  ;;  %4912 = vmatprep.subr.bf16.mxu1 %v7682_v48  ;;  %v7692_v31 = vld [vmem:[#allocation59_spill] sm:$0xff]  ;;  %v7693_v48 = vld [vmem:[#allocation60_spill] sm:$0xff] }
 0x641   :  { %4850 = vmatpush1.bf16.msra.mxu0 %v7683_v63  ;;  %4914 = vmatpush1.bf16.msra.mxu1 %v7684_v21  ;;  %v7694_v63 = vld [vmem:[#allocation61_spill] sm:$0xff]  ;;  %v7695_v21 = vld [vmem:[#allocation62_spill] sm:$0xff] }
 0x642   :  { %4852 = vmatprep.subr.bf16.mxu0 %v7685_v0  ;;  %4916 = vmatprep.subr.bf16.mxu1 %v7686_v9  ;;  %v7696_v0 = vld [vmem:[#allocation63_spill] sm:$0xff]  ;;  %v7697_v9 = vld [vmem:[#allocation64_spill] sm:$0xff] }
 0x645   :  { %4854 = vmatpush1.bf16.msra.mxu0 %v7687_v51  ;;  %4918 = vmatpush1.bf16.msra.mxu1 %v7688_v41  ;;  %v7698_v51 = vld [vmem:[#allocation65_spill] sm:$0xff]  ;;  %v7699_v41 = vld [vmem:[#allocation66_spill] sm:$0xff] }
 0x646   :  { %4856 = vmatprep.subr.bf16.mxu0 %v7689_v23  ;;  %4920 = vmatprep.subr.bf16.mxu1 %v7690_v16  ;;  %v7700_v23 = vld [vmem:[#allocation67_spill] sm:$0xff]  ;;  %v7701_v16 = vld [vmem:[#allocation68_spill] sm:$0xff] }
 0x649   :  { %4858 = vmatpush1.bf16.msra.mxu0 %v7691_v14  ;;  %4922 = vmatpush1.bf16.msra.mxu1 %v7692_v31  ;;  %v7702_v14 = vld [vmem:[#allocation69_spill] sm:$0xff]  ;;  %v7703_v31 = vld [vmem:[#allocation70_spill] sm:$0xff] }
 0x64a   :  { %4860 = vmatprep.subr.bf16.mxu0 %v7693_v48  ;;  %4924 = vmatprep.subr.bf16.mxu1 %v7694_v63  ;;  %v7704_v48 = vld [vmem:[#allocation71_spill] sm:$0xff]  ;;  %v7705_v63 = vld [vmem:[#allocation72_spill] sm:$0xff] }
 0x64d   :  { %4862 = vmatpush1.bf16.msra.mxu0 %v7695_v21  ;;  %4926 = vmatpush1.bf16.msra.mxu1 %v7696_v0  ;;  %v7706_v21 = vld [vmem:[#allocation73_spill] sm:$0xff]  ;;  %v7707_v0 = vld [vmem:[#allocation74_spill] sm:$0xff] }
 0x64e   :  { %4864 = vmatprep.subr.bf16.mxu0 %v7697_v9  ;;  %4928 = vmatprep.subr.bf16.mxu1 %v7698_v51  ;;  %v7708_v9 = vld [vmem:[#allocation75_spill] sm:$0xff]  ;;  %v7709_v51 = vld [vmem:[#allocation20_spill] sm:$0xff] }
 0x651   :  { %4866 = vmatpush1.bf16.msra.mxu0 %v7699_v41  ;;  %4930 = vmatpush1.bf16.msra.mxu1 %v7700_v23  ;;  %v7710_v41 = vld [vmem:[#allocation21_spill] sm:$0xff] }
 0x652   :  { %4868 = vmatprep.subr.bf16.mxu0 %v7701_v16  ;;  %4932 = vmatprep.subr.bf16.mxu1 %v7702_v14 }
 0x655   :  { %4870 = vmatpush1.bf16.msra.mxu0 %v7703_v31  ;;  %4934 = vmatpush1.bf16.msra.mxu1 %v7704_v48 }
 0x656   :  { %4872 = vmatprep.subr.bf16.mxu0 %v7705_v63  ;;  %4936 = vmatprep.subr.bf16.mxu1 %v7706_v21  ;;  %v7712_v21 = vld [vmem:[#allocation81_spill] sm:$0xff] }
 0x659   :  { %4874 = vmatpush1.bf16.msra.mxu0 %v7707_v0  ;;  %4938 = vmatpush1.bf16.msra.mxu1 %v7708_v9 }
 0x65a   :  { %4940 = vmatprep.subr.bf16.mxu0 %v7709_v51  ;;  %4972 = vmatprep.subr.bf16.mxu1 %v7710_v41 }
 0x6cf   :  { %v2253_v23 = vpop.f32.mrb[24].mxu0  ;;  %v2324_v16 = vpop.f32.mrb[24].mxu1 }
 0x6d0   :  { %v2254_v14 = vadd.f32 %v2253_v23, %v7711_v40  ;;  %v2255_v49 = vpop.f32.mrb[25].mxu0  ;;  %v2326_v31 = vpop.f32.mrb[25].mxu1  ;;  %v2325_v9 = vadd.f32 %v2324_v16, %v7532_v53  ;;  %v7713_v16 = vld [vmem:[#allocation77_spill] sm:$0xff] }
 0x6d1   :  { %v2256_v48 = vadd.f32 %v2255_v49, %v7530_v17  ;;  %v2327_v0 = vadd.f32 %v2326_v31, %v7712_v21 }
 0x6d2   :  { %v3651_v10 = vmul.f32 -1.442695, %v2254_v14 }
 0x6d3   :  { %v3652_v63 = vmul.f32 -1.442695, %v2256_v48  ;;  %v3653_v13 = vmul.f32 -1.442695, %v2327_v0 }
 0x6d4   :  { %5591 = vpow2.f32 %v3651_v10 }
 0x6d5   :  { %5593 = vpow2.f32 %v3652_v63 }
 0x6d6   :  { %5595 = vpow2.f32 %v3653_v13 }
 0x6d7   :  { %5597 = vtanh.f32 %v2325_v9 }
 0x6de   :  { %v5592_v51 = vpop.eup %5591 }
 0x6df   :  { %v5594_v3 = vpop.eup %5593  ;;  %v2332_v41 = vadd.f32 1.0, %v5592_v51 }
 0x6e0   :  { %v2338_v55 = vadd.f32 1.0, %v5594_v3  ;;  %v5596_v23 = vpop.eup %5595 }
 0x6e1   :  { %5599 = vrcp.f32 %v2332_v41  ;;  %v5598_v40 = vpop.eup %5597  ;;  %v2345_v10 = vadd.f32 1.0, %v5596_v23 }
 0x6e2   :  { %5601 = vrcp.f32 %v2338_v55 }
 0x6e3   :  { %5603 = vrcp.f32 %v2345_v10 }
 0x6eb   :  { %v5600_v49 = vpop.eup %5599 }
 0x6ec   :  { %v5602_v14 = vpop.eup %5601  ;;  %v2349_v48 = vmul.f32 %v5600_v49, %v5598_v40  ;;  %v7714_v40 = vld [vmem:[#allocation79_spill] sm:$0xff] }
 0x6ed   :  { %v2348_v63 = vmul.f32 %v5602_v14, %v6818_v44  ;;  %v5604_v44 = vpop.eup %5603 }
 0x6ef   :  { %v2426_v31 = vpop.f32.mrb[10].mxu0  ;;  %v2497_v0 = vpop.f32.mrb[10].mxu1  ;;  %v6932_v21 = vadd.f32 %v2349_v48, %v2348_v63 }
 0x6f0   :  { %v5381_v51 = vadd.f32 %v2426_v31, %v7713_v16  ;;  %v2428_v13 = vpop.f32.mrb[11].mxu0  ;;  %v2499_v9 = vpop.f32.mrb[11].mxu1  ;;  %v5397_v48 = vadd.f32 %v2497_v0, %v6349_v30 }
 0x6f1   :  { %v5382_v3 = vadd.f32 %v2428_v13, %v7473_v26  ;;  %5605 = vtanh.f32 %v6932_v21  ;;  %v5398_v23 = vadd.f32 %v2499_v9, %v7714_v40 }
 0x6f2   :  { %v3654_v55 = vmul.f32 -1.442695, %v5381_v51 }
 0x6f3   :  { %v3655_v41 = vmul.f32 -1.442695, %v5382_v3  ;;  %v3656_v14 = vmul.f32 -1.442695, %v5398_v23 }
 0x6f4   :  { %5607 = vpow2.f32 %v3654_v55 }
 0x6f5   :  { %5609 = vpow2.f32 %v3655_v41 }
 0x6f6   :  { %5611 = vpow2.f32 %v3656_v14 }
 0x6f7   :  { %5613 = vtanh.f32 %v5397_v48  ;;  %v7718_v48 = vld [vmem:[#allocation25_spill] sm:$0xff] }
 0x6fb   :  { %v5606_v49 = vpop.eup %5605 }
 0x6fc   :  { %v2352_v10 = vmul.f32 %v5606_v49, %v5604_v44 }
 0x6fe   :  { %v5608_v63 = vpop.eup %5607  ;;  %2594 = vmatprep.mubr.f32.mxu0 %v2352_v10  ;;  %2665 = vmatprep.mubr.f32.mxu1 %v2352_v10  ;;  %v7719_v10 = vld [vmem:[#allocation26_spill] sm:$0xff] }
 0x6ff   :  { %v5610_v31 = vpop.eup %5609  ;;  %v2509_v16 = vadd.f32 1.0, %v5608_v63  ;;  %v7720_v63 = vld [vmem:[#allocation27_spill] sm:$0xff] }
 0x700   :  { %v2515_v13 = vadd.f32 1.0, %v5610_v31  ;;  %v5612_v51 = vpop.eup %5611  ;;  %v7721_v31 = vld [vmem:[#allocation28_spill] sm:$0xff] }
 0x701   :  { %5615 = vrcp.f32 %v2509_v16  ;;  %v5614_v3 = vpop.eup %5613  ;;  %v2522_v40 = vadd.f32 1.0, %v5612_v51  ;;  %v7716_v16 = vld [vmem:[#allocation23_spill] sm:$0xff]  ;;  %v7723_v51 = vld [vmem:[#allocation30_spill] sm:$0xff] }
 0x702   :  { %5617 = vrcp.f32 %v2515_v13  ;;  %v7722_v13 = vld [vmem:[#allocation29_spill] sm:$0xff] }
 0x703   :  { %5619 = vrcp.f32 %v2522_v40  ;;  %v7717_v40 = vld [vmem:[#allocation24_spill] sm:$0xff] }
 0x70b   :  { %v5616_v55 = vpop.eup %5615 }
 0x70c   :  { %v5618_v9 = vpop.eup %5617  ;;  %v2526_v41 = vmul.f32 %v5616_v55, %v5614_v3  ;;  %v7724_v3 = vld [vmem:[#allocation31_spill] sm:$0xff]  ;;  %v7725_v55 = vld [vmem:[#allocation32_spill] sm:$0xff] }
 0x70d   :  { %v2525_v23 = vmul.f32 %v5618_v9, %v6826_v20  ;;  %v5620_v44 = vpop.eup %5619  ;;  %v7715_v20 = vld [vmem:[#allocation22_spill] sm:$0xff]  ;;  %v7726_v9 = vld [vmem:[#allocation33_spill] sm:$0xff] }
 0x70f   :  { %v6940_v0 = vadd.f32 %v2526_v41, %v2525_v23  ;;  %v7727_v41 = vld [vmem:[#allocation34_spill] sm:$0xff]  ;;  %v7728_v23 = vld [vmem:[#allocation35_spill] sm:$0xff] }
 0x711   :  { %5621 = vtanh.f32 %v6940_v0 }
 0x71b   :  { %v5622_v49 = vpop.eup %5621 }
 0x71c   :  { %v2529_v14 = vmul.f32 %v5622_v49, %v5620_v44  ;;  %v7729_v44 = vld [vmem:[#allocation36_spill] sm:$0xff]  ;;  %v7730_v49 = vld [vmem:[#allocation37_spill] sm:$0xff] }
 0x71e   :  { %2595 = vmatmul.mubr.f32.vlgmr.msra.gmra.mrb[26].mxu0 %v2529_v14  ;;  %2666 = vmatmul.mubr.f32.vlgmr.msra.gmra.mrb[26].mxu1 %v2529_v14 }
 0x71f   :  { %4942 = vmatpush1.bf16.msra.mxu0 %v5980_v22  ;;  %4974 = vmatpush1.bf16.msra.mxu1 %v5983_v25 }
 0x720   :  { %4944 = vmatprep.subr.bf16.mxu0 %v5987_v29  ;;  %4976 = vmatprep.subr.bf16.mxu1 %v5994_v34 }
 0x721   :  { %2767 = vmatprep.mubr.f32.mxu0 %v7412_v4  ;;  %2838 = vmatprep.mubr.f32.mxu1 %v7412_v4 }
 0x723   :  { %4946 = vmatpush1.bf16.msra.mxu0 %v5996_v35  ;;  %4978 = vmatpush1.bf16.msra.mxu1 %v6000_v38 }
 0x724   :  { %4948 = vmatprep.subr.bf16.mxu0 %v6004_v42  ;;  %4980 = vmatprep.subr.bf16.mxu1 %v6011_v47 }
 0x727   :  { %4950 = vmatpush1.bf16.msra.mxu0 %v6015_v50  ;;  %4982 = vmatpush1.bf16.msra.mxu1 %v6019_v54 }
 0x728   :  { %4952 = vmatprep.subr.bf16.mxu0 %v6023_v58  ;;  %4984 = vmatprep.subr.bf16.mxu1 %v6027_v61 }
 0x72b   :  { %4954 = vmatpush1.bf16.msra.mxu0 %v6034_v2  ;;  %4986 = vmatpush1.bf16.msra.mxu1 %v6038_v5 }
 0x72c   :  { %4956 = vmatprep.subr.bf16.mxu0 %v6042_v8  ;;  %4988 = vmatprep.subr.bf16.mxu1 %v6046_v11 }
 0x72f   :  { %4958 = vmatpush1.bf16.msra.mxu0 %v6053_v15  ;;  %4990 = vmatpush1.bf16.msra.mxu1 %v6057_v19 }
 0x730   :  { %4960 = vmatprep.subr.bf16.mxu0 %v6061_v24  ;;  %4992 = vmatprep.subr.bf16.mxu1 %v6065_v28 }
 0x733   :  { %4962 = vmatpush1.bf16.msra.mxu0 %v6072_v33  ;;  %4994 = vmatpush1.bf16.msra.mxu1 %v6076_v39 }
 0x734   :  { %4964 = vmatprep.subr.bf16.mxu0 %v6080_v43  ;;  %4996 = vmatprep.subr.bf16.mxu1 %v6084_v46 }
 0x737   :  { %4966 = vmatpush1.bf16.msra.mxu0 %v6091_v52  ;;  %4998 = vmatpush1.bf16.msra.mxu1 %v6095_v56 }
 0x738   :  { %4968 = vmatprep.subr.bf16.mxu0 %v6099_v60  ;;  %5000 = vmatprep.subr.bf16.mxu1 %v6103_v1 }
 0x73b   :  { %4970 = vmatpush1.bf16.msra.mxu0 %v6110_v7  ;;  %5002 = vmatpush1.bf16.msra.mxu1 %v6114_v12 }
 0x73c   :  { %5004 = vmatprep.subr.bf16.mxu0 %v6118_v18  ;;  %5068 = vmatprep.subr.bf16.mxu1 %v6122_v27 }
 0x73e   :  { %2768 = vmatmul.mubr.f32.vlgmr.msra.gmra.mrb[12].mxu0 %v2529_v14  ;;  %2839 = vmatmul.mubr.f32.vlgmr.msra.gmra.mrb[12].mxu1 %v2529_v14  ;;  %v7731_v14 = vld [vmem:[#allocation38_spill] sm:$0xff] }
 0x73f   :  { %5006 = vmatpush1.bf16.msra.mxu0 %v6126_v32  ;;  %5070 = vmatpush1.bf16.msra.mxu1 %v6130_v36 }
 0x740   :  { %5008 = vmatprep.subr.bf16.mxu0 %v6132_v37  ;;  %5072 = vmatprep.subr.bf16.mxu1 %v6136_v45 }
 0x743   :  { %5010 = vmatpush1.bf16.msra.mxu0 %v6142_v57  ;;  %5074 = vmatpush1.bf16.msra.mxu1 %v6146_v59 }
 0x744   :  { %5012 = vmatprep.subr.bf16.mxu0 %v6148_v62  ;;  %5076 = vmatprep.subr.bf16.mxu1 %v6151_v6 }
 0x747   :  { %5014 = vmatpush1.bf16.msra.mxu0 %v7715_v20  ;;  %5078 = vmatpush1.bf16.msra.mxu1 %v7716_v16 }
 0x748   :  { %5016 = vmatprep.subr.bf16.mxu0 %v7717_v40  ;;  %5080 = vmatprep.subr.bf16.mxu1 %v7718_v48 }
 0x74b   :  { %5018 = vmatpush1.bf16.msra.mxu0 %v7719_v10  ;;  %5082 = vmatpush1.bf16.msra.mxu1 %v7720_v63  ;;  %v7771_v63 = vld [vmem:[#allocation76_spill] sm:$0xff] }
 0x74c   :  { %5020 = vmatprep.subr.bf16.mxu0 %v7721_v31  ;;  %5084 = vmatprep.subr.bf16.mxu1 %v7722_v13  ;;  %v7732_v31 = vld [vmem:[#allocation39_spill] sm:$0xff]  ;;  %v7733_v13 = vld [vmem:[#allocation40_spill] sm:$0xff] }
 0x74f   :  { %5022 = vmatpush1.bf16.msra.mxu0 %v7723_v51  ;;  %5086 = vmatpush1.bf16.msra.mxu1 %v7724_v3  ;;  %v7734_v51 = vld [vmem:[#allocation41_spill] sm:$0xff]  ;;  %v7735_v3 = vld [vmem:[#allocation42_spill] sm:$0xff] }
 0x750   :  { %5024 = vmatprep.subr.bf16.mxu0 %v7725_v55  ;;  %5088 = vmatprep.subr.bf16.mxu1 %v7726_v9  ;;  %v7736_v55 = vld [vmem:[#allocation43_spill] sm:$0xff]  ;;  %v7737_v9 = vld [vmem:[#allocation44_spill] sm:$0xff] }
 0x753   :  { %5026 = vmatpush1.bf16.msra.mxu0 %v7727_v41  ;;  %5090 = vmatpush1.bf16.msra.mxu1 %v7728_v23  ;;  %v7738_v41 = vld [vmem:[#allocation45_spill] sm:$0xff]  ;;  %v7739_v23 = vld [vmem:[#allocation46_spill] sm:$0xff] }
 0x754   :  { %5028 = vmatprep.subr.bf16.mxu0 %v7729_v44  ;;  %5092 = vmatprep.subr.bf16.mxu1 %v7730_v49  ;;  %v7740_v44 = vld [vmem:[#allocation47_spill] sm:$0xff]  ;;  %v7741_v49 = vld [vmem:[#allocation48_spill] sm:$0xff] }
 0x757   :  { %5030 = vmatpush1.bf16.msra.mxu0 %v7731_v14  ;;  %5094 = vmatpush1.bf16.msra.mxu1 %v7732_v31  ;;  %v7742_v14 = vld [vmem:[#allocation49_spill] sm:$0xff]  ;;  %v7743_v31 = vld [vmem:[#allocation50_spill] sm:$0xff] }
 0x758   :  { %5032 = vmatprep.subr.bf16.mxu0 %v7733_v13  ;;  %5096 = vmatprep.subr.bf16.mxu1 %v7734_v51  ;;  %v7744_v13 = vld [vmem:[#allocation51_spill] sm:$0xff]  ;;  %v7745_v51 = vld [vmem:[#allocation52_spill] sm:$0xff] }
 0x75b   :  { %5034 = vmatpush1.bf16.msra.mxu0 %v7735_v3  ;;  %5098 = vmatpush1.bf16.msra.mxu1 %v7736_v55  ;;  %v7746_v3 = vld [vmem:[#allocation53_spill] sm:$0xff]  ;;  %v7747_v55 = vld [vmem:[#allocation54_spill] sm:$0xff] }
 0x75c   :  { %5036 = vmatprep.subr.bf16.mxu0 %v7737_v9  ;;  %5100 = vmatprep.subr.bf16.mxu1 %v7738_v41  ;;  %v7748_v9 = vld [vmem:[#allocation55_spill] sm:$0xff]  ;;  %v7749_v41 = vld [vmem:[#allocation56_spill] sm:$0xff] }
 0x75f   :  { %5038 = vmatpush1.bf16.msra.mxu0 %v7739_v23  ;;  %5102 = vmatpush1.bf16.msra.mxu1 %v7740_v44  ;;  %v7750_v23 = vld [vmem:[#allocation57_spill] sm:$0xff]  ;;  %v7751_v44 = vld [vmem:[#allocation58_spill] sm:$0xff] }
 0x760   :  { %5040 = vmatprep.subr.bf16.mxu0 %v7741_v49  ;;  %5104 = vmatprep.subr.bf16.mxu1 %v7742_v14  ;;  %v7752_v49 = vld [vmem:[#allocation59_spill] sm:$0xff]  ;;  %v7753_v14 = vld [vmem:[#allocation60_spill] sm:$0xff] }
 0x763   :  { %5042 = vmatpush1.bf16.msra.mxu0 %v7743_v31  ;;  %5106 = vmatpush1.bf16.msra.mxu1 %v7744_v13  ;;  %v7754_v31 = vld [vmem:[#allocation61_spill] sm:$0xff]  ;;  %v7755_v13 = vld [vmem:[#allocation62_spill] sm:$0xff] }
 0x764   :  { %5044 = vmatprep.subr.bf16.mxu0 %v7745_v51  ;;  %5108 = vmatprep.subr.bf16.mxu1 %v7746_v3  ;;  %v7756_v51 = vld [vmem:[#allocation63_spill] sm:$0xff]  ;;  %v7757_v3 = vld [vmem:[#allocation64_spill] sm:$0xff] }
 0x767   :  { %5046 = vmatpush1.bf16.msra.mxu0 %v7747_v55  ;;  %5110 = vmatpush1.bf16.msra.mxu1 %v7748_v9  ;;  %v7758_v55 = vld [vmem:[#allocation65_spill] sm:$0xff]  ;;  %v7759_v9 = vld [vmem:[#allocation66_spill] sm:$0xff] }
 0x768   :  { %5048 = vmatprep.subr.bf16.mxu0 %v7749_v41  ;;  %5112 = vmatprep.subr.bf16.mxu1 %v7750_v23  ;;  %v7760_v41 = vld [vmem:[#allocation67_spill] sm:$0xff]  ;;  %v7761_v23 = vld [vmem:[#allocation68_spill] sm:$0xff] }
 0x76b   :  { %5050 = vmatpush1.bf16.msra.mxu0 %v7751_v44  ;;  %5114 = vmatpush1.bf16.msra.mxu1 %v7752_v49  ;;  %v7762_v44 = vld [vmem:[#allocation69_spill] sm:$0xff]  ;;  %v7763_v49 = vld [vmem:[#allocation70_spill] sm:$0xff] }
 0x76c   :  { %5052 = vmatprep.subr.bf16.mxu0 %v7753_v14  ;;  %5116 = vmatprep.subr.bf16.mxu1 %v7754_v31  ;;  %v7764_v14 = vld [vmem:[#allocation71_spill] sm:$0xff]  ;;  %v7765_v31 = vld [vmem:[#allocation72_spill] sm:$0xff] }
 0x76f   :  { %5054 = vmatpush1.bf16.msra.mxu0 %v7755_v13  ;;  %5118 = vmatpush1.bf16.msra.mxu1 %v7756_v51  ;;  %v7766_v13 = vld [vmem:[#allocation73_spill] sm:$0xff]  ;;  %v7767_v51 = vld [vmem:[#allocation74_spill] sm:$0xff] }
 0x770   :  { %5056 = vmatprep.subr.bf16.mxu0 %v7757_v3  ;;  %5120 = vmatprep.subr.bf16.mxu1 %v7758_v55  ;;  %v7768_v3 = vld [vmem:[#allocation75_spill] sm:$0xff]  ;;  %v7769_v55 = vld [vmem:[#allocation20_spill] sm:$0xff] }
 0x773   :  { %5058 = vmatpush1.bf16.msra.mxu0 %v7759_v9  ;;  %5122 = vmatpush1.bf16.msra.mxu1 %v7760_v41  ;;  %v7770_v9 = vld [vmem:[#allocation21_spill] sm:$0xff] }
 0x774   :  { %5060 = vmatprep.subr.bf16.mxu0 %v7761_v23  ;;  %5124 = vmatprep.subr.bf16.mxu1 %v7762_v44 }
 0x777   :  { %5062 = vmatpush1.bf16.msra.mxu0 %v7763_v49  ;;  %5126 = vmatpush1.bf16.msra.mxu1 %v7764_v14 }
 0x778   :  { %5064 = vmatprep.subr.bf16.mxu0 %v7765_v31  ;;  %5128 = vmatprep.subr.bf16.mxu1 %v7766_v13  ;;  %v7772_v13 = vld [vmem:[#allocation81_spill] sm:$0xff] }
 0x77b   :  { %5066 = vmatpush1.bf16.msra.mxu0 %v7767_v51  ;;  %5130 = vmatpush1.bf16.msra.mxu1 %v7768_v3 }
 0x77c   :  { %5132 = vmatprep.subr.bf16.mxu0 %v7769_v55  ;;  %5164 = vmatprep.subr.bf16.mxu1 %v7770_v9 }
 0x7f1   :  { %v2596_v41 = vpop.f32.mrb[26].mxu0  ;;  %v2667_v23 = vpop.f32.mrb[26].mxu1 }
 0x7f2   :  { %v2597_v44 = vadd.f32 %v2596_v41, %v7771_v63  ;;  %v2598_v10 = vpop.f32.mrb[27].mxu0  ;;  %v2669_v49 = vpop.f32.mrb[27].mxu1  ;;  %v2668_v3 = vadd.f32 %v2667_v23, %v7532_v53  ;;  %v7773_v23 = vld [vmem:[#allocation77_spill] sm:$0xff] }
 0x7f3   :  { %v2599_v14 = vadd.f32 %v2598_v10, %v7530_v17  ;;  %v2670_v51 = vadd.f32 %v2669_v49, %v7772_v13 }
 0x7f4   :  { %v3657_v48 = vmul.f32 -1.442695, %v2597_v44 }
 0x7f5   :  { %v3658_v31 = vmul.f32 -1.442695, %v2599_v14  ;;  %v3659_v40 = vmul.f32 -1.442695, %v2670_v51 }
 0x7f6   :  { %5623 = vpow2.f32 %v3657_v48 }
 0x7f7   :  { %5625 = vpow2.f32 %v3658_v31 }
 0x7f8   :  { %5627 = vpow2.f32 %v3659_v40 }
 0x7f9   :  { %5629 = vtanh.f32 %v2668_v3 }
 0x800   :  { %v5624_v55 = vpop.eup %5623 }
 0x801   :  { %v5626_v16 = vpop.eup %5625  ;;  %v2675_v9 = vadd.f32 1.0, %v5624_v55 }
 0x802   :  { %v2681_v20 = vadd.f32 1.0, %v5626_v16  ;;  %v5628_v41 = vpop.eup %5627 }
 0x803   :  { %5631 = vrcp.f32 %v2675_v9  ;;  %v5630_v63 = vpop.eup %5629  ;;  %v2688_v48 = vadd.f32 1.0, %v5628_v41 }
 0x804   :  { %5633 = vrcp.f32 %v2681_v20 }
 0x805   :  { %5635 = vrcp.f32 %v2688_v48 }
 0x80d   :  { %v5632_v10 = vpop.eup %5631 }
 0x80e   :  { %v5634_v44 = vpop.eup %5633  ;;  %v2692_v14 = vmul.f32 %v5632_v10, %v5630_v63  ;;  %v7774_v63 = vld [vmem:[#allocation79_spill] sm:$0xff] }
 0x80f   :  { %v2691_v31 = vmul.f32 %v5634_v44, %v6932_v21  ;;  %v5636_v21 = vpop.eup %5635 }
 0x811   :  { %v2769_v49 = vpop.f32.mrb[12].mxu0  ;;  %v2840_v51 = vpop.f32.mrb[12].mxu1  ;;  %v7046_v13 = vadd.f32 %v2692_v14, %v2691_v31 }
 0x812   :  { %v5383_v55 = vadd.f32 %v2769_v49, %v7773_v23  ;;  %v2771_v40 = vpop.f32.mrb[13].mxu0  ;;  %v2842_v3 = vpop.f32.mrb[13].mxu1  ;;  %v5399_v14 = vadd.f32 %v2840_v51, %v6349_v30 }
 0x813   :  { %v5384_v16 = vadd.f32 %v2771_v40, %v7473_v26  ;;  %5637 = vtanh.f32 %v7046_v13  ;;  %v5400_v41 = vadd.f32 %v2842_v3, %v7774_v63 }
 0x814   :  { %v3660_v20 = vmul.f32 -1.442695, %v5383_v55 }
 0x815   :  { %v3661_v9 = vmul.f32 -1.442695, %v5384_v16  ;;  %v3662_v44 = vmul.f32 -1.442695, %v5400_v41 }
 0x816   :  { %5639 = vpow2.f32 %v3660_v20 }
 0x817   :  { %5641 = vpow2.f32 %v3661_v9 }
 0x818   :  { %5643 = vpow2.f32 %v3662_v44 }
 0x819   :  { %5645 = vtanh.f32 %v5399_v14  ;;  %v7818_v14 = vld [vmem:[#allocation65_spill] sm:$0xff] }
 0x81d   :  { %v5638_v10 = vpop.eup %5637 }
 0x81e   :  { %v2695_v48 = vmul.f32 %v5638_v10, %v5636_v21 }
 0x820   :  { %v5640_v31 = vpop.eup %5639  ;;  %2937 = vmatprep.mubr.f32.mxu0 %v2695_v48  ;;  %3008 = vmatprep.mubr.f32.mxu1 %v2695_v48  ;;  %v7819_v48 = vld [vmem:[#allocation66_spill] sm:$0xff] }
 0x821   :  { %v5642_v49 = vpop.eup %5641  ;;  %v2852_v23 = vadd.f32 1.0, %v5640_v31  ;;  %v7820_v31 = vld [vmem:[#allocation67_spill] sm:$0xff] }
 0x822   :  { %v2858_v40 = vadd.f32 1.0, %v5642_v49  ;;  %v5644_v55 = vpop.eup %5643  ;;  %v7821_v49 = vld [vmem:[#allocation68_spill] sm:$0xff] }
 0x823   :  { %5647 = vrcp.f32 %v2852_v23  ;;  %v5646_v16 = vpop.eup %5645  ;;  %v2865_v63 = vadd.f32 1.0, %v5644_v55  ;;  %v7816_v23 = vld [vmem:[#allocation63_spill] sm:$0xff]  ;;  %v7823_v55 = vld [vmem:[#allocation70_spill] sm:$0xff] }
 0x824   :  { %5649 = vrcp.f32 %v2858_v40  ;;  %v7822_v40 = vld [vmem:[#allocation69_spill] sm:$0xff] }
 0x825   :  { %5651 = vrcp.f32 %v2865_v63  ;;  %v7817_v63 = vld [vmem:[#allocation64_spill] sm:$0xff] }
 0x82d   :  { %v5648_v20 = vpop.eup %5647 }
 0x82e   :  { %v5650_v3 = vpop.eup %5649  ;;  %v2869_v9 = vmul.f32 %v5648_v20, %v5646_v16  ;;  %v7824_v16 = vld [vmem:[#allocation71_spill] sm:$0xff]  ;;  %v7825_v20 = vld [vmem:[#allocation72_spill] sm:$0xff] }
 0x82f   :  { %v2868_v41 = vmul.f32 %v5650_v3, %v6940_v0  ;;  %v5652_v21 = vpop.eup %5651  ;;  %v7815_v0 = vld [vmem:[#allocation62_spill] sm:$0xff]  ;;  %v7826_v3 = vld [vmem:[#allocation73_spill] sm:$0xff] }
 0x831   :  { %v7054_v51 = vadd.f32 %v2869_v9, %v2868_v41  ;;  %v7827_v9 = vld [vmem:[#allocation74_spill] sm:$0xff]  ;;  %v7828_v41 = vld [vmem:[#allocation75_spill] sm:$0xff] }
 0x833   :  { %5653 = vtanh.f32 %v7054_v51 }
 0x83d   :  { %v5654_v10 = vpop.eup %5653 }
 0x83e   :  { %v2872_v44 = vmul.f32 %v5654_v10, %v5652_v21 }
 0x840   :  { %2938 = vmatmul.mubr.f32.vlgmr.msra.gmra.mrb[28].mxu0 %v2872_v44  ;;  %3009 = vmatmul.mubr.f32.vlgmr.msra.gmra.mrb[28].mxu1 %v2872_v44 }
 0x841   :  { %5134 = vmatpush1.bf16.msra.mxu0 %v5980_v22  ;;  %5166 = vmatpush1.bf16.msra.mxu1 %v5983_v25  ;;  %v7775_v22 = vld [vmem:[#allocation22_spill] sm:$0xff]  ;;  %v7776_v25 = vld [vmem:[#allocation23_spill] sm:$0xff] }
 0x842   :  { %5136 = vmatprep.subr.bf16.mxu0 %v5987_v29  ;;  %5168 = vmatprep.subr.bf16.mxu1 %v5994_v34  ;;  %v7777_v29 = vld [vmem:[#allocation24_spill] sm:$0xff]  ;;  %v7778_v34 = vld [vmem:[#allocation25_spill] sm:$0xff] }
 0x843   :  { %3110 = vmatprep.mubr.f32.mxu0 %v7412_v4  ;;  %3181 = vmatprep.mubr.f32.mxu1 %v7412_v4 }
 0x845   :  { %5138 = vmatpush1.bf16.msra.mxu0 %v5996_v35  ;;  %5170 = vmatpush1.bf16.msra.mxu1 %v6000_v38  ;;  %v7779_v35 = vld [vmem:[#allocation26_spill] sm:$0xff]  ;;  %v7780_v38 = vld [vmem:[#allocation27_spill] sm:$0xff] }
 0x846   :  { %5140 = vmatprep.subr.bf16.mxu0 %v6004_v42  ;;  %5172 = vmatprep.subr.bf16.mxu1 %v6011_v47  ;;  %v7781_v42 = vld [vmem:[#allocation28_spill] sm:$0xff]  ;;  %v7782_v47 = vld [vmem:[#allocation29_spill] sm:$0xff] }
 0x849   :  { %5142 = vmatpush1.bf16.msra.mxu0 %v6015_v50  ;;  %5174 = vmatpush1.bf16.msra.mxu1 %v6019_v54  ;;  %v7783_v50 = vld [vmem:[#allocation30_spill] sm:$0xff]  ;;  %v7784_v54 = vld [vmem:[#allocation31_spill] sm:$0xff] }
 0x84a   :  { %5144 = vmatprep.subr.bf16.mxu0 %v6023_v58  ;;  %5176 = vmatprep.subr.bf16.mxu1 %v6027_v61  ;;  %v7785_v58 = vld [vmem:[#allocation32_spill] sm:$0xff]  ;;  %v7786_v61 = vld [vmem:[#allocation33_spill] sm:$0xff] }
 0x84d   :  { %5146 = vmatpush1.bf16.msra.mxu0 %v6034_v2  ;;  %5178 = vmatpush1.bf16.msra.mxu1 %v6038_v5  ;;  %v7787_v2 = vld [vmem:[#allocation34_spill] sm:$0xff]  ;;  %v7788_v5 = vld [vmem:[#allocation35_spill] sm:$0xff] }
 0x84e   :  { %5148 = vmatprep.subr.bf16.mxu0 %v6042_v8  ;;  %5180 = vmatprep.subr.bf16.mxu1 %v6046_v11  ;;  %v7789_v8 = vld [vmem:[#allocation36_spill] sm:$0xff]  ;;  %v7790_v11 = vld [vmem:[#allocation37_spill] sm:$0xff] }
 0x851   :  { %5150 = vmatpush1.bf16.msra.mxu0 %v6053_v15  ;;  %5182 = vmatpush1.bf16.msra.mxu1 %v6057_v19  ;;  %v7791_v15 = vld [vmem:[#allocation38_spill] sm:$0xff]  ;;  %v7792_v19 = vld [vmem:[#allocation39_spill] sm:$0xff] }
 0x852   :  { %5152 = vmatprep.subr.bf16.mxu0 %v6061_v24  ;;  %5184 = vmatprep.subr.bf16.mxu1 %v6065_v28  ;;  %v7793_v24 = vld [vmem:[#allocation40_spill] sm:$0xff]  ;;  %v7794_v28 = vld [vmem:[#allocation41_spill] sm:$0xff] }
 0x855   :  { %5154 = vmatpush1.bf16.msra.mxu0 %v6072_v33  ;;  %5186 = vmatpush1.bf16.msra.mxu1 %v6076_v39  ;;  %v7795_v33 = vld [vmem:[#allocation42_spill] sm:$0xff]  ;;  %v7796_v39 = vld [vmem:[#allocation43_spill] sm:$0xff] }
 0x856   :  { %5156 = vmatprep.subr.bf16.mxu0 %v6080_v43  ;;  %5188 = vmatprep.subr.bf16.mxu1 %v6084_v46  ;;  %v7797_v43 = vld [vmem:[#allocation44_spill] sm:$0xff]  ;;  %v7798_v46 = vld [vmem:[#allocation45_spill] sm:$0xff] }
 0x859   :  { %5158 = vmatpush1.bf16.msra.mxu0 %v6091_v52  ;;  %5190 = vmatpush1.bf16.msra.mxu1 %v6095_v56  ;;  %v7799_v52 = vld [vmem:[#allocation46_spill] sm:$0xff]  ;;  %v7800_v56 = vld [vmem:[#allocation47_spill] sm:$0xff] }
 0x85a   :  { %5160 = vmatprep.subr.bf16.mxu0 %v6099_v60  ;;  %5192 = vmatprep.subr.bf16.mxu1 %v6103_v1  ;;  %v7801_v60 = vld [vmem:[#allocation48_spill] sm:$0xff]  ;;  %v7802_v1 = vld [vmem:[#allocation49_spill] sm:$0xff] }
 0x85d   :  { %5162 = vmatpush1.bf16.msra.mxu0 %v6110_v7  ;;  %5194 = vmatpush1.bf16.msra.mxu1 %v6114_v12  ;;  %v7803_v7 = vld [vmem:[#allocation50_spill] sm:$0xff]  ;;  %v7804_v12 = vld [vmem:[#allocation51_spill] sm:$0xff] }
 0x85e   :  { %5196 = vmatprep.subr.bf16.mxu0 %v6118_v18  ;;  %5260 = vmatprep.subr.bf16.mxu1 %v6122_v27  ;;  %v7805_v18 = vld [vmem:[#allocation52_spill] sm:$0xff]  ;;  %v7806_v27 = vld [vmem:[#allocation53_spill] sm:$0xff] }
 0x860   :  { %3111 = vmatmul.mubr.f32.vlgmr.msra.gmra.mrb[14].mxu0 %v2872_v44  ;;  %3182 = vmatmul.mubr.f32.vlgmr.msra.gmra.mrb[14].mxu1 %v2872_v44  ;;  %v7829_v44 = vld [vmem:[#allocation76_spill] sm:$0xff] }
 0x861   :  { %5198 = vmatpush1.bf16.msra.mxu0 %v6126_v32  ;;  %5262 = vmatpush1.bf16.msra.mxu1 %v6130_v36  ;;  %v7807_v32 = vld [vmem:[#allocation54_spill] sm:$0xff]  ;;  %v7808_v36 = vld [vmem:[#allocation55_spill] sm:$0xff] }
 0x862   :  { %5200 = vmatprep.subr.bf16.mxu0 %v6132_v37  ;;  %5264 = vmatprep.subr.bf16.mxu1 %v6136_v45  ;;  %v7809_v37 = vld [vmem:[#allocation56_spill] sm:$0xff]  ;;  %v7810_v45 = vld [vmem:[#allocation57_spill] sm:$0xff] }
 0x865   :  { %5202 = vmatpush1.bf16.msra.mxu0 %v6142_v57  ;;  %5266 = vmatpush1.bf16.msra.mxu1 %v6146_v59  ;;  %v7811_v57 = vld [vmem:[#allocation58_spill] sm:$0xff]  ;;  %v7812_v59 = vld [vmem:[#allocation59_spill] sm:$0xff] }
 0x866   :  { %5204 = vmatprep.subr.bf16.mxu0 %v6148_v62  ;;  %5268 = vmatprep.subr.bf16.mxu1 %v6151_v6  ;;  %v7813_v62 = vld [vmem:[#allocation60_spill] sm:$0xff]  ;;  %v7814_v6 = vld [vmem:[#allocation61_spill] sm:$0xff] }
 0x869   :  { %5206 = vmatpush1.bf16.msra.mxu0 %v7775_v22  ;;  %5270 = vmatpush1.bf16.msra.mxu1 %v7776_v25 }
 0x86a   :  { %5208 = vmatprep.subr.bf16.mxu0 %v7777_v29  ;;  %5272 = vmatprep.subr.bf16.mxu1 %v7778_v34 }
 0x86d   :  { %5210 = vmatpush1.bf16.msra.mxu0 %v7779_v35  ;;  %5274 = vmatpush1.bf16.msra.mxu1 %v7780_v38 }
 0x86e   :  { %5212 = vmatprep.subr.bf16.mxu0 %v7781_v42  ;;  %5276 = vmatprep.subr.bf16.mxu1 %v7782_v47  ;;  %v7830_v42 = vld [vmem:[#allocation81_spill] sm:$0xff] }
 0x871   :  { %5214 = vmatpush1.bf16.msra.mxu0 %v7783_v50  ;;  %5278 = vmatpush1.bf16.msra.mxu1 %v7784_v54 }
 0x872   :  { %5216 = vmatprep.subr.bf16.mxu0 %v7785_v58  ;;  %5280 = vmatprep.subr.bf16.mxu1 %v7786_v61 }
 0x875   :  { %5218 = vmatpush1.bf16.msra.mxu0 %v7787_v2  ;;  %5282 = vmatpush1.bf16.msra.mxu1 %v7788_v5 }
 0x876   :  { %5220 = vmatprep.subr.bf16.mxu0 %v7789_v8  ;;  %5284 = vmatprep.subr.bf16.mxu1 %v7790_v11 }
 0x879   :  { %5222 = vmatpush1.bf16.msra.mxu0 %v7791_v15  ;;  %5286 = vmatpush1.bf16.msra.mxu1 %v7792_v19 }
 0x87a   :  { %5224 = vmatprep.subr.bf16.mxu0 %v7793_v24  ;;  %5288 = vmatprep.subr.bf16.mxu1 %v7794_v28 }
 0x87d   :  { %5226 = vmatpush1.bf16.msra.mxu0 %v7795_v33  ;;  %5290 = vmatpush1.bf16.msra.mxu1 %v7796_v39 }
 0x87e   :  { %5228 = vmatprep.subr.bf16.mxu0 %v7797_v43  ;;  %5292 = vmatprep.subr.bf16.mxu1 %v7798_v46 }
 0x881   :  { %5230 = vmatpush1.bf16.msra.mxu0 %v7799_v52  ;;  %5294 = vmatpush1.bf16.msra.mxu1 %v7800_v56  ;;  %v7831_v52 = vld [vmem:[#allocation77_spill] sm:$0xff] }
 0x882   :  { %5232 = vmatprep.subr.bf16.mxu0 %v7801_v60  ;;  %5296 = vmatprep.subr.bf16.mxu1 %v7802_v1 }
 0x885   :  { %5234 = vmatpush1.bf16.msra.mxu0 %v7803_v7  ;;  %5298 = vmatpush1.bf16.msra.mxu1 %v7804_v12 }
 0x886   :  { %5236 = vmatprep.subr.bf16.mxu0 %v7805_v18  ;;  %5300 = vmatprep.subr.bf16.mxu1 %v7806_v27  ;;  %v7832_v27 = vld [vmem:[#allocation79_spill] sm:$0xff] }
 0x889   :  { %5238 = vmatpush1.bf16.msra.mxu0 %v7807_v32  ;;  %5302 = vmatpush1.bf16.msra.mxu1 %v7808_v36 }
 0x88a   :  { %5240 = vmatprep.subr.bf16.mxu0 %v7809_v37  ;;  %5304 = vmatprep.subr.bf16.mxu1 %v7810_v45 }
 0x88d   :  { %5242 = vmatpush1.bf16.msra.mxu0 %v7811_v57  ;;  %5306 = vmatpush1.bf16.msra.mxu1 %v7812_v59 }
 0x88e   :  { %5244 = vmatprep.subr.bf16.mxu0 %v7813_v62  ;;  %5308 = vmatprep.subr.bf16.mxu1 %v7814_v6 }
 0x891   :  { %5246 = vmatpush1.bf16.msra.mxu0 %v7815_v0  ;;  %5310 = vmatpush1.bf16.msra.mxu1 %v7816_v23 }
 0x892   :  { %5248 = vmatprep.subr.bf16.mxu0 %v7817_v63  ;;  %5312 = vmatprep.subr.bf16.mxu1 %v7818_v14 }
 0x895   :  { %5250 = vmatpush1.bf16.msra.mxu0 %v7819_v48  ;;  %5314 = vmatpush1.bf16.msra.mxu1 %v7820_v31 }
 0x896   :  { %5252 = vmatprep.subr.bf16.mxu0 %v7821_v49  ;;  %5316 = vmatprep.subr.bf16.mxu1 %v7822_v40 }
 0x899   :  { %5254 = vmatpush1.bf16.msra.mxu0 %v7823_v55  ;;  %5318 = vmatpush1.bf16.msra.mxu1 %v7824_v16 }
 0x89a   :  { %5256 = vmatprep.subr.bf16.mxu0 %v7825_v20  ;;  %5320 = vmatprep.subr.bf16.mxu1 %v7826_v3  ;;  %v3390_v20 = vld [vmem:[#allocation12] sm:$0xff]  ;;  %v3391_v3 = vld [vmem:[#allocation12 + $0x8] sm:$0xff] }
 0x89d   :  { %5258 = vmatpush1.bf16.msra.mxu0 %v7827_v9  ;;  %5322 = vmatpush1.bf16.msra.mxu1 %v7828_v41  ;;  %v5324_v9 = vpack.c.bf16 %v3391_v3, %v3390_v20  ;;  %v5834_v41 = vmov 0.0|0.0  }
 0x89e   :  { %5323 = vmatprep.subr.bf16.mxu0 %v5834_v41  ;;  %5347 = vmatprep.subr.bf16.mxu1 %v5834_v41 }
 0x913   :  { %v2939_v21 = vpop.f32.mrb[28].mxu0  ;;  %v3010_v10 = vpop.f32.mrb[28].mxu1 }
 0x914   :  { %v2940_v22 = vadd.f32 %v2939_v21, %v7829_v44  ;;  %v2941_v25 = vpop.f32.mrb[29].mxu0  ;;  %v3012_v29 = vpop.f32.mrb[29].mxu1  ;;  %v3011_v54 = vadd.f32 %v3010_v10, %v7532_v53  ;;  %v3393_v21 = vld [vmem:[#allocation12 + $0x18] sm:$0xff] }
 0x915   :  { %v2942_v34 = vadd.f32 %v2941_v25, %v7530_v17  ;;  %v3013_v47 = vadd.f32 %v3012_v29, %v7830_v42  ;;  %v3395_v25 = vld [vmem:[#allocation12 + $0x28] sm:$0xff] }
 0x916   :  { %v3663_v35 = vmul.f32 -1.442695, %v2940_v22  ;;  %v3394_v22 = vld [vmem:[#allocation12 + $0x20] sm:$0xff] }
 0x917   :  { %v3664_v38 = vmul.f32 -1.442695, %v2942_v34  ;;  %v3665_v50 = vmul.f32 -1.442695, %v3013_v47  ;;  %v5330_v29 = vpack.c.bf16 %v3395_v25, %v3394_v22  ;;  %v3396_v34 = vld [vmem:[#allocation12 + $0x30] sm:$0xff]  ;;  %v3398_v47 = vld [vmem:[#allocation12 + $0x40] sm:$0xff] }
 0x918   :  { %5655 = vpow2.f32 %v3663_v35  ;;  %v3397_v35 = vld [vmem:[#allocation12 + $0x38] sm:$0xff] }
 0x919   :  { %5657 = vpow2.f32 %v3664_v38  ;;  %v5333_v38 = vpack.c.bf16 %v3397_v35, %v3396_v34  ;;  %v3499_v34 = vld [vmem:[#allocation13 + $0x78] sm:$0xff] }
 0x91a   :  { %5659 = vpow2.f32 %v3665_v50  ;;  %v3399_v50 = vld [vmem:[#allocation12 + $0x48] sm:$0xff] }
 0x91b   :  { %5661 = vtanh.f32 %v3011_v54  ;;  %v5336_v54 = vpack.c.bf16 %v3399_v50, %v3398_v47 }
 0x922   :  { %v5656_v58 = vpop.eup %5655 }
 0x923   :  { %v5658_v61 = vpop.eup %5657  ;;  %v3018_v2 = vadd.f32 1.0, %v5656_v58  ;;  %v3400_v58 = vld [vmem:[#allocation12 + $0x50] sm:$0xff] }
 0x924   :  { %v3024_v5 = vadd.f32 1.0, %v5658_v61  ;;  %v5660_v8 = vpop.eup %5659  ;;  %v3401_v61 = vld [vmem:[#allocation12 + $0x58] sm:$0xff] }
 0x925   :  { %5663 = vrcp.f32 %v3018_v2  ;;  %v5662_v11 = vpop.eup %5661  ;;  %v3031_v28 = vadd.f32 1.0, %v5660_v8  ;;  %v3402_v2 = vld [vmem:[#allocation12 + $0x60] sm:$0xff]  ;;  %v3403_v8 = vld [vmem:[#allocation12 + $0x68] sm:$0xff] }
 0x926   :  { %5665 = vrcp.f32 %v3024_v5  ;;  %v5339_v5 = vpack.c.bf16 %v3401_v61, %v3400_v58 }
 0x927   :  { %5667 = vrcp.f32 %v3031_v28  ;;  %v3484_v28 = vld [vmem:[#allocation13] sm:$0xff] }
 0x92f   :  { %v5664_v15 = vpop.eup %5663 }
 0x930   :  { %v5666_v19 = vpop.eup %5665  ;;  %v3035_v24 = vmul.f32 %v5664_v15, %v5662_v11  ;;  %v5342_v11 = vpack.c.bf16 %v3403_v8, %v3402_v2  ;;  %v3404_v15 = vld [vmem:[#allocation12 + $0x70] sm:$0xff] }
 0x931   :  { %v3034_v33 = vmul.f32 %v5666_v19, %v7046_v13  ;;  %v5668_v13 = vpop.eup %5667  ;;  %v3405_v19 = vld [vmem:[#allocation12 + $0x78] sm:$0xff] }
 0x933   :  { %v3112_v39 = vpop.f32.mrb[14].mxu0  ;;  %v3183_v43 = vpop.f32.mrb[14].mxu1  ;;  %v7158_v46 = vadd.f32 %v3035_v24, %v3034_v33  ;;  %v5345_v24 = vpack.c.bf16 %v3405_v19, %v3404_v15  ;;  %v3485_v33 = vld [vmem:[#allocation13 + $0x8] sm:$0xff] }
 0x934   :  { %v5385_v56 = vadd.f32 %v3112_v39, %v7831_v52  ;;  %v3114_v60 = vpop.f32.mrb[15].mxu0  ;;  %v3185_v1 = vpop.f32.mrb[15].mxu1  ;;  %v5401_v45 = vadd.f32 %v3183_v43, %v6349_v30  ;;  %v3486_v39 = vld [vmem:[#allocation13 + $0x10] sm:$0xff]  ;;  %v5348_v43 = vpack.c.bf16 %v3485_v33, %v3484_v28  ;;  %v3487_v52 = vld [vmem:[#allocation13 + $0x18] sm:$0xff] }
 0x935   :  { %v5386_v7 = vadd.f32 %v3114_v60, %v7473_v26  ;;  %5669 = vtanh.f32 %v7158_v46  ;;  %v5402_v32 = vadd.f32 %v3185_v1, %v7832_v27  ;;  %v3489_v60 = vld [vmem:[#allocation13 + $0x28] sm:$0xff]  ;;  %v3492_v27 = vld [vmem:[#allocation13 + $0x40] sm:$0xff] }
 0x936   :  { %v3666_v12 = vmul.f32 -1.442695, %v5385_v56  ;;  %v5351_v56 = vpack.c.bf16 %v3487_v52, %v3486_v39 }
 0x937   :  { %v3667_v18 = vmul.f32 -1.442695, %v5386_v7  ;;  %v3668_v37 = vmul.f32 -1.442695, %v5402_v32  ;;  %v3490_v7 = vld [vmem:[#allocation13 + $0x30] sm:$0xff]  ;;  %v3493_v32 = vld [vmem:[#allocation13 + $0x48] sm:$0xff] }
 0x938   :  { %5671 = vpow2.f32 %v3666_v12  ;;  %v3491_v12 = vld [vmem:[#allocation13 + $0x38] sm:$0xff] }
 0x939   :  { %5673 = vpow2.f32 %v3667_v18  ;;  %v5357_v18 = vpack.c.bf16 %v3491_v12, %v3490_v7 }
 0x93a   :  { %5675 = vpow2.f32 %v3668_v37  ;;  %v3495_v37 = vld [vmem:[#allocation13 + $0x58] sm:$0xff] }
 0x93b   :  { %5677 = vtanh.f32 %v5401_v45 }
 0x93f   :  { %v5670_v36 = vpop.eup %5669 }
 0x940   :  { %v3038_v57 = vmul.f32 %v5670_v36, %v5668_v13  ;;  %v5360_v13 = vpack.c.bf16 %v3493_v32, %v3492_v27  ;;  %v3494_v36 = vld [vmem:[#allocation13 + $0x50] sm:$0xff] }
 0x941   :  { %v5363_v45 = vpack.c.bf16 %v3495_v37, %v3494_v36 }
 0x942   :  { %v5672_v59 = vpop.eup %5671  ;;  %3280 = vmatprep.mubr.f32.mxu0 %v3038_v57  ;;  %3351 = vmatprep.mubr.f32.mxu1 %v3038_v57  ;;  %v3496_v57 = vld [vmem:[#allocation13 + $0x60] sm:$0xff] }
 0x943   :  { %v5674_v62 = vpop.eup %5673  ;;  %v3195_v6 = vadd.f32 1.0, %v5672_v59  ;;  %v3497_v59 = vld [vmem:[#allocation13 + $0x68] sm:$0xff] }
 0x944   :  { %v3201_v26 = vadd.f32 1.0, %v5674_v62  ;;  %v5676_v0 = vpop.eup %5675  ;;  %v5366_v62 = vpack.c.bf16 %v3497_v59, %v3496_v57 }
 0x945   :  { %5679 = vrcp.f32 %v3195_v6  ;;  %v5678_v23 = vpop.eup %5677  ;;  %v3208_v31 = vadd.f32 1.0, %v5676_v0 }
 0x946   :  { %5681 = vrcp.f32 %v3201_v26 }
 0x947   :  { %5683 = vrcp.f32 %v3208_v31 }
 0x94f   :  { %v5680_v63 = vpop.eup %5679 }
 0x950   :  { %v5682_v14 = vpop.eup %5681  ;;  %v3212_v48 = vmul.f32 %v5680_v63, %v5678_v23 }
 0x951   :  { %v3211_v49 = vmul.f32 %v5682_v14, %v7054_v51  ;;  %v5684_v40 = vpop.eup %5683  ;;  %v3392_v51 = vld [vmem:[#allocation12 + $0x10] sm:$0xff] }
 0x952   :  { %v5327_v10 = vpack.c.bf16 %v3393_v21, %v3392_v51 }
 0x953   :  { %v3213_v30 = vadd.f32 %v3212_v48, %v3211_v49 }
 0x955   :  { %5685 = vtanh.f32 %v3213_v30 }
 0x95f   :  { %v5686_v55 = vpop.eup %5685 }
 0x960   :  { %v3215_v16 = vmul.f32 %v5686_v55, %v5684_v40 }
 0x962   :  { %3281 = vmatmul.mubr.f32.vlgmr.msra.gmra.mrb[30].mxu0 %v3215_v16  ;;  %3352 = vmatmul.mubr.f32.vlgmr.msra.gmra.mrb[30].mxu1 %v3215_v16 }
 0x963   :  { %5325 = vmatpush3.bf16.msra.mxu0 %v5324_v9  ;;  %3741 = vmatprep.mubr.msk.f32.mxu0 %vm5835_vm1, %v7412_v4 }
 0x964   :  { %5326 = vmatprep.subr.bf16.mxu0 %v5834_v41  ;;  %3776 = vmatprep.mubr.msk.f32.mxu1 %vm5835_vm1, %v7412_v4  ;;  %v3488_v4 = vld [vmem:[#allocation13 + $0x20] sm:$0xff] }
 0x965   :  { %5349 = vmatpush3.bf16.msra.mxu1 %v5348_v43  ;;  %v5354_v1 = vpack.c.bf16 %v3489_v60, %v3488_v4 }
 0x966   :  { %5350 = vmatprep.subr.bf16.mxu1 %v5834_v41 }
 0x967   :  { %5328 = vmatpush3.bf16.msra.mxu0 %v5327_v10 }
 0x968   :  { %5329 = vmatprep.subr.bf16.mxu0 %v5834_v41 }
 0x969   :  { %5352 = vmatpush3.bf16.msra.mxu1 %v5351_v56 }
 0x96a   :  { %5353 = vmatprep.subr.bf16.mxu1 %v5834_v41 }
 0x96b   :  { %5331 = vmatpush3.bf16.msra.mxu0 %v5330_v29  ;;  %v3498_v29 = vld [vmem:[#allocation13 + $0x70] sm:$0xff] }
 0x96c   :  { %5332 = vmatprep.subr.bf16.mxu0 %v5834_v41  ;;  %v5369_v35 = vpack.c.bf16 %v3499_v34, %v3498_v29 }
 0x96d   :  { %5355 = vmatpush3.bf16.msra.mxu1 %v5354_v1 }
 0x96e   :  { %5356 = vmatprep.subr.bf16.mxu1 %v5834_v41 }
 0x96f   :  { %5334 = vmatpush3.bf16.msra.mxu0 %v5333_v38  ;;  %v3672_v38 = vld [vmem:[%s7214_s7] ss:$0 sm:$0xff]  ;;  %s5795_s7 = scalar_lea.vmem %s3591_s12, 128 }
 0x970   :  { %5335 = vmatprep.subr.bf16.mxu0 %v5834_v41  ;;  %p5796_p4 = scmp.ne.s32.totalorder %s3591_s12, %s5795_s7  ;;  %p5801_p6 = scmp.lt.s32.totalorder %s5795_s7, %s5795_s7 }
 0x971   :  { %5358 = vmatpush3.bf16.msra.mxu1 %v5357_v18 }
 0x972   :  { %5359 = vmatprep.subr.bf16.mxu1 %v5834_v41  ;;  %p5802_p7 = por %p5801_p6, %p5800_p5 }
 0x973   :  { %5337 = vmatpush3.bf16.msra.mxu0 %v5336_v54 }
 0x974   :  { %5338 = vmatprep.subr.bf16.mxu0 %v5834_v41  ;;  %p5803_p8 = pnand %p5802_p7, %p5796_p4 }
 0x975   :  { %5361 = vmatpush3.bf16.msra.mxu1 %v5360_v13 }
 0x976   :  { %5362 = vmatprep.subr.bf16.mxu1 %v5834_v41 }
 0x977   :  { %5340 = vmatpush3.bf16.msra.mxu0 %v5339_v5 }
 0x978   :  { %5341 = vmatprep.subr.bf16.mxu0 %v5834_v41 }
 0x979   :  { %5364 = vmatpush3.bf16.msra.mxu1 %v5363_v45 }
 0x97a   :  { %5365 = vmatprep.subr.bf16.mxu1 %v5834_v41 }
 0x97b   :  { %5343 = vmatpush3.bf16.msra.mxu0 %v5342_v11 }
 0x97c   :  { %5344 = vmatprep.subr.bf16.mxu0 %v5834_v41 }
 0x97d   :  { %5367 = vmatpush3.bf16.msra.mxu1 %v5366_v62 }
 0x97e   :  { %5368 = vmatprep.subr.bf16.mxu1 %v5834_v41 }
 0x97f   :  { %5346 = vmatpush3.bf16.msra.mxu0 %v5345_v24 }
 0x981   :  { %5370 = vmatpush3.bf16.msra.mxu1 %v5369_v35 }
 0xa35   :  { %v3282_v6 = vpop.f32.mrb[30].mxu0  ;;  %v3353_v26 = vpop.f32.mrb[30].mxu1 }
 0xa36   :  { %v3283_v0 = vadd.f32 %v3282_v6, %v7829_v44  ;;  %v3284_v23 = vpop.f32.mrb[31].mxu0  ;;  %v3355_v63 = vpop.f32.mrb[31].mxu1  ;;  %v3354_v40 = vadd.f32 %v3353_v26, %v7532_v53 }
 0xa37   :  { %v3285_v14 = vadd.f32 %v3284_v23, %v7530_v17  ;;  %v3356_v49 = vadd.f32 %v3355_v63, %v7830_v42 }
 0xa38   :  { %v3669_v48 = vmul.f32 -1.442695, %v3283_v0 }
 0xa39   :  { %v3670_v31 = vmul.f32 -1.442695, %v3285_v14  ;;  %v3671_v30 = vmul.f32 -1.442695, %v3356_v49 }
 0xa3a   :  { %5687 = vpow2.f32 %v3669_v48 }
 0xa3b   :  { %5689 = vpow2.f32 %v3670_v31 }
 0xa3c   :  { %5691 = vpow2.f32 %v3671_v30 }
 0xa3d   :  { %5693 = vtanh.f32 %v3354_v40 }
 0xa44   :  { %v5688_v55 = vpop.eup %5687 }
 0xa45   :  { %v5690_v16 = vpop.eup %5689  ;;  %v3361_v20 = vadd.f32 1.0, %v5688_v55 }
 0xa46   :  { %v3367_v3 = vadd.f32 1.0, %v5690_v16  ;;  %v5692_v44 = vpop.eup %5691 }
 0xa47   :  { %5695 = vrcp.f32 %v3361_v20  ;;  %v5694_v9 = vpop.eup %5693  ;;  %v3374_v21 = vadd.f32 1.0, %v5692_v44 }
 0xa48   :  { %5697 = vrcp.f32 %v3367_v3 }
 0xa49   :  { %5699 = vrcp.f32 %v3374_v21 }
 0xa51   :  { %v5696_v17 = vpop.eup %5695 }
 0xa52   :  { %v5698_v41 = vpop.eup %5697  ;;  %v3378_v51 = vmul.f32 %v5696_v17, %v5694_v9 }
 0xa53   :  { %v3377_v10 = vmul.f32 %v5698_v41, %v7158_v46  ;;  %v5700_v53 = vpop.eup %5699  ;;  %v3673_v46 = vld [vmem:[%s7216_s9] ss:$0 sm:$0xff] }
 0xa55   :  { %v3379_v42 = vadd.f32 %v3378_v51, %v3377_v10 }
 0xa57   :  { %5701 = vtanh.f32 %v3379_v42 }
 0xa61   :  { %v5702_v22 = vpop.eup %5701 }
 0xa62   :  { %v3381_v25 = vmul.f32 %v5702_v22, %v5700_v53 }
 0xa64   :  { %3742 = vmatmul.mubr.f32.vlgmr.msra.gmra.mrb[32].mxu0 %v3381_v25 }
 0xb37   :  { %v3479_v47 = vpop.f32.mrb[32].mxu0 }
 0xb38   :  { %v3480_v50 = vadd.f32 %v3672_v38, %v3479_v47  ;;  %v3743_v54 = vpop.f32.mrb[33].mxu0 }
 0xb3a   :  { %v3483_v58 = vmax.f32 %v3480_v50, 0.0 }
 0xb3c   :  { %3777 = vmatmul.mubr.f32.vlgmr.msra.gmra.mrb[32].mxu1 %v3483_v58 }
 0xc0f   :  { %v3573_v61 = vpop.f32.mrb[32].mxu1 }
 0xc10   :  { %v3574_v2 = vadd.f32 %v3673_v46, %v3573_v61  ;;  %v3778_v5 = vpop.f32.mrb[33].mxu1 }
 0xc12   :  { %v3674_v8 = vmul.f32 -1.442695, %v3574_v2 }
 0xc14   :  { %5703 = vpow2.f32 %v3674_v8 }
 0xc1e   :  { %v5704_v11 = vpop.eup %5703 }
 0xc1f   :  { %v3580_v15 = vadd.f32 1.0, %v5704_v11 }
 0xc21   :  { %5705 = vrcp.f32 %v3580_v15 }
 0xc2b   :  { %v5706_v19 = vpop.eup %5705 }
 0xc2c   :  { %3583 = vst [vmem:[#allocation15] sm:$0xff] %v5706_v19 }
 0xc2d   :  { %5806 = shalt.err (!%p5803_p8)
}
 0xc2e   :  { %s5807_s15 = scalar_lea.hbm %s7217_s10, 128 }
 0xc2f   :  { %p5808_p9 = scmp.ne.s32.totalorder %s7217_s10, %s5807_s15  ;;  %p5811_p10 = scmp.lt.u32.totalorder %s5807_s15, %s7217_s10 }
 0xc31   :  { %p5813_p11 = pnand %p5811_p10, %p5808_p9 }
 0xc33   :  { %5816 = shalt.err (!%p5813_p11)
}
 0xc34   :  { %3593 = dma.vmem_to_hbm [thread:$0]  %s3591_s12, 128, %s7217_s10, [#allocation9]  }
 0xc35   :  { %5823 = dma.done.wait [#allocation9], 128  }
 0xc36   :  { %5824 = vsyncadd [#allocation9], 4294967168 }
 0xc37   :  { %3597 = vsyncpa [#allocation8], 1 }
 0xc38   :  { %3598 = vsyncpa [#allocation11], 1 }
 0xc39   :  { %3599 = vsyncpa [#allocation14], 1 }
 0xc3a   :  { %3600 = vsyncpa [#allocation9], 1 }

</bundles_post_ra>
